<compile_context>
chip_gen: v7x
topology: tpu7x:2x2x1
jax: 0.10.0
libtpu: 0.0.40
codegen_flags: <defaults>
</compile_context>

<pallas_src>
import functools

import jax
import jax.numpy as jnp
from jax import lax
from jax.experimental import pallas as pl
from jax.experimental.pallas import tpu as pltpu

EPS = 1e-6
LANE = 128


def _round_up(x, m):
    return ((x + m - 1) // m) * m


# --------------------------------------------------------------------------------------
# Fused kernel: GTConv mix + softmax-norm + adjacency product chain + GCN head.
#   grid = (P, L+1); layer axis 'arbitrary'; running product M lives in a VMEM scratch.
# --------------------------------------------------------------------------------------
def _hlhia_fused_kernel(
    w_ref, adj_ref, fw_ref, b_ref, o_ref, m_ref, *, num_rels, num_paths, n_valid, eps
):
    # w_ref  : SMEM (L1*P*R,) f32   per-layer GTConv mixing weights (scalar prefetch)
    # adj_ref: VMEM (R, Np, Np) bf16 relation adjacencies (fully resident, one copy)
    # fw_ref : VMEM (P, Np, Dhp) bf16 feat @ Wg[p] (GCN matmul reordered to K = N)
    # b_ref  : VMEM (P, 1, Dhp) f32  GCN bias (lane padded with zeros)
    # o_ref  : VMEM (1, 1, Np, Dhp) f32 GCN features for (meta-path p, layer j)
    # m_ref  : VMEM scratch (Np, Np) f32 running adjacency product, carried across j
    p = pl.program_id(0)
    j = pl.program_id(1)
    base = (j * num_paths + p) * num_rels
    n_pad = m_ref.shape[0]

    row_i = lax.broadcasted_iota(jnp.int32, (n_pad, n_pad), 0)
    col_i = lax.broadcasted_iota(jnp.int32, (n_pad, n_pad), 1)

    # --- GTConv: S = sum_r W[j, p, r] * adjs[r]  (VPU, f32 accumulation) ----------------
    s = w_ref[base] * adj_ref[0].astype(jnp.float32)
    for r in range(1, num_rels):
        s = s + w_ref[base + r] * adj_ref[r].astype(jnp.float32)

    def _softmax_norm(x):
        # HMAELayer.softmax_norm == exp + EdgeWeightNorm(norm='right').
        # NOTE: no max-subtraction, to match the torch module / reference exactly;
        #       assumes GTConv outputs stay well below f32 exp overflow.
        e = jnp.exp(x)
        if n_valid < n_pad:  # exclude lane/sublane padding from the in-weight sums
            e = jnp.where((row_i < n_valid) & (col_i < n_valid), e, 0.0)
        denom = jnp.sum(e, axis=0, keepdims=True) + eps
        return e * pl.reciprocal(denom, approx=True)

    # --- HMAE chain: M stays resident in f32 VMEM, bf16 MXU operands --------------------
    @pl.when(j == 0)
    def _():  # first_graph_list entry: normalized conv1 of the first HMAELayer
        m_ref[...] = _softmax_norm(s)

    @pl.when(j == 1)
    def _():  # first HMAELayer product: A_norm @ B_norm
        m_ref[...] = jnp.dot(
            m_ref[...].astype(jnp.bfloat16),
            _softmax_norm(s).astype(jnp.bfloat16),
            preferred_element_type=jnp.float32,
        )

    @pl.when(j >= 2)
    def _():  # later HMAELayers (first=False): M @ raw GTConv output
        m_ref[...] = jnp.dot(
            m_ref[...].astype(jnp.bfloat16),
            s.astype(jnp.bfloat16),
            preferred_element_type=jnp.float32,
        )

    # --- GCN head on the current layer graph ---------------------------------------------
    g = m_ref[...]
    ghat = jnp.where(row_i == col_i, 0.0, g)               # dgl.remove_self_loop
    denom = jnp.sum(ghat, axis=0, keepdims=True) + eps     # EdgeWeightNorm(norm='right')
    gn = ghat * pl.reciprocal(denom, approx=True)
    h = jnp.dot(gn.astype(jnp.bfloat16), fw_ref[p],        # (Np, Dhp), contraction K = Np
                preferred_element_type=jnp.float32)
    h = h + b_ref[p]
    o_ref[0, 0] = jnp.maximum(h, 0.0).astype(o_ref.dtype)  # F.relu


# --------------------------------------------------------------------------------------
# Full HLHIA forward
# --------------------------------------------------------------------------------------
def hlhia_forward(adjs, feat, params, *, eps=EPS):
    """Returns (nested list[P][num_layers+1] of (N, hidden), stacked (P, L+1, N, hidden))."""
    w1_list = params["conv1_weights"]        # one (P, R) per HMAELayer
    w2_0 = params["conv2_weight_layer0"]     # (P, R), only used by the first layer
    wg = params["gcn_weight"]                # (P, Din, Dh)
    bg = params["gcn_bias"]                  # (P, Dh)

    R, N, _ = adjs.shape
    P, Din, Dh = wg.shape
    num_layers = len(w1_list)
    L1 = num_layers + 1

    Np = _round_up(N, LANE)                  # lane / MXU-tile aligned node count
    Dhp = _round_up(Dh, LANE)                # lane-dense hidden dim

    # Per-output-layer GTConv mixing weights:
    #   layer 0    -> conv1 of HMAELayer 0 (normalized; becomes first_graph_list / M)
    #   layer 1    -> conv2 of HMAELayer 0 (normalized; right-multiplied into M)
    #   layer j>=2 -> conv1 of HMAELayer j-1 (raw; right-multiplied into M)
    w_layers = [w1_list[0], w2_0] + [w1_list[i] for i in range(1, num_layers)]
    w_flat = jnp.stack(w_layers, axis=0).astype(jnp.float32).reshape(-1)  # (L1*P*R,)

    # bf16 operands in HBM / VMEM (f32 accumulation stays inside the kernel).
    adjs_bf16 = jnp.pad(
        adjs.astype(jnp.float32), ((0, 0), (0, Np - N), (0, Np - N))
    ).astype(jnp.bfloat16)                                                # (R, Np, Np)
    feat_p = jnp.pad(feat.astype(jnp.float32), ((0, Np - N), (0, 0)))     # (Np, Din)
    wg_p = jnp.pad(wg.astype(jnp.float32), ((0, 0), (0, 0), (0, Dhp - Dh)))
    # GCN matmul reorder: tiny K = Din GEMM done once by XLA, stored bf16.
    fw = jnp.einsum("nd,pde->pne", feat_p, wg_p).astype(jnp.bfloat16)     # (P, Np, Dhp)
    bg_p = jnp.pad(bg.astype(jnp.float32), ((0, 0), (0, Dhp - Dh))).reshape(P, 1, Dhp)

    # Explicit scoped-VMEM budget: resident inputs + scratch + output buffers + temps,
    # with headroom, clamped to [32 MiB, 64 MiB] (64 MiB = v7x per-TC physical ceiling).
    need = (
        R * Np * Np * 2            # adjs (bf16, single resident copy)
        + P * Np * Dhp * 2         # fw   (bf16)
        + P * Dhp * 4              # bias
        + Np * Np * 4              # m_ref scratch
        + 2 * Np * Dhp * 4         # double-buffered output block
        + 8 * Np * Np * 4          # elementwise temps (s, exp, masks, bf16 casts, ...)
    )
    vmem_limit = int(min(max(int(need * 1.5), 32 * 1024 * 1024), 64 * 1024 * 1024))

    kernel = functools.partial(
        _hlhia_fused_kernel, num_rels=R, num_paths=P, n_valid=N, eps=eps
    )

    def _run(resident_inputs):
        if resident_inputs:
            # Whole-array VMEM residency: one copy, no double-buffering of constants.
            in_specs = [
                pl.BlockSpec(memory_space=pltpu.MemorySpace.VMEM),   # adjs
                pl.BlockSpec(memory_space=pltpu.MemorySpace.VMEM),   # fw
                pl.BlockSpec(memory_space=pltpu.MemorySpace.VMEM),   # bias
            ]
        else:
            # Fallback: full-array blocks with constant index maps (never re-DMA'd).
            in_specs = [
                pl.BlockSpec((R, Np, Np), lambda p, j, w: (0, 0, 0)),
                pl.BlockSpec((P, Np, Dhp), lambda p, j, w: (0, 0, 0)),
                pl.BlockSpec((P, 1, Dhp), lambda p, j, w: (0, 0, 0)),
            ]
        return pl.pallas_call(
            kernel,
            out_shape=jax.ShapeDtypeStruct((P, L1, Np, Dhp), jnp.float32),
            grid_spec=pltpu.PrefetchScalarGridSpec(
                num_scalar_prefetch=1,
                grid=(P, L1),
                in_specs=in_specs,
                out_specs=pl.BlockSpec((1, 1, Np, Dhp), lambda p, j, w: (p, j, 0, 0)),
                scratch_shapes=[pltpu.VMEM((Np, Np), jnp.float32)],
            ),
            compiler_params=pltpu.CompilerParams(
                dimension_semantics=("parallel", "arbitrary"),
                vmem_limit_bytes=vmem_limit,
            ),
        )(w_flat, adjs_bf16, fw, bg_p)

    try:
        out_pad = _run(resident_inputs=True)
    except Exception:
        # If whole-array VMEM operand residency is not supported by this JAX build,
        # fall back to the conventional (double-buffered) blocked specs.
        out_pad = _run(resident_inputs=False)

    out = out_pad[:, :, :N, :Dh]             # drop lane / node padding
    nested = [[out[p, j] for j in range(L1)] for p in range(P)]
    return nested, out


# --------------------------------------------------------------------------------------
# Pure-JAX f32 reference (same dense-graph math) for correctness checking
# --------------------------------------------------------------------------------------
def hlhia_reference(adjs, feat, params, eps=EPS):
    hp = lax.Precision.HIGHEST
    w1_list = params["conv1_weights"]
    w2_0 = params["conv2_weight_layer0"]
    wg = params["gcn_weight"]
    bg = params["gcn_bias"]

    def gtc(w):
        return jnp.einsum("pr,ruv->puv", w, adjs, precision=hp)

    def norm(s):
        e = jnp.exp(s)
        return e / (jnp.sum(e, axis=1, keepdims=True) + eps)

    ra = norm(gtc(w1_list[0]))
    rb = norm(gtc(w2_0))
    layers = [ra]
    m = jnp.einsum("puw,pwv->puv", ra, rb, precision=hp)
    layers.append(m)
    for i in range(1, len(w1_list)):
        b = gtc(w1_list[i])
        m = jnp.einsum("puw,pwv->puv", m, b, precision=hp)
        layers.append(m)
    ls = jnp.stack(layers, axis=1)                       # (P, L+1, N, N)

    n = adjs.shape[1]
    eye = jnp.eye(n, dtype=ls.dtype)
    ghat = ls * (1.0 - eye)
    denom = jnp.sum(ghat, axis=2, keepdims=True) + eps
    gn = ghat / denom
    agg = jnp.einsum("pjuv,vd->pjud", gn, feat, precision=hp)
    h = jnp.einsum("pjud,pde->pjue", agg, wg, precision=hp) + bg[:, None, None, :]
    return jnp.maximum(h, 0.0)


# --------------------------------------------------------------------------------------
if __name__ == "__main__":
    N = 16                 # number of graph nodes
    INPUT_DIM = 8
    HIDDEN_DIM = 32
    NUM_META_RELS = 4      # len(graph_list)
    NUM_META_PATHS = 3
    NUM_LAYERS = 2

    key = jax.random.PRNGKey(0)
    k_adj, k_feat, k_w1, k_w2, k_wg = jax.random.split(key, 5)

    # dense positive edge weights g.edata['w'] and node features
    adjs = jax.random.uniform(
        k_adj, (NUM_META_RELS, N, N), jnp.float32, minval=0.1, maxval=1.0
    )
    feat = jax.random.normal(k_feat, (N, INPUT_DIM), dtype=jnp.float32)

    # deterministic synthetic parameters (GTConv: normal std=0.01; GCN: xavier-ish, zero bias)
    w1_keys = jax.random.split(k_w1, NUM_LAYERS)
    params = {
        "conv1_weights": [
            0.01
            * jax.random.normal(
                w1_keys[i], (NUM_META_PATHS, NUM_META_RELS), dtype=jnp.float32
            )
            for i in range(NUM_LAYERS)
        ],
        "conv2_weight_layer0": 0.01
        * jax.random.normal(k_w2, (NUM_META_PATHS, NUM_META_RELS), dtype=jnp.float32),
        "gcn_weight": jax.random.normal(
            k_wg, (NUM_META_PATHS, INPUT_DIM, HIDDEN_DIM), dtype=jnp.float32
        )
        * (2.0 / (INPUT_DIM + HIDDEN_DIM)) ** 0.5,
        "gcn_bias": jnp.zeros((NUM_META_PATHS, HIDDEN_DIM), dtype=jnp.float32),
    }

    nested, out = hlhia_forward(adjs, feat, params)
    out = jax.block_until_ready(out)

    assert out.shape == (NUM_META_PATHS, NUM_LAYERS + 1, N, HIDDEN_DIM)
    assert len(nested) == NUM_META_PATHS and len(nested[0]) == NUM_LAYERS + 1

    ref = hlhia_reference(adjs, feat, params)
    max_err = float(jnp.max(jnp.abs(out - ref)))
    # bf16 MXU operands (adjs / chain / GCN matmuls) + approx EUP reciprocals vs. an f32
    # HIGHEST-precision reference -> relaxed tolerance.
    assert jnp.allclose(out, ref, atol=5e-2, rtol=5e-2), f"max abs err {max_err}"

    print("KERNEL_OK")
</pallas_src>

<mosaic_0001>
module attributes {stable_mosaic.version = 11 : i64} {
  func.func @_hlhia_fused_kernel(%arg0: i32, %arg1: i32, %arg2: memref<36xf32, #tpu.memory_space<smem>>, %arg3: memref<4x128x128xbf16, #tpu.memory_space<vmem>>, %arg4: memref<3x128x128xbf16, #tpu.memory_space<vmem>>, %arg5: memref<3x1x128xf32, #tpu.memory_space<vmem>>, %arg6: memref<1x1x128x128xf32, #tpu.memory_space<vmem>>, %arg7: memref<128x128xf32, #tpu.memory_space<vmem>>) attributes {dimension_semantics = [#tpu.dimension_semantics<parallel>, #tpu.dimension_semantics<arbitrary>], iteration_bounds = array<i64: 3, 3>, scalar_prefetch = 1 : i64, scratch_operands = 1 : i64, tpu.core_type = #tpu.core_type<tc>, window_params = [{pipeline_mode = #tpu.pipeline_mode<synchronous>, transform_indices = @transform_0, window_bounds = array<i64: 4, 128, 128>}, {pipeline_mode = #tpu.pipeline_mode<synchronous>, transform_indices = @transform_1, window_bounds = array<i64: 3, 128, 128>}, {pipeline_mode = #tpu.pipeline_mode<synchronous>, transform_indices = @transform_2, window_bounds = array<i64: 3, 1, 128>}, {transform_indices = @transform_3, window_bounds = array<i64: 1, 1, 128, 128>}]} {
    %c3_i32 = arith.constant 3 : i32
    %0 = arith.muli %arg1, %c3_i32 : i32
    %1 = arith.addi %0, %arg0 : i32
    %c4_i32 = arith.constant 4 : i32
    %2 = arith.muli %1, %c4_i32 : i32
    %3 = tpu.iota {dimensions = array<i32: 0>} : vector<128x128xi32>
    %4 = tpu.iota {dimensions = array<i32: 1>} : vector<128x128xi32>
    %5 = arith.index_cast %2 : i32 to index
    %6 = memref.load %arg2[%5] : memref<36xf32, #tpu.memory_space<smem>>
    %c0 = arith.constant 0 : index
    %c0_0 = arith.constant 0 : index
    %c0_1 = arith.constant 0 : index
    %7 = vector.load %arg3[%c0, %c0_0, %c0_1] : memref<4x128x128xbf16, #tpu.memory_space<vmem>>, vector<1x128x128xbf16>
    %8 = vector.shape_cast %7 : vector<1x128x128xbf16> to vector<128x128xbf16>
    %9 = arith.extf %8 : vector<128x128xbf16> to vector<128x128xf32>
    %10 = vector.broadcast %6 : f32 to vector<128x128xf32>
    %11 = arith.mulf %10, %9 : vector<128x128xf32>
    %c1_i32 = arith.constant 1 : i32
    %12 = arith.addi %2, %c1_i32 : i32
    %13 = arith.index_cast %12 : i32 to index
    %14 = memref.load %arg2[%13] : memref<36xf32, #tpu.memory_space<smem>>
    %c1 = arith.constant 1 : index
    %c0_2 = arith.constant 0 : index
    %c0_3 = arith.constant 0 : index
    %15 = vector.load %arg3[%c1, %c0_2, %c0_3] : memref<4x128x128xbf16, #tpu.memory_space<vmem>>, vector<1x128x128xbf16>
    %16 = vector.shape_cast %15 : vector<1x128x128xbf16> to vector<128x128xbf16>
    %17 = arith.extf %16 : vector<128x128xbf16> to vector<128x128xf32>
    %18 = vector.broadcast %14 : f32 to vector<128x128xf32>
    %19 = arith.mulf %18, %17 : vector<128x128xf32>
    %20 = arith.addf %11, %19 : vector<128x128xf32>
    %c2_i32 = arith.constant 2 : i32
    %21 = arith.addi %2, %c2_i32 : i32
    %22 = arith.index_cast %21 : i32 to index
    %23 = memref.load %arg2[%22] : memref<36xf32, #tpu.memory_space<smem>>
    %c2 = arith.constant 2 : index
    %c0_4 = arith.constant 0 : index
    %c0_5 = arith.constant 0 : index
    %24 = vector.load %arg3[%c2, %c0_4, %c0_5] : memref<4x128x128xbf16, #tpu.memory_space<vmem>>, vector<1x128x128xbf16>
    %25 = vector.shape_cast %24 : vector<1x128x128xbf16> to vector<128x128xbf16>
    %26 = arith.extf %25 : vector<128x128xbf16> to vector<128x128xf32>
    %27 = vector.broadcast %23 : f32 to vector<128x128xf32>
    %28 = arith.mulf %27, %26 : vector<128x128xf32>
    %29 = arith.addf %20, %28 : vector<128x128xf32>
    %c3_i32_6 = arith.constant 3 : i32
    %30 = arith.addi %2, %c3_i32_6 : i32
    %31 = arith.index_cast %30 : i32 to index
    %32 = memref.load %arg2[%31] : memref<36xf32, #tpu.memory_space<smem>>
    %c3 = arith.constant 3 : index
    %c0_7 = arith.constant 0 : index
    %c0_8 = arith.constant 0 : index
    %33 = vector.load %arg3[%c3, %c0_7, %c0_8] : memref<4x128x128xbf16, #tpu.memory_space<vmem>>, vector<1x128x128xbf16>
    %34 = vector.shape_cast %33 : vector<1x128x128xbf16> to vector<128x128xbf16>
    %35 = arith.extf %34 : vector<128x128xbf16> to vector<128x128xf32>
    %36 = vector.broadcast %32 : f32 to vector<128x128xf32>
    %37 = arith.mulf %36, %35 : vector<128x128xf32>
    %38 = arith.addf %29, %37 : vector<128x128xf32>
    %c0_i32 = arith.constant 0 : i32
    %39 = arith.cmpi eq, %arg1, %c0_i32 : i32
    %40 = arith.extui %39 : i1 to i32
    %c0_i32_9 = arith.constant 0 : i32
    %41 = arith.cmpi ne, %40, %c0_i32_9 : i32
    scf.if %41 {
      %74 = math.exp %38 : vector<128x128xf32>
      %c16_i32 = arith.constant 16 : i32
      %75 = vector.broadcast %c16_i32 : i32 to vector<128x128xi32>
      %76 = arith.cmpi slt, %3, %75 : vector<128x128xi32>
      %c16_i32_28 = arith.constant 16 : i32
      %77 = vector.broadcast %c16_i32_28 : i32 to vector<128x128xi32>
      %78 = arith.cmpi slt, %4, %77 : vector<128x128xi32>
      %79 = arith.andi %76, %78 : vector<128x128xi1>
      %cst_29 = arith.constant 0.000000e+00 : f32
      %80 = vector.broadcast %cst_29 : f32 to vector<128x128xf32>
      %81 = arith.select %79, %74, %80 : vector<128x128xi1>, vector<128x128xf32>
      %cst_30 = arith.constant dense<0.000000e+00> : vector<128xf32>
      %82 = vector.multi_reduction <add>, %81, %cst_30 [0] : vector<128x128xf32> to vector<128xf32>
      %83 = vector.shape_cast %82 : vector<128xf32> to vector<1x128xf32>
      %cst_31 = arith.constant 9.99999997E-7 : f32
      %84 = vector.broadcast %cst_31 : f32 to vector<1x128xf32>
      %85 = arith.addf %83, %84 : vector<1x128xf32>
      %86 = tpu.reciprocal %85 {approx = true} : vector<1x128xf32> -> vector<1x128xf32>
      %87 = vector.broadcast %86 : vector<1x128xf32> to vector<128x128xf32>
      %88 = arith.mulf %81, %87 : vector<128x128xf32>
      %c0_32 = arith.constant 0 : index
      %c0_33 = arith.constant 0 : index
      %89 = vector.load %arg7[%c0_32, %c0_33] : memref<128x128xf32, #tpu.memory_space<vmem>>, vector<128x128xf32>
      tpu.vector_store %arg7[%c0_32, %c0_33], %88 {strides = array<i32>} : memref<128x128xf32, #tpu.memory_space<vmem>>, vector<128x128xf32>,
    } else {
    }
    %c1_i32_10 = arith.constant 1 : i32
    %42 = arith.cmpi eq, %arg1, %c1_i32_10 : i32
    %43 = arith.extui %42 : i1 to i32
    %c0_i32_11 = arith.constant 0 : i32
    %44 = arith.cmpi ne, %43, %c0_i32_11 : i32
    scf.if %44 {
      %c0_28 = arith.constant 0 : index
      %c0_29 = arith.constant 0 : index
      %74 = vector.load %arg7[%c0_28, %c0_29] : memref<128x128xf32, #tpu.memory_space<vmem>>, vector<128x128xf32>
      %75 = arith.truncf %74 : vector<128x128xf32> to vector<128x128xbf16>
      %76 = math.exp %38 : vector<128x128xf32>
      %c16_i32 = arith.constant 16 : i32
      %77 = vector.broadcast %c16_i32 : i32 to vector<128x128xi32>
      %78 = arith.cmpi slt, %3, %77 : vector<128x128xi32>
      %c16_i32_30 = arith.constant 16 : i32
      %79 = vector.broadcast %c16_i32_30 : i32 to vector<128x128xi32>
      %80 = arith.cmpi slt, %4, %79 : vector<128x128xi32>
      %81 = arith.andi %78, %80 : vector<128x128xi1>
      %cst_31 = arith.constant 0.000000e+00 : f32
      %82 = vector.broadcast %cst_31 : f32 to vector<128x128xf32>
      %83 = arith.select %81, %76, %82 : vector<128x128xi1>, vector<128x128xf32>
      %cst_32 = arith.constant dense<0.000000e+00> : vector<128xf32>
      %84 = vector.multi_reduction <add>, %83, %cst_32 [0] : vector<128x128xf32> to vector<128xf32>
      %85 = vector.shape_cast %84 : vector<128xf32> to vector<1x128xf32>
      %cst_33 = arith.constant 9.99999997E-7 : f32
      %86 = vector.broadcast %cst_33 : f32 to vector<1x128xf32>
      %87 = arith.addf %85, %86 : vector<1x128xf32>
      %88 = tpu.reciprocal %87 {approx = true} : vector<1x128xf32> -> vector<1x128xf32>
      %89 = vector.broadcast %88 : vector<1x128xf32> to vector<128x128xf32>
      %90 = arith.mulf %83, %89 : vector<128x128xf32>
      %91 = arith.truncf %90 : vector<128x128xf32> to vector<128x128xbf16>
      %cst_34 = arith.constant dense<0.000000e+00> : vector<128x128xf32>
      %92 = tpu.matmul %75, %91, %cst_34 {dimension_numbers = #tpu.dot_dimension_numbers<[1], [0], [0], [1], [0, 0, 1, 1], [], []>} : vector<128x128xbf16>, vector<128x128xbf16>, vector<128x128xf32> -> vector<128x128xf32>
      %c0_35 = arith.constant 0 : index
      %c0_36 = arith.constant 0 : index
      %93 = vector.load %arg7[%c0_35, %c0_36] : memref<128x128xf32, #tpu.memory_space<vmem>>, vector<128x128xf32>
      tpu.vector_store %arg7[%c0_35, %c0_36], %92 {strides = array<i32>} : memref<128x128xf32, #tpu.memory_space<vmem>>, vector<128x128xf32>,
    } else {
    }
    %c2_i32_12 = arith.constant 2 : i32
    %45 = arith.cmpi sge, %arg1, %c2_i32_12 : i32
    %46 = arith.extui %45 : i1 to i32
    %c0_i32_13 = arith.constant 0 : i32
    %47 = arith.cmpi ne, %46, %c0_i32_13 : i32
    scf.if %47 {
      %c0_28 = arith.constant 0 : index
      %c0_29 = arith.constant 0 : index
      %74 = vector.load %arg7[%c0_28, %c0_29] : memref<128x128xf32, #tpu.memory_space<vmem>>, vector<128x128xf32>
      %75 = arith.truncf %74 : vector<128x128xf32> to vector<128x128xbf16>
      %76 = arith.truncf %38 : vector<128x128xf32> to vector<128x128xbf16>
      %cst_30 = arith.constant dense<0.000000e+00> : vector<128x128xf32>
      %77 = tpu.matmul %75, %76, %cst_30 {dimension_numbers = #tpu.dot_dimension_numbers<[1], [0], [0], [1], [0, 0, 1, 1], [], []>} : vector<128x128xbf16>, vector<128x128xbf16>, vector<128x128xf32> -> vector<128x128xf32>
      %c0_31 = arith.constant 0 : index
      %c0_32 = arith.constant 0 : index
      %78 = vector.load %arg7[%c0_31, %c0_32] : memref<128x128xf32, #tpu.memory_space<vmem>>, vector<128x128xf32>
      tpu.vector_store %arg7[%c0_31, %c0_32], %77 {strides = array<i32>} : memref<128x128xf32, #tpu.memory_space<vmem>>, vector<128x128xf32>,
    } else {
    }
    %c0_14 = arith.constant 0 : index
    %c0_15 = arith.constant 0 : index
    %48 = vector.load %arg7[%c0_14, %c0_15] : memref<128x128xf32, #tpu.memory_space<vmem>>, vector<128x128xf32>
    %49 = arith.cmpi eq, %3, %4 : vector<128x128xi32>
    %cst = arith.constant 0.000000e+00 : f32
    %50 = vector.broadcast %cst : f32 to vector<128x128xf32>
    %51 = arith.select %49, %50, %48 : vector<128x128xi1>, vector<128x128xf32>
    %cst_16 = arith.constant dense<0.000000e+00> : vector<128xf32>
    %52 = vector.multi_reduction <add>, %51, %cst_16 [0] : vector<128x128xf32> to vector<128xf32>
    %53 = vector.shape_cast %52 : vector<128xf32> to vector<1x128xf32>
    %cst_17 = arith.constant 9.99999997E-7 : f32
    %54 = vector.broadcast %cst_17 : f32 to vector<1x128xf32>
    %55 = arith.addf %53, %54 : vector<1x128xf32>
    %56 = tpu.reciprocal %55 {approx = true} : vector<1x128xf32> -> vector<1x128xf32>
    %57 = vector.broadcast %56 : vector<1x128xf32> to vector<128x128xf32>
    %58 = arith.mulf %51, %57 : vector<128x128xf32>
    %59 = arith.truncf %58 : vector<128x128xf32> to vector<128x128xbf16>
    %60 = arith.index_cast %arg0 : i32 to index
    %c0_18 = arith.constant 0 : index
    %c0_19 = arith.constant 0 : index
    %61 = vector.load %arg4[%60, %c0_18, %c0_19] : memref<3x128x128xbf16, #tpu.memory_space<vmem>>, vector<1x128x128xbf16>
    %62 = vector.shape_cast %61 : vector<1x128x128xbf16> to vector<128x128xbf16>
    %cst_20 = arith.constant dense<0.000000e+00> : vector<128x128xf32>
    %63 = tpu.matmul %59, %62, %cst_20 {dimension_numbers = #tpu.dot_dimension_numbers<[1], [0], [0], [1], [0, 0, 1, 1], [], []>} : vector<128x128xbf16>, vector<128x128xbf16>, vector<128x128xf32> -> vector<128x128xf32>
    %64 = arith.index_cast %arg0 : i32 to index
    %c0_21 = arith.constant 0 : index
    %c0_22 = arith.constant 0 : index
    %65 = vector.load %arg5[%64, %c0_21, %c0_22] : memref<3x1x128xf32, #tpu.memory_space<vmem>>, vector<1x1x128xf32>
    %66 = vector.shape_cast %65 : vector<1x1x128xf32> to vector<1x128xf32>
    %67 = vector.broadcast %66 : vector<1x128xf32> to vector<128x128xf32>
    %68 = arith.addf %63, %67 : vector<128x128xf32>
    %cst_23 = arith.constant 0.000000e+00 : f32
    %69 = vector.broadcast %cst_23 : f32 to vector<128x128xf32>
    %70 = arith.maximumf %68, %69 : vector<128x128xf32>
    %c0_24 = arith.constant 0 : index
    %c0_25 = arith.constant 0 : index
    %c0_26 = arith.constant 0 : index
    %c0_27 = arith.constant 0 : index
    %71 = vector.load %arg6[%c0_24, %c0_25, %c0_26, %c0_27] : memref<1x1x128x128xf32, #tpu.memory_space<vmem>>, vector<1x1x128x128xf32>
    %72 = vector.shape_cast %71 : vector<1x1x128x128xf32> to vector<128x128xf32>
    %73 = vector.shape_cast %70 : vector<128x128xf32> to vector<1x1x128x128xf32>
    tpu.vector_store %arg6[%c0_24, %c0_25, %c0_26, %c0_27], %73 {strides = array<i32>} : memref<1x1x128x128xf32, #tpu.memory_space<vmem>>, vector<1x1x128x128xf32>,
    return
  }
  func.func @transform_0(%arg0: i32, %arg1: i32, %arg2: memref<36xf32, #tpu.memory_space<smem>>) -> (i32, i32, i32) {
    %c0_i32 = arith.constant 0 : i32
    %c0_i32_0 = arith.constant 0 : i32
    %c0_i32_1 = arith.constant 0 : i32
    %c0_i32_2 = arith.constant 0 : i32
    return %c0_i32, %c0_i32_0, %c0_i32_1 : i32, i32, i32
  }
  func.func @transform_1(%arg0: i32, %arg1: i32, %arg2: memref<36xf32, #tpu.memory_space<smem>>) -> (i32, i32, i32) {
    %c0_i32 = arith.constant 0 : i32
    %c0_i32_0 = arith.constant 0 : i32
    %c0_i32_1 = arith.constant 0 : i32
    %c0_i32_2 = arith.constant 0 : i32
    return %c0_i32, %c0_i32_0, %c0_i32_1 : i32, i32, i32
  }
  func.func @transform_2(%arg0: i32, %arg1: i32, %arg2: memref<36xf32, #tpu.memory_space<smem>>) -> (i32, i32, i32) {
    %c0_i32 = arith.constant 0 : i32
    %c0_i32_0 = arith.constant 0 : i32
    %c0_i32_1 = arith.constant 0 : i32
    %c0_i32_2 = arith.constant 0 : i32
    return %c0_i32, %c0_i32_0, %c0_i32_1 : i32, i32, i32
  }
  func.func @transform_3(%arg0: i32, %arg1: i32, %arg2: memref<36xf32, #tpu.memory_space<smem>>) -> (i32, i32, i32, i32) {
    %c0_i32 = arith.constant 0 : i32
    %c0_i32_0 = arith.constant 0 : i32
    %c0_i32_1 = arith.constant 0 : i32
    return %arg0, %arg1, %c0_i32, %c0_i32_0 : i32, i32, i32, i32
  }
}

module attributes {stable_mosaic.version = 11 : i64} {
  func.func @_hlhia_fused_kernel(%arg0: i32, %arg1: i32, %arg2: memref<36xf32, #tpu.memory_space<smem>>, %arg3: memref<4x128x128xbf16, #tpu.memory_space<vmem>>, %arg4: memref<3x128x128xbf16, #tpu.memory_space<vmem>>, %arg5: memref<3x1x128xf32, #tpu.memory_space<vmem>>, %arg6: memref<1x1x128x128xf32, #tpu.memory_space<vmem>>, %arg7: memref<128x128xf32, #tpu.memory_space<vmem>>) attributes {dimension_semantics = [#tpu.dimension_semantics<parallel>, #tpu.dimension_semantics<arbitrary>], iteration_bounds = array<i64: 3, 3>, scalar_prefetch = 1 : i64, scratch_operands = 1 : i64, tpu.core_type = #tpu.core_type<tc>, window_params = [{pipeline_mode = #tpu.pipeline_mode<synchronous>, transform_indices = @transform_0, window_bounds = array<i64: 4, 128, 128>}, {pipeline_mode = #tpu.pipeline_mode<synchronous>, transform_indices = @transform_1, window_bounds = array<i64: 3, 128, 128>}, {pipeline_mode = #tpu.pipeline_mode<synchronous>, transform_indices = @transform_2, window_bounds = array<i64: 3, 1, 128>}, {transform_indices = @transform_3, window_bounds = array<i64: 1, 1, 128, 128>}]} {
    %c3_i32 = arith.constant 3 : i32
    %0 = arith.muli %arg1, %c3_i32 : i32
    %1 = arith.addi %0, %arg0 : i32
    %c4_i32 = arith.constant 4 : i32
    %2 = arith.muli %1, %c4_i32 : i32
    %3 = tpu.iota {dimensions = array<i32: 0>} : vector<128x128xi32>
    %4 = tpu.iota {dimensions = array<i32: 1>} : vector<128x128xi32>
    %5 = arith.index_cast %2 : i32 to index
    %6 = memref.load %arg2[%5] : memref<36xf32, #tpu.memory_space<smem>>
    %c0 = arith.constant 0 : index
    %c0_0 = arith.constant 0 : index
    %c0_1 = arith.constant 0 : index
    %7 = vector.load %arg3[%c0, %c0_0, %c0_1] : memref<4x128x128xbf16, #tpu.memory_space<vmem>>, vector<1x128x128xbf16>
    %8 = vector.shape_cast %7 : vector<1x128x128xbf16> to vector<128x128xbf16>
    %9 = arith.extf %8 : vector<128x128xbf16> to vector<128x128xf32>
    %10 = vector.broadcast %6 : f32 to vector<128x128xf32>
    %11 = arith.mulf %10, %9 : vector<128x128xf32>
    %c1_i32 = arith.constant 1 : i32
    %12 = arith.addi %2, %c1_i32 : i32
    %13 = arith.index_cast %12 : i32 to index
    %14 = memref.load %arg2[%13] : memref<36xf32, #tpu.memory_space<smem>>
    %c1 = arith.constant 1 : index
    %c0_2 = arith.constant 0 : index
    %c0_3 = arith.constant 0 : index
    %15 = vector.load %arg3[%c1, %c0_2, %c0_3] : memref<4x128x128xbf16, #tpu.memory_space<vmem>>, vector<1x128x128xbf16>
    %16 = vector.shape_cast %15 : vector<1x128x128xbf16> to vector<128x128xbf16>
    %17 = arith.extf %16 : vector<128x128xbf16> to vector<128x128xf32>
    %18 = vector.broadcast %14 : f32 to vector<128x128xf32>
    %19 = arith.mulf %18, %17 : vector<128x128xf32>
    %20 = arith.addf %11, %19 : vector<128x128xf32>
    %c2_i32 = arith.constant 2 : i32
    %21 = arith.addi %2, %c2_i32 : i32
    %22 = arith.index_cast %21 : i32 to index
    %23 = memref.load %arg2[%22] : memref<36xf32, #tpu.memory_space<smem>>
    %c2 = arith.constant 2 : index
    %c0_4 = arith.constant 0 : index
    %c0_5 = arith.constant 0 : index
    %24 = vector.load %arg3[%c2, %c0_4, %c0_5] : memref<4x128x128xbf16, #tpu.memory_space<vmem>>, vector<1x128x128xbf16>
    %25 = vector.shape_cast %24 : vector<1x128x128xbf16> to vector<128x128xbf16>
    %26 = arith.extf %25 : vector<128x128xbf16> to vector<128x128xf32>
    %27 = vector.broadcast %23 : f32 to vector<128x128xf32>
    %28 = arith.mulf %27, %26 : vector<128x128xf32>
    %29 = arith.addf %20, %28 : vector<128x128xf32>
    %c3_i32_6 = arith.constant 3 : i32
    %30 = arith.addi %2, %c3_i32_6 : i32
    %31 = arith.index_cast %30 : i32 to index
    %32 = memref.load %arg2[%31] : memref<36xf32, #tpu.memory_space<smem>>
    %c3 = arith.constant 3 : index
    %c0_7 = arith.constant 0 : index
    %c0_8 = arith.constant 0 : index
    %33 = vector.load %arg3[%c3, %c0_7, %c0_8] : memref<4x128x128xbf16, #tpu.memory_space<vmem>>, vector<1x128x128xbf16>
    %34 = vector.shape_cast %33 : vector<1x128x128xbf16> to vector<128x128xbf16>
    %35 = arith.extf %34 : vector<128x128xbf16> to vector<128x128xf32>
    %36 = vector.broadcast %32 : f32 to vector<128x128xf32>
    %37 = arith.mulf %36, %35 : vector<128x128xf32>
    %38 = arith.addf %29, %37 : vector<128x128xf32>
    %c0_i32 = arith.constant 0 : i32
    %39 = arith.cmpi eq, %arg1, %c0_i32 : i32
    %40 = arith.extui %39 : i1 to i32
    %c0_i32_9 = arith.constant 0 : i32
    %41 = arith.cmpi ne, %40, %c0_i32_9 : i32
    scf.if %41 {
      %74 = math.exp %38 : vector<128x128xf32>
      %c16_i32 = arith.constant 16 : i32
      %75 = vector.broadcast %c16_i32 : i32 to vector<128x128xi32>
      %76 = arith.cmpi slt, %3, %75 : vector<128x128xi32>
      %c16_i32_28 = arith.constant 16 : i32
      %77 = vector.broadcast %c16_i32_28 : i32 to vector<128x128xi32>
      %78 = arith.cmpi slt, %4, %77 : vector<128x128xi32>
      %79 = arith.andi %76, %78 : vector<128x128xi1>
      %cst_29 = arith.constant 0.000000e+00 : f32
      %80 = vector.broadcast %cst_29 : f32 to vector<128x128xf32>
      %81 = arith.select %79, %74, %80 : vector<128x128xi1>, vector<128x128xf32>
      %cst_30 = arith.constant dense<0.000000e+00> : vector<128xf32>
      %82 = vector.multi_reduction <add>, %81, %cst_30 [0] : vector<128x128xf32> to vector<128xf32>
      %83 = vector.shape_cast %82 : vector<128xf32> to vector<1x128xf32>
      %cst_31 = arith.constant 9.99999997E-7 : f32
      %84 = vector.broadcast %cst_31 : f32 to vector<1x128xf32>
      %85 = arith.addf %83, %84 : vector<1x128xf32>
      %86 = tpu.reciprocal %85 {approx = true} : vector<1x128xf32> -> vector<1x128xf32>
      %87 = vector.broadcast %86 : vector<1x128xf32> to vector<128x128xf32>
      %88 = arith.mulf %81, %87 : vector<128x128xf32>
      %c0_32 = arith.constant 0 : index
      %c0_33 = arith.constant 0 : index
      %89 = vector.load %arg7[%c0_32, %c0_33] : memref<128x128xf32, #tpu.memory_space<vmem>>, vector<128x128xf32>
      tpu.vector_store %arg7[%c0_32, %c0_33], %88 {strides = array<i32>} : memref<128x128xf32, #tpu.memory_space<vmem>>, vector<128x128xf32>,
    } else {
    }
    %c1_i32_10 = arith.constant 1 : i32
    %42 = arith.cmpi eq, %arg1, %c1_i32_10 : i32
    %43 = arith.extui %42 : i1 to i32
    %c0_i32_11 = arith.constant 0 : i32
    %44 = arith.cmpi ne, %43, %c0_i32_11 : i32
    scf.if %44 {
      %c0_28 = arith.constant 0 : index
      %c0_29 = arith.constant 0 : index
      %74 = vector.load %arg7[%c0_28, %c0_29] : memref<128x128xf32, #tpu.memory_space<vmem>>, vector<128x128xf32>
      %75 = arith.truncf %74 : vector<128x128xf32> to vector<128x128xbf16>
      %76 = math.exp %38 : vector<128x128xf32>
      %c16_i32 = arith.constant 16 : i32
      %77 = vector.broadcast %c16_i32 : i32 to vector<128x128xi32>
      %78 = arith.cmpi slt, %3, %77 : vector<128x128xi32>
      %c16_i32_30 = arith.constant 16 : i32
      %79 = vector.broadcast %c16_i32_30 : i32 to vector<128x128xi32>
      %80 = arith.cmpi slt, %4, %79 : vector<128x128xi32>
      %81 = arith.andi %78, %80 : vector<128x128xi1>
      %cst_31 = arith.constant 0.000000e+00 : f32
      %82 = vector.broadcast %cst_31 : f32 to vector<128x128xf32>
      %83 = arith.select %81, %76, %82 : vector<128x128xi1>, vector<128x128xf32>
      %cst_32 = arith.constant dense<0.000000e+00> : vector<128xf32>
      %84 = vector.multi_reduction <add>, %83, %cst_32 [0] : vector<128x128xf32> to vector<128xf32>
      %85 = vector.shape_cast %84 : vector<128xf32> to vector<1x128xf32>
      %cst_33 = arith.constant 9.99999997E-7 : f32
      %86 = vector.broadcast %cst_33 : f32 to vector<1x128xf32>
      %87 = arith.addf %85, %86 : vector<1x128xf32>
      %88 = tpu.reciprocal %87 {approx = true} : vector<1x128xf32> -> vector<1x128xf32>
      %89 = vector.broadcast %88 : vector<1x128xf32> to vector<128x128xf32>
      %90 = arith.mulf %83, %89 : vector<128x128xf32>
      %91 = arith.truncf %90 : vector<128x128xf32> to vector<128x128xbf16>
      %cst_34 = arith.constant dense<0.000000e+00> : vector<128x128xf32>
      %92 = tpu.matmul %75, %91, %cst_34 {dimension_numbers = #tpu.dot_dimension_numbers<[1], [0], [0], [1], [0, 0, 1, 1], [], []>} : vector<128x128xbf16>, vector<128x128xbf16>, vector<128x128xf32> -> vector<128x128xf32>
      %c0_35 = arith.constant 0 : index
      %c0_36 = arith.constant 0 : index
      %93 = vector.load %arg7[%c0_35, %c0_36] : memref<128x128xf32, #tpu.memory_space<vmem>>, vector<128x128xf32>
      tpu.vector_store %arg7[%c0_35, %c0_36], %92 {strides = array<i32>} : memref<128x128xf32, #tpu.memory_space<vmem>>, vector<128x128xf32>,
    } else {
    }
    %c2_i32_12 = arith.constant 2 : i32
    %45 = arith.cmpi sge, %arg1, %c2_i32_12 : i32
    %46 = arith.extui %45 : i1 to i32
    %c0_i32_13 = arith.constant 0 : i32
    %47 = arith.cmpi ne, %46, %c0_i32_13 : i32
    scf.if %47 {
      %c0_28 = arith.constant 0 : index
      %c0_29 = arith.constant 0 : index
      %74 = vector.load %arg7[%c0_28, %c0_29] : memref<128x128xf32, #tpu.memory_space<vmem>>, vector<128x128xf32>
      %75 = arith.truncf %74 : vector<128x128xf32> to vector<128x128xbf16>
      %76 = arith.truncf %38 : vector<128x128xf32> to vector<128x128xbf16>
      %cst_30 = arith.constant dense<0.000000e+00> : vector<128x128xf32>
      %77 = tpu.matmul %75, %76, %cst_30 {dimension_numbers = #tpu.dot_dimension_numbers<[1], [0], [0], [1], [0, 0, 1, 1], [], []>} : vector<128x128xbf16>, vector<128x128xbf16>, vector<128x128xf32> -> vector<128x128xf32>
      %c0_31 = arith.constant 0 : index
      %c0_32 = arith.constant 0 : index
      %78 = vector.load %arg7[%c0_31, %c0_32] : memref<128x128xf32, #tpu.memory_space<vmem>>, vector<128x128xf32>
      tpu.vector_store %arg7[%c0_31, %c0_32], %77 {strides = array<i32>} : memref<128x128xf32, #tpu.memory_space<vmem>>, vector<128x128xf32>,
    } else {
    }
    %c0_14 = arith.constant 0 : index
    %c0_15 = arith.constant 0 : index
    %48 = vector.load %arg7[%c0_14, %c0_15] : memref<128x128xf32, #tpu.memory_space<vmem>>, vector<128x128xf32>
    %49 = arith.cmpi eq, %3, %4 : vector<128x128xi32>
    %cst = arith.constant 0.000000e+00 : f32
    %50 = vector.broadcast %cst : f32 to vector<128x128xf32>
    %51 = arith.select %49, %50, %48 : vector<128x128xi1>, vector<128x128xf32>
    %cst_16 = arith.constant dense<0.000000e+00> : vector<128xf32>
    %52 = vector.multi_reduction <add>, %51, %cst_16 [0] : vector<128x128xf32> to vector<128xf32>
    %53 = vector.shape_cast %52 : vector<128xf32> to vector<1x128xf32>
    %cst_17 = arith.constant 9.99999997E-7 : f32
    %54 = vector.broadcast %cst_17 : f32 to vector<1x128xf32>
    %55 = arith.addf %53, %54 : vector<1x128xf32>
    %56 = tpu.reciprocal %55 {approx = true} : vector<1x128xf32> -> vector<1x128xf32>
    %57 = vector.broadcast %56 : vector<1x128xf32> to vector<128x128xf32>
    %58 = arith.mulf %51, %57 : vector<128x128xf32>
    %59 = arith.truncf %58 : vector<128x128xf32> to vector<128x128xbf16>
    %60 = arith.index_cast %arg0 : i32 to index
    %c0_18 = arith.constant 0 : index
    %c0_19 = arith.constant 0 : index
    %61 = vector.load %arg4[%60, %c0_18, %c0_19] : memref<3x128x128xbf16, #tpu.memory_space<vmem>>, vector<1x128x128xbf16>
    %62 = vector.shape_cast %61 : vector<1x128x128xbf16> to vector<128x128xbf16>
    %cst_20 = arith.constant dense<0.000000e+00> : vector<128x128xf32>
    %63 = tpu.matmul %59, %62, %cst_20 {dimension_numbers = #tpu.dot_dimension_numbers<[1], [0], [0], [1], [0, 0, 1, 1], [], []>} : vector<128x128xbf16>, vector<128x128xbf16>, vector<128x128xf32> -> vector<128x128xf32>
    %64 = arith.index_cast %arg0 : i32 to index
    %c0_21 = arith.constant 0 : index
    %c0_22 = arith.constant 0 : index
    %65 = vector.load %arg5[%64, %c0_21, %c0_22] : memref<3x1x128xf32, #tpu.memory_space<vmem>>, vector<1x1x128xf32>
    %66 = vector.shape_cast %65 : vector<1x1x128xf32> to vector<1x128xf32>
    %67 = vector.broadcast %66 : vector<1x128xf32> to vector<128x128xf32>
    %68 = arith.addf %63, %67 : vector<128x128xf32>
    %cst_23 = arith.constant 0.000000e+00 : f32
    %69 = vector.broadcast %cst_23 : f32 to vector<128x128xf32>
    %70 = arith.maximumf %68, %69 : vector<128x128xf32>
    %c0_24 = arith.constant 0 : index
    %c0_25 = arith.constant 0 : index
    %c0_26 = arith.constant 0 : index
    %c0_27 = arith.constant 0 : index
    %71 = vector.load %arg6[%c0_24, %c0_25, %c0_26, %c0_27] : memref<1x1x128x128xf32, #tpu.memory_space<vmem>>, vector<1x1x128x128xf32>
    %72 = vector.shape_cast %71 : vector<1x1x128x128xf32> to vector<128x128xf32>
    %73 = vector.shape_cast %70 : vector<128x128xf32> to vector<1x1x128x128xf32>
    tpu.vector_store %arg6[%c0_24, %c0_25, %c0_26, %c0_27], %73 {strides = array<i32>} : memref<1x1x128x128xf32, #tpu.memory_space<vmem>>, vector<1x1x128x128xf32>,
    return
  }
  func.func @transform_0(%arg0: i32, %arg1: i32, %arg2: memref<36xf32, #tpu.memory_space<smem>>) -> (i32, i32, i32) {
    %c0_i32 = arith.constant 0 : i32
    %c0_i32_0 = arith.constant 0 : i32
    %c0_i32_1 = arith.constant 0 : i32
    %c0_i32_2 = arith.constant 0 : i32
    return %c0_i32, %c0_i32_0, %c0_i32_1 : i32, i32, i32
  }
  func.func @transform_1(%arg0: i32, %arg1: i32, %arg2: memref<36xf32, #tpu.memory_space<smem>>) -> (i32, i32, i32) {
    %c0_i32 = arith.constant 0 : i32
    %c0_i32_0 = arith.constant 0 : i32
    %c0_i32_1 = arith.constant 0 : i32
    %c0_i32_2 = arith.constant 0 : i32
    return %c0_i32, %c0_i32_0, %c0_i32_1 : i32, i32, i32
  }
  func.func @transform_2(%arg0: i32, %arg1: i32, %arg2: memref<36xf32, #tpu.memory_space<smem>>) -> (i32, i32, i32) {
    %c0_i32 = arith.constant 0 : i32
    %c0_i32_0 = arith.constant 0 : i32
    %c0_i32_1 = arith.constant 0 : i32
    %c0_i32_2 = arith.constant 0 : i32
    return %c0_i32, %c0_i32_0, %c0_i32_1 : i32, i32, i32
  }
  func.func @transform_3(%arg0: i32, %arg1: i32, %arg2: memref<36xf32, #tpu.memory_space<smem>>) -> (i32, i32, i32, i32) {
    %c0_i32 = arith.constant 0 : i32
    %c0_i32_0 = arith.constant 0 : i32
    %c0_i32_1 = arith.constant 0 : i32
    return %arg0, %arg1, %c0_i32, %c0_i32_0 : i32, i32, i32, i32
  }
}

</mosaic_0001>

<bundles_post_ra>
// kernel: tpu_custom_call.1
= control target key start
LH: loop header
LB: loop body
LE: loop exit
PB: predicated region body
PF: predicated region fallthrough
CT: control target
= control target key end

     0   :  { %s2595_s0 = inlined_call_operand.hbm [shape: f32[36], index: 0, kind: input, shape index: {}]   ;;  %s2596_s1 = inlined_call_operand.hbm [shape: bf16[4,128,128], index: 1, kind: input, shape index: {}]   ;;  %s2597_s2 = inlined_call_operand.hbm [shape: bf16[3,128,128], index: 2, kind: input, shape index: {}]   ;;  %s2598_s3 = inlined_call_operand.vmem [shape: f32[3,1,128], index: 3, kind: input, shape index: {}]   ;;  %s2599_s4 = inlined_call_operand.hbm [shape: f32[3,3,128,128], index: 4, kind: output, shape index: {}]  }
   0x1   :  { %s1935_s17 = scalar_lea.hbm %s2595_s0, 16 }
   0x2   :  { %p1936_p0 = scmp.ne.s32.totalorder %s2595_s0, %s1935_s17  ;;  %p1939_p1 = scmp.lt.u32.totalorder %s1935_s17, %s2595_s0 }
   0x4   :  { %p1941_p2 = pnand %p1939_p1, %p1936_p0 }
   0x6   :  { %1944 = shalt.err (!%p1941_p2)  }
   0x7   :  { %s2107_s22 = smov [#allocation4]  }
   0x8   :  { %10 = dma.hbm_to_smem %s2595_s0, 16, %s2107_s22, [#allocation3] }
   0x9   :  { %2061 = dma.done.wait [#allocation3], 16 }
   0xa   :  { %2062 = vsyncadd [#allocation3], 4294967280 }
   0xb   :  { %12 = sfence }
   0xc   :  { %13 = vsyncpa [#allocation6], 0 }
   0xd   :  { %14 = vsyncpa [#allocation9], 0 }
   0xe   :  { %15 = vsyncpa [#allocation7], 0 }
   0xf   :  { %17 = vsyncpa [#allocation7 + $0x1], 0  ;;  %s2152_s25 = smov 0   ;;  %s2154_s26 = smov 0  }
  0x10   :  { %s2156_s27 = smov 0   ;;  %s2158_s28 = smov 0  }
  0x11   :  { %s2160_s29 = smov 0   ;;  %s2162_s30 = smov 0  }
  0x12   :  { %s2164_s0 = smov 0   ;;  %s2166_s5 = smov 0  }
  0x13 LB: > { %2607 = sst [smem:[#allocation15_spill]] %s2101_s0  ;;  %s1437_s6 = sadd.s32 4294967295, %s2105_s5   ;;  %s2105_s5 = sphi %s2166_s5, %s23_s5   ;;  %s2101_s0 = sphi %s2164_s0, %s2635_s0   ;;  %s2097_s30 = sphi %s2162_s30, %s2640_s30   ;;  %s2093_s29 = sphi %s2160_s29, %s2633_s29   ;;  %s2089_s28 = sphi %s2158_s28, %s2639_s28   ;;  %s2085_s27 = sphi %s2156_s27, %s2638_s27   ;;  %s2081_s26 = sphi %s2154_s26, %s2637_s26   ;;  %s2077_s25 = sphi %s2152_s25, %s2636_s25  }
  0x14   : > { %s1438_s7 = sadd.s32 4294967294, %s2105_s5   ;;  %s32_s8 = sadd.s32 1, %s2097_s30 }
  0x15   : > { %s35_s9 = sadd.s32 1, %s2101_s0  ;;  %p33_p3 = scmp.ge.s32.totalorder %s32_s8, 3 }
  0x16   : > { %s107_s10 = sadd.s32 1, %s2085_s27  ;;  %p117_p4 = scmp.ne.s32.totalorder %s2085_s27, %s2081_s26 }
  0x17   : > { %p118_p5 = scmp.eq.s32.totalorder %s1437_s6, 8  ;;  %s2642_s8 = smov (%p33_p3, %s32_s8), 0 }
  0x18   : > { %2608 = sst [smem:[#allocation16_spill]] %s2642_s8  ;;  %s2644_s9 = smov (!%p33_p3, %s35_s9), %s2101_s0 }
  0x19   : > { %s103_s11 = ssub.s32 %s2097_s30, %s2642_s8  ;;  %p2204_p6 = por %p118_p5, %p117_p4 }
  0x1a   : > { %p37_p7 = scmp.ge.s32.totalorder %s2644_s9, 3  ;;  %p123_p8 = scmp.ne.s32.totalorder %s2081_s26, %s2077_s25 }
  0x1b   : > { %s2609_s12 = scalar_select %p2204_p6, 1, 0 }
  0x1c   : > { %p124_p9 = scmp.eq.s32.totalorder %s1438_s7, 8  ;;  %p1439_p10 = scmp.ge.s32.totalorder %s2105_s5, 1 }
  0x1d   : > { %s2646_s9 = smov (%p37_p7, %s2644_s9), 0  ;;  %p131_p12 = scmp.lt.s32.totalorder %s2105_s5, 10 }
  0x1e   : > { %2610 = sst [smem:[#allocation17_spill]] %s2646_s9  ;;  %p2213_p11 = por %p124_p9, %p123_p8 }
  0x1f   : > { %s102_s14 = ssub.s32 %s2101_s0, %s2646_s9  ;;  %p2220_p13 = pnand %p1439_p10, %p131_p12 }
  0x20   : > { %s2611_s13 = scalar_select %p2213_p11, 1, 0 }
  0x21   : > { %s104_s15 = sor.u32 %s103_s11, %s102_s14  ;;  %p2224_p1 = scmp.eq.s32.totalorder %s1437_s6, 0 }
  0x22   : > { %s2612_s16 = scalar_select %p2220_p13, 1, 0 }
  0x23   : > { %p105_p0 = scmp.eq.s32.totalorder %s104_s15, 0  ;;  %p1826_p2 = pneg %p2220_p13 }
  0x24   : > { %s2613_s17 = scalar_select %p2224_p1, 1, 0 }
  0x25   : > { %s2231_s18 = scalar_select %p105_p0, %s2085_s27, %s107_s10  }
  0x26   : > { %s2108_s19 = smov [#allocation5]   ;;  %p2235_p3 = pnand %p2224_p1, %p1826_p2 }
  0x27   : > { %s143_s20 = sshll.u32 %s2108_s19, 4  ;;  %s1945_s24 = scalar_lea.hbm %s2596_s1, 4096  ;;  %s144_s20 = int_to_ptr.vmem [resolvable:$true] %s143_s20 }
  0x28   : > { %p1946_p4 = scmp.ne.s32.totalorder %s2596_s1, %s1945_s24  ;;  %p1947_p5 = pneg %p2235_p3 }
  0x29   : > { %p1952_p9 = scmp.lt.u32.totalorder %s1945_s24, %s2596_s1 }
  0x2a   : > { %p1948_p7 = pnand %p1947_p5, %p1946_p4 }
  0x2c   : > { %p1949_p8 = pneg %p1948_p7 }
  0x2e   : > { %p1954_p10 = pnand %p1952_p9, %p1949_p8 }
  0x30   : > { %1957 = shalt.err (!%p1954_p10)
}
  0x31   : > { %s1958_s14 = scalar_lea.vmem %s144_s20, 4096  ;;  %p1966_p11 = scmp.lt.s32.totalorder %s144_s20, %s144_s20 }
  0x32   : > { %p1959_p12 = scmp.ne.s32.totalorder %s144_s20, %s1958_s14  ;;  %p1967_p6 = scmp.lt.s32.totalorder %s1958_s14, %s1958_s14 }
  0x34   : > { %p1961_p0 = pnand %p1959_p12, %p1947_p5  ;;  %p1968_p1 = por %p1967_p6, %p1966_p11 }
  0x36   : > { %p1962_p2 = pneg %p1961_p0 }
  0x38   : > { %p1969_p13 = pnand %p1968_p1, %p1962_p2 }
  0x3a   : > { %1972 = shalt.err (!%p1969_p13)
}
  0x3b   : > { %s2109_s15 = smov 64   ;;  %s2110_s19 = smov 4  }
  0x3c   : > { %1829 = dma.hbm_to_vmem [thread:$0]  (!%p2235_p3), %s2596_s1, 4096, %s144_s20, [#allocation6], %s2109_s15, %s2109_s15, %s2110_s19  }
  0x3d   : > { %s2111_s24 = smov [#allocation8]   ;;  %s1973_s11 = scalar_lea.hbm %s2597_s2, 3072 }
  0x3e   : > { %s156_s6 = sshll.u32 %s2111_s24, 4  ;;  %p1974_p6 = scmp.ne.s32.totalorder %s2597_s2, %s1973_s11  ;;  %s157_s6 = int_to_ptr.vmem [resolvable:$true] %s156_s6 }
  0x3f   : > { %p1980_p1 = scmp.lt.u32.totalorder %s1973_s11, %s2597_s2 }
  0x40   : > { %p1976_p11 = pnand %p1974_p6, %p1947_p5 }
  0x42   : > { %p1977_p13 = pneg %p1976_p11 }
  0x44   : > { %p1982_p4 = pnand %p1980_p1, %p1977_p13 }
  0x46   : > { %1985 = shalt.err (!%p1982_p4)
}
  0x47   : > { %s1986_s20 = scalar_lea.vmem %s157_s6, 3072  ;;  %p1994_p10 = scmp.lt.s32.totalorder %s157_s6, %s157_s6 }
  0x48   : > { %p1987_p7 = scmp.ne.s32.totalorder %s157_s6, %s1986_s20  ;;  %p1995_p12 = scmp.lt.s32.totalorder %s1986_s20, %s1986_s20 }
  0x4a   : > { %p1989_p8 = pnand %p1987_p7, %p1947_p5  ;;  %p1996_p0 = por %p1995_p12, %p1994_p10 }
  0x4c   : > { %p1990_p9 = pneg %p1989_p8 }
  0x4e   : > { %p1997_p2 = pnand %p1996_p0, %p1990_p9 }
  0x50   : > { %2000 = shalt.err (!%p1997_p2)
}
  0x51   : > { %1832 = dma.hbm_to_vmem [thread:$0]  (!%p2235_p3), %s2597_s2, 3072, %s157_s6, [#allocation9], %s2109_s15, %s2109_s15, %s2110_s19  }
  0x52   : > { %p2615_p6 = scmp.ne.s32.totalorder %s2612_s16, 0 }
  0x54   : > { %175 = sbr.rel (%p2615_p6) target bundleno = 1065 (0x429), region = 32 }
  0x5b   : > { %p2616_p11 = scmp.ne.s32.totalorder %s2613_s17, 0 }
  0x5d   : > { %2064 = dma.done.wait (%p2616_p11), [#allocation6], 4096  }
  0x5e   : > { %2066 = vsyncadd (%p2616_p11), [#allocation6], 4294963200 }
  0x5f   : > { %2068 = dma.done.wait (%p2616_p11), [#allocation9], 3072  }
  0x60   : > { %2070 = vsyncadd (%p2616_p11), [#allocation9], 4294964224  ;;  %s195_s0 = sand.u32 1, %s2081_s26   ;;  %s199_s8 = smul.u32 3, %s2089_s28  ;;  %v202_v0 = vlaneseq  ;;  %v1468_v18 = vld [vmem:[#allocation5] sm:$0xff]   ;;  %v1595_v19 = vld [vmem:[#allocation5 + $0x8] sm:$0xff]  }
  0x61   : > { %s2295_s16 = sshll.u32 %s195_s0, 7  ;;  %v1596_v20 = vld [vmem:[#allocation5 + $0x10] sm:$0xff]   ;;  %v1469_v21 = vunpack.c.l.bf16 %v1468_v18  ;;  %v1470_v22 = vunpack.c.h.bf16 %v1468_v18  ;;  %v1473_v23 = vunpack.c.l.bf16 %v1595_v19  ;;  %v1474_v24 = vunpack.c.h.bf16 %v1595_v19  ;;  %v1597_v25 = vld [vmem:[#allocation5 + $0x18] sm:$0xff]   ;;  %v1598_v26 = vld [vmem:[#allocation5 + $0x20] sm:$0xff]   ;;  %p1447_p3 = scmp.ne.s32.totalorder %s2089_s28, 0 }
  0x62   : > { %s200_s21 = sadd.s32 %s2093_s29, %s199_s8  ;;  %v2298_v1 = vshrl.u32 %v202_v0, 7  ;;  %v2300_v2 = vand.u32 127, %v202_v0  ;;  %v1599_v27 = vld [vmem:[#allocation5 + $0x28] sm:$0xff]   ;;  %v1477_v28 = vunpack.c.l.bf16 %v1596_v20  ;;  %v1478_v29 = vunpack.c.h.bf16 %v1596_v20  ;;  %v1600_v32 = vld [vmem:[#allocation5 + $0x30] sm:$0xff]   ;;  %v1601_v33 = vld [vmem:[#allocation5 + $0x38] sm:$0xff]   ;;  %s2406_s11 = scalar_lea.vmem [#allocation10], %s2295_s16 }
  0x63   : > { %s2302_s15 = sshll.u32 %s200_s21, 2  ;;  %v1481_v30 = vunpack.c.l.bf16 %v1597_v25  ;;  %v1482_v31 = vunpack.c.h.bf16 %v1597_v25  ;;  %v1500_v34 = vld [vmem:[#allocation5 + $0x40] sm:$0xff]   ;;  %v1485_v35 = vunpack.c.l.bf16 %v1598_v26  ;;  %v1486_v36 = vunpack.c.h.bf16 %v1598_v26  ;;  %v1602_v39 = vld [vmem:[#allocation5 + $0x48] sm:$0xff]   ;;  %v1603_v56 = vld [vmem:[#allocation5 + $0x50] sm:$0xff]  }
  0x64   : > { %v2305_v3 = vadd.s32 8, %v2298_v1  ;;  %v2308_v4 = vadd.s32 16, %v2298_v1  ;;  %v2311_v5 = vadd.s32 24, %v2298_v1  ;;  %v2314_v6 = vadd.s32 32, %v2298_v1  ;;  %s2317_s17 = sld [smem:[#allocation4 + %s2302_s15]]  ;;  %s271_s19 = sadd.s32 1, %s2302_s15 }
  0x65   : > { %v2320_v7 = vadd.s32 40, %v2298_v1  ;;  %v2323_v8 = vadd.s32 48, %v2298_v1  ;;  %v2326_v9 = vadd.s32 56, %v2298_v1  ;;  %v2329_v10 = vadd.s32 64, %v2298_v1  ;;  %s2354_s23 = sld [smem:[#allocation4 + %s271_s19]]  ;;  %v1604_v57 = vld [vmem:[#allocation5 + $0x58] sm:$0xff]  }
  0x66   : > { %v2332_v11 = vadd.s32 72, %v2298_v1  ;;  %v2335_v12 = vadd.s32 80, %v2298_v1  ;;  %v2338_v13 = vadd.s32 88, %v2298_v1  ;;  %v2341_v14 = vadd.s32 96, %v2298_v1  ;;  %v1605_v62 = vld [vmem:[#allocation5 + $0x60] sm:$0xff]   ;;  %v1606_v63 = vld [vmem:[#allocation5 + $0x68] sm:$0xff]  }
  0x67   : > { %v2344_v15 = vadd.s32 104, %v2298_v1  ;;  %v2347_v16 = vadd.s32 112, %v2298_v1  ;;  %v2350_v17 = vadd.s32 120, %v2298_v1  ;;  %v1489_v37 = vunpack.c.l.bf16 %v1599_v27  ;;  %s339_s24 = sadd.s32 2, %s2302_s15  ;;  %s407_s7 = sadd.s32 3, %s2302_s15 }
  0x68   : > { %2617 = vst [vmem:[#allocation18_spill] sm:$0xff] %v2332_v11  ;;  %2618 = vst [vmem:[#allocation19_spill] sm:$0xff] %v2335_v12  ;;  %v1490_v38 = vunpack.c.h.bf16 %v1599_v27  ;;  %v1493_v40 = vunpack.c.l.bf16 %v1600_v32  ;;  %v1494_v41 = vunpack.c.h.bf16 %v1600_v32  ;;  %v1497_v42 = vunpack.c.l.bf16 %v1601_v33  ;;  %v2356_v27 = vld [vmem:[#allocation5 + $0x80] sm:$0xff]   ;;  %s2362_s6 = sld [smem:[#allocation4 + %s339_s24]] }
  0x69   : > { %2619 = vst [vmem:[#allocation20_spill] sm:$0xff] %v2338_v13  ;;  %2620 = vst [vmem:[#allocation21_spill] sm:$0xff] %v2341_v14  ;;  %v1498_v43 = vunpack.c.h.bf16 %v1601_v33  ;;  %v1501_v45 = vunpack.c.l.bf16 %v1500_v34  ;;  %v1502_v46 = vunpack.c.h.bf16 %v1500_v34  ;;  %v1505_v47 = vunpack.c.l.bf16 %v1602_v39  ;;  %s2369_s10 = sld [smem:[#allocation4 + %s407_s7]] }
  0x6a   : > { %2621 = vst [vmem:[#allocation22_spill] sm:$0xff] %v2344_v15  ;;  %2622 = vst [vmem:[#allocation23_spill] sm:$0xff] %v2347_v16  ;;  %v254_v44 = vstv %s2317_s17  ;;  %v1510_v25 = vunpack.c.h.bf16 %v1603_v56  ;;  %v1513_v26 = vunpack.c.l.bf16 %v1604_v57  ;;  %v1522_v32 = vunpack.c.h.bf16 %v1606_v63 }
  0x6b   : > { %2623 = vst [vmem:[#allocation24_spill] sm:$0xff] %v2350_v17  ;;  %v255_v48 = vmul.f32 %v1469_v21, %v254_v44  ;;  %v256_v49 = vmul.f32 %v1470_v22, %v254_v44  ;;  %v257_v50 = vmul.f32 %v1473_v23, %v254_v44  ;;  %v258_v51 = vmul.f32 %v1474_v24, %v254_v44  ;;  %v1607_v21 = vld [vmem:[#allocation5 + $0x70] sm:$0xff]   ;;  %v1608_v22 = vld [vmem:[#allocation5 + $0x78] sm:$0xff]  }
  0x6c   : > { %v259_v52 = vmul.f32 %v1477_v28, %v254_v44  ;;  %v260_v53 = vmul.f32 %v1478_v29, %v254_v44  ;;  %v261_v54 = vmul.f32 %v1481_v30, %v254_v44  ;;  %v262_v55 = vmul.f32 %v1482_v31, %v254_v44 }
  0x6d   : > { %v263_v58 = vmul.f32 %v1485_v35, %v254_v44  ;;  %v264_v59 = vmul.f32 %v1486_v36, %v254_v44  ;;  %v265_v60 = vmul.f32 %v1489_v37, %v254_v44  ;;  %v266_v61 = vmul.f32 %v1490_v38, %v254_v44 }
  0x6e   : > { %v267_v0 = vmul.f32 %v1493_v40, %v254_v44  ;;  %v268_v18 = vmul.f32 %v1494_v41, %v254_v44  ;;  %v269_v19 = vmul.f32 %v1497_v42, %v254_v44  ;;  %v270_v20 = vmul.f32 %v1498_v43, %v254_v44 }
  0x6f   : > { %v1506_v23 = vunpack.c.h.bf16 %v1602_v39  ;;  %v1509_v24 = vunpack.c.l.bf16 %v1603_v56  ;;  %v1514_v28 = vunpack.c.h.bf16 %v1604_v57  ;;  %v1517_v29 = vunpack.c.l.bf16 %v1605_v62 }
  0x70   : > { %v1518_v30 = vunpack.c.h.bf16 %v1605_v62  ;;  %v1521_v31 = vunpack.c.l.bf16 %v1606_v63  ;;  %v1525_v33 = vunpack.c.l.bf16 %v1607_v21  ;;  %v1526_v34 = vunpack.c.h.bf16 %v1607_v21 }
  0x71   : > { %v1529_v35 = vunpack.c.l.bf16 %v1608_v22  ;;  %v1530_v36 = vunpack.c.h.bf16 %v1608_v22  ;;  %v306_v37 = vstv %s2354_s23  ;;  %v1533_v38 = vunpack.c.l.bf16 %v2356_v27 }
  0x72   : > { %v1534_v39 = vunpack.c.h.bf16 %v2356_v27  ;;  %v307_v40 = vmul.f32 %v1501_v45, %v306_v37  ;;  %v308_v41 = vmul.f32 %v1502_v46, %v306_v37  ;;  %v309_v42 = vmul.f32 %v1505_v47, %v306_v37 }
  0x73   : > { %v310_v43 = vmul.f32 %v1506_v23, %v306_v37  ;;  %v311_v44 = vmul.f32 %v1509_v24, %v306_v37  ;;  %v312_v56 = vmul.f32 %v1510_v25, %v306_v37  ;;  %v313_v57 = vmul.f32 %v1513_v26, %v306_v37  ;;  %v1609_v26 = vld [vmem:[#allocation5 + $0x88] sm:$0xff]  }
  0x74   : > { %v314_v62 = vmul.f32 %v1514_v28, %v306_v37  ;;  %v315_v17 = vmul.f32 %v1517_v29, %v306_v37  ;;  %v316_v63 = vmul.f32 %v1518_v30, %v306_v37  ;;  %v317_v16 = vmul.f32 %v1521_v31, %v306_v37  ;;  %v1610_v28 = vld [vmem:[#allocation5 + $0x90] sm:$0xff]  }
  0x75   : > { %v318_v21 = vmul.f32 %v1522_v32, %v306_v37  ;;  %v319_v15 = vmul.f32 %v1525_v33, %v306_v37  ;;  %v320_v22 = vmul.f32 %v1526_v34, %v306_v37  ;;  %v321_v14 = vmul.f32 %v1529_v35, %v306_v37  ;;  %v1611_v33 = vld [vmem:[#allocation5 + $0x98] sm:$0xff]   ;;  %v1612_v34 = vld [vmem:[#allocation5 + $0xa0] sm:$0xff]  }
  0x76   : > { %v322_v13 = vmul.f32 %v1530_v36, %v306_v37  ;;  %v323_v27 = vadd.f32 %v307_v40, %v255_v48  ;;  %v324_v45 = vadd.f32 %v308_v41, %v256_v49  ;;  %v325_v46 = vadd.f32 %v309_v42, %v257_v50  ;;  %v1613_v48 = vld [vmem:[#allocation5 + $0xa8] sm:$0xff]   ;;  %v1614_v49 = vld [vmem:[#allocation5 + $0xb0] sm:$0xff]  }
  0x77   : > { %v326_v47 = vadd.f32 %v310_v43, %v258_v51  ;;  %v327_v23 = vadd.f32 %v311_v44, %v259_v52  ;;  %v328_v12 = vadd.f32 %v312_v56, %v260_v53  ;;  %v329_v24 = vadd.f32 %v313_v57, %v261_v54  ;;  %v1615_v54 = vld [vmem:[#allocation5 + $0xb8] sm:$0xff]  }
  0x78   : > { %v330_v25 = vadd.f32 %v314_v62, %v262_v55  ;;  %v331_v29 = vadd.f32 %v315_v17, %v263_v58  ;;  %v332_v30 = vadd.f32 %v316_v63, %v264_v59  ;;  %v333_v31 = vadd.f32 %v317_v16, %v265_v60  ;;  %v2364_v55 = vld [vmem:[#allocation5 + $0xc0] sm:$0xff]  }
  0x79   : > { %v334_v32 = vadd.f32 %v318_v21, %v266_v61  ;;  %v335_v35 = vadd.f32 %v319_v15, %v267_v0  ;;  %v336_v36 = vadd.f32 %v320_v22, %v268_v18  ;;  %v337_v37 = vadd.f32 %v321_v14, %v269_v19 }
  0x7a   : > { %v338_v11 = vadd.f32 %v322_v13, %v270_v20  ;;  %v1537_v50 = vunpack.c.l.bf16 %v1609_v26  ;;  %v1538_v51 = vunpack.c.h.bf16 %v1609_v26  ;;  %v1541_v52 = vunpack.c.l.bf16 %v1610_v28 }
  0x7b   : > { %v1542_v53 = vunpack.c.h.bf16 %v1610_v28  ;;  %v1545_v17 = vunpack.c.l.bf16 %v1611_v33  ;;  %v1546_v16 = vunpack.c.h.bf16 %v1611_v33  ;;  %v1549_v58 = vunpack.c.l.bf16 %v1612_v34 }
  0x7c   : > { %v1550_v59 = vunpack.c.h.bf16 %v1612_v34  ;;  %v1553_v60 = vunpack.c.l.bf16 %v1613_v48  ;;  %v1554_v15 = vunpack.c.h.bf16 %v1613_v48  ;;  %v1557_v61 = vunpack.c.l.bf16 %v1614_v49 }
  0x7d   : > { %v1558_v14 = vunpack.c.h.bf16 %v1614_v49  ;;  %v1561_v13 = vunpack.c.l.bf16 %v1615_v54  ;;  %v1562_v0 = vunpack.c.h.bf16 %v1615_v54  ;;  %v374_v18 = vstv %s2362_s6  ;;  %v1616_v54 = vld [vmem:[#allocation5 + $0xc8] sm:$0xff]  }
  0x7e   : > { %v1565_v19 = vunpack.c.l.bf16 %v2364_v55  ;;  %v375_v20 = vmul.f32 %v1533_v38, %v374_v18  ;;  %v376_v40 = vmul.f32 %v1534_v39, %v374_v18  ;;  %v377_v41 = vmul.f32 %v1537_v50, %v374_v18 }
  0x7f   : > { %v378_v42 = vmul.f32 %v1538_v51, %v374_v18  ;;  %v379_v43 = vmul.f32 %v1541_v52, %v374_v18  ;;  %v380_v44 = vmul.f32 %v1542_v53, %v374_v18  ;;  %v381_v56 = vmul.f32 %v1545_v17, %v374_v18  ;;  %v1617_v17 = vld [vmem:[#allocation5 + $0xd0] sm:$0xff]  }
  0x80   : > { %v382_v57 = vmul.f32 %v1546_v16, %v374_v18  ;;  %v383_v62 = vmul.f32 %v1549_v58, %v374_v18  ;;  %v384_v63 = vmul.f32 %v1550_v59, %v374_v18  ;;  %v385_v21 = vmul.f32 %v1553_v60, %v374_v18 }
  0x81   : > { %v386_v22 = vmul.f32 %v1554_v15, %v374_v18  ;;  %v387_v26 = vmul.f32 %v1557_v61, %v374_v18  ;;  %v388_v28 = vmul.f32 %v1558_v14, %v374_v18  ;;  %v389_v33 = vmul.f32 %v1561_v13, %v374_v18  ;;  %v1618_v15 = vld [vmem:[#allocation5 + $0xd8] sm:$0xff]   ;;  %v1619_v61 = vld [vmem:[#allocation5 + $0xe0] sm:$0xff]  }
  0x82   : > { %v390_v34 = vmul.f32 %v1562_v0, %v374_v18  ;;  %v391_v48 = vadd.f32 %v375_v20, %v323_v27  ;;  %v392_v38 = vadd.f32 %v376_v40, %v324_v45  ;;  %v393_v39 = vadd.f32 %v377_v41, %v325_v46  ;;  %v1620_v27 = vld [vmem:[#allocation5 + $0xe8] sm:$0xff]   ;;  %v1621_v45 = vld [vmem:[#allocation5 + $0xf0] sm:$0xff]  }
  0x83   : > { %v394_v49 = vadd.f32 %v378_v42, %v326_v47  ;;  %v395_v50 = vadd.f32 %v379_v43, %v327_v23  ;;  %v396_v51 = vadd.f32 %v380_v44, %v328_v12  ;;  %v397_v52 = vadd.f32 %v381_v56, %v329_v24  ;;  %v1622_v24 = vld [vmem:[#allocation5 + $0xf8] sm:$0xff]  }
  0x84   : > { %v398_v53 = vadd.f32 %v382_v57, %v330_v25  ;;  %v399_v16 = vadd.f32 %v383_v62, %v331_v29  ;;  %v400_v58 = vadd.f32 %v384_v63, %v332_v30  ;;  %v401_v59 = vadd.f32 %v385_v21, %v333_v31 }
  0x85   : > { %v402_v60 = vadd.f32 %v386_v22, %v334_v32  ;;  %v403_v14 = vadd.f32 %v387_v26, %v335_v35  ;;  %v404_v13 = vadd.f32 %v388_v28, %v336_v36  ;;  %v405_v0 = vadd.f32 %v389_v33, %v337_v37 }
  0x86   : > { %v406_v18 = vadd.f32 %v390_v34, %v338_v11  ;;  %v1566_v46 = vunpack.c.h.bf16 %v2364_v55  ;;  %v1569_v12 = vunpack.c.l.bf16 %v1616_v54  ;;  %v1570_v47 = vunpack.c.h.bf16 %v1616_v54 }
  0x87   : > { %v1573_v23 = vunpack.c.l.bf16 %v1617_v17  ;;  %v1574_v25 = vunpack.c.h.bf16 %v1617_v17  ;;  %v1577_v29 = vunpack.c.l.bf16 %v1618_v15  ;;  %v1578_v30 = vunpack.c.h.bf16 %v1618_v15 }
  0x88   : > { %v1581_v31 = vunpack.c.l.bf16 %v1619_v61  ;;  %v1582_v32 = vunpack.c.h.bf16 %v1619_v61  ;;  %v1585_v20 = vunpack.c.l.bf16 %v1620_v27  ;;  %v1586_v40 = vunpack.c.h.bf16 %v1620_v27 }
  0x89   : > { %v1589_v35 = vunpack.c.l.bf16 %v1621_v45  ;;  %v1590_v36 = vunpack.c.h.bf16 %v1621_v45  ;;  %v1593_v37 = vunpack.c.l.bf16 %v1622_v24  ;;  %v1594_v11 = vunpack.c.h.bf16 %v1622_v24 }
  0x8a   : > { %v442_v41 = vstv %s2369_s10  ;;  %vm527_vm0 = vcmp.lt.s32.totalorder (!%p1447_p3), %v2300_v2, 16 }
  0x8b   : > { %v443_v42 = vmul.f32 %v1565_v19, %v442_v41  ;;  %v444_v43 = vmul.f32 %v1566_v46, %v442_v41  ;;  %v445_v55 = vmul.f32 %v1569_v12, %v442_v41  ;;  %v446_v44 = vmul.f32 %v1570_v47, %v442_v41 }
  0x8c   : > { %v447_v56 = vmul.f32 %v1573_v23, %v442_v41  ;;  %v448_v57 = vmul.f32 %v1574_v25, %v442_v41  ;;  %v449_v62 = vmul.f32 %v1577_v29, %v442_v41  ;;  %v450_v63 = vmul.f32 %v1578_v30, %v442_v41  ;;  %478 = sbr.rel (%p1447_p3) target bundleno = 199 (0xc7), region = 44 }
  0x8d   : > { %v451_v21 = vmul.f32 %v1581_v31, %v442_v41  ;;  %v452_v22 = vmul.f32 %v1582_v32, %v442_v41  ;;  %v453_v26 = vmul.f32 %v1585_v20, %v442_v41  ;;  %v454_v28 = vmul.f32 %v1586_v40, %v442_v41 }
  0x8e   : > { %v455_v33 = vmul.f32 %v1589_v35, %v442_v41  ;;  %v456_v34 = vmul.f32 %v1590_v36, %v442_v41  ;;  %v457_v54 = vmul.f32 %v1593_v37, %v442_v41  ;;  %v458_v17 = vmul.f32 %v1594_v11, %v442_v41 }
  0x8f   : > { %v2373_v15 = vadd.f32 %v443_v42, %v391_v48  ;;  %v2375_v61 = vadd.f32 %v444_v43, %v392_v38  ;;  %v2377_v19 = vadd.f32 %v445_v55, %v393_v39  ;;  %v2379_v27 = vadd.f32 %v446_v44, %v394_v49 }
  0x90   : > { %v2381_v45 = vadd.f32 %v447_v56, %v395_v50  ;;  %v2383_v46 = vadd.f32 %v448_v57, %v396_v51  ;;  %v2385_v12 = vadd.f32 %v449_v62, %v397_v52  ;;  %v2387_v47 = vadd.f32 %v450_v63, %v398_v53 }
  0x91   : > { %v2389_v23 = vadd.f32 %v451_v21, %v399_v16  ;;  %v2391_v24 = vadd.f32 %v452_v22, %v400_v58  ;;  %v2393_v48 = vadd.f32 %v453_v26, %v401_v59  ;;  %v2395_v38 = vadd.f32 %v454_v28, %v402_v60 }
  0x92   : > { %v2397_v39 = vadd.f32 %v455_v33, %v403_v14  ;;  %v2399_v49 = vadd.f32 %v456_v34, %v404_v13  ;;  %v2401_v50 = vadd.f32 %v457_v54, %v405_v0  ;;  %v2403_v51 = vadd.f32 %v458_v17, %v406_v18 }
  0x93   : > { %v479_v52 = vmul.f32 1.442695, %v2373_v15  ;;  %v481_v53 = vmul.f32 1.442695, %v2375_v61 }
  0x95   : > { %1913 = vpow2.f32 %v479_v52 }
  0x96   : > { %1915 = vpow2.f32 %v481_v53 }
  0x9f   : > { %v1914_v16 = vpop.eup %1913 }
  0xa0   : > { %v1916_v58 = vpop.eup %1915  ;;  %v544_v59 = vsel %vm527_vm0, %v1914_v16, 0.0 }
  0xa1   : > { %v545_v60 = vsel %vm527_vm0, %v1916_v58, 0.0 }
  0xa2   : > { %v560_v14 = vadd.f32 %v545_v60, %v544_v59 }
  0xa4   : > { %v575_v13 = vrot.slane %v560_v14, 4 }
  0xa6   : > { %v576_v0 = vadd.f32 %v575_v13, %v560_v14 }
  0xa8   : > { %v577_v18 = vrot.slane %v576_v0, 2 }
  0xaa   : > { %v578_v25 = vadd.f32 %v577_v18, %v576_v0 }
  0xac   : > { %v579_v29 = vrot.slane %v578_v25, 1 }
  0xae   : > { %v580_v30 = vadd.f32 %v579_v29, %v578_v25 }
  0xb0   : > { %v581_v31 = vadd.f32 1e-06, %v580_v30 }
  0xb2   : > { %1917 = vrcp.f32 %v581_v31 }
  0xbc   : > { %v1918_v32 = vpop.eup %1917 }
  0xbd   : > { %v583_v20 = vmul.f32 %v1918_v32, %v544_v59  ;;  %v585_v40 = vmul.f32 0.0, %v1918_v32  ;;  %v584_v35 = vmul.f32 %v1918_v32, %v545_v60 }
  0xbf   : > { %599 = vst [vmem:[#allocation2] sm:$0xff] %v583_v20  ;;  %601 = vst [vmem:[#allocation2 + $0x10] sm:$0xff] %v585_v40 }
  0xc0   : > { %602 = vst [vmem:[#allocation2 + $0x18] sm:$0xff] %v585_v40  ;;  %603 = vst [vmem:[#allocation2 + $0x20] sm:$0xff] %v585_v40 }
  0xc1   : > { %604 = vst [vmem:[#allocation2 + $0x28] sm:$0xff] %v585_v40  ;;  %605 = vst [vmem:[#allocation2 + $0x30] sm:$0xff] %v585_v40 }
  0xc2   : > { %606 = vst [vmem:[#allocation2 + $0x38] sm:$0xff] %v585_v40  ;;  %607 = vst [vmem:[#allocation2 + $0x40] sm:$0xff] %v585_v40 }
  0xc3   : > { %608 = vst [vmem:[#allocation2 + $0x48] sm:$0xff] %v585_v40  ;;  %609 = vst [vmem:[#allocation2 + $0x50] sm:$0xff] %v585_v40 }
  0xc4   : > { %610 = vst [vmem:[#allocation2 + $0x58] sm:$0xff] %v585_v40  ;;  %611 = vst [vmem:[#allocation2 + $0x60] sm:$0xff] %v585_v40 }
  0xc5   : > { %612 = vst [vmem:[#allocation2 + $0x68] sm:$0xff] %v585_v40  ;;  %613 = vst [vmem:[#allocation2 + $0x70] sm:$0xff] %v585_v40 }
  0xc6   : > { %614 = vst [vmem:[#allocation2 + $0x78] sm:$0xff] %v585_v40  ;;  %600 = vst [vmem:[#allocation2 + $0x8] sm:$0xff] %v584_v35 }
  0xc7 PF: > { %p1448_p5 = scmp.ne.s32.totalorder %s2089_s28, 1 }
  0xc8   : > { %v643_v36 = vmul.f32 (!%p1448_p5), 1.442695, %v2373_v15  ;;  %v645_v37 = vmul.f32 (!%p1448_p5), 1.442695, %v2375_v61  ;;  %v619_v11 = vld [vmem:[#allocation2] sm:$0xff] (!%p1448_p5)  ;;  %vm691_vm1 = vcmp.lt.s32.totalorder (!%p1448_p5), %v2300_v2, 16 }
  0xc9   : > { %618 = sbr.rel (%p1448_p5) target bundleno = 502 (0x1f6), region = 48  ;;  %v627_v42 = vld [vmem:[#allocation2 + $0x40] sm:$0xff] (!%p1448_p5)  ;;  %v621_v14 = vld [vmem:[#allocation2 + $0x10] sm:$0xff] (!%p1448_p5)  ;;  %v622_v13 = vld [vmem:[#allocation2 + $0x18] sm:$0xff] (!%p1448_p5) }
  0xca   : > { %v628_v43 = vld [vmem:[#allocation2 + $0x48] sm:$0xff] (!%p1448_p5)  ;;  %1919 = vpow2.f32 (!%p1448_p5), %v643_v36  ;;  %v629_v0 = vld [vmem:[#allocation2 + $0x50] sm:$0xff] (!%p1448_p5)  ;;  %v623_v25 = vld [vmem:[#allocation2 + $0x20] sm:$0xff] (!%p1448_p5)  ;;  %v636_v32 = vpack.c.bf16 (!%p1448_p5), %v622_v13, %v621_v14 }
  0xcb   : > { %v639_v44 = vpack.c.bf16 (!%p1448_p5), %v628_v43, %v627_v42  ;;  %1921 = vpow2.f32 (!%p1448_p5), %v645_v37  ;;  %v630_v18 = vld [vmem:[#allocation2 + $0x58] sm:$0xff] (!%p1448_p5)  ;;  %v624_v29 = vld [vmem:[#allocation2 + $0x28] sm:$0xff] (!%p1448_p5)  ;;  %v631_v30 = vld [vmem:[#allocation2 + $0x60] sm:$0xff] (!%p1448_p5) }
  0xcc   : > { %v632_v31 = vld [vmem:[#allocation2 + $0x68] sm:$0xff] (!%p1448_p5)  ;;  %v640_v20 = vpack.c.bf16 (!%p1448_p5), %v630_v18, %v629_v0  ;;  %v637_v40 = vpack.c.bf16 (!%p1448_p5), %v624_v29, %v623_v25  ;;  %v625_v36 = vld [vmem:[#allocation2 + $0x30] sm:$0xff] (!%p1448_p5)  ;;  %v626_v37 = vld [vmem:[#allocation2 + $0x38] sm:$0xff] (!%p1448_p5) }
  0xcd   : > { %v620_v41 = vld [vmem:[#allocation2 + $0x8] sm:$0xff] (!%p1448_p5)  ;;  %1695 = vmatprep.mubr.bf16.mxu1 (!%p1448_p5), %v639_v44  ;;  %v641_v35 = vpack.c.bf16 (!%p1448_p5), %v632_v31, %v631_v30  ;;  %v638_v42 = vpack.c.bf16 (!%p1448_p5), %v626_v37, %v625_v36 }
  0xce   : > { %v635_v55 = vpack.c.bf16 (!%p1448_p5), %v620_v41, %v619_v11  ;;  %v633_v11 = vld [vmem:[#allocation2 + $0x70] sm:$0xff] (!%p1448_p5)  ;;  %v634_v41 = vld [vmem:[#allocation2 + $0x78] sm:$0xff] (!%p1448_p5) }
  0xcf   : > { %v642_v43 = vpack.c.bf16 (!%p1448_p5), %v634_v41, %v633_v11 }
  0xd0   : > { %1687 = vmatprep.mubr.bf16.mxu0 %v635_v55 }
  0xd4   : > { %v1920_v56 = vpop.eup %1919 }
  0xd5   : > { %v1922_v57 = vpop.eup %1921  ;;  %v708_v62 = vsel %vm691_vm1, %v1920_v56, 0.0 }
  0xd6   : > { %v709_v63 = vsel %vm691_vm1, %v1922_v57, 0.0 }
  0xd7   : > { %v724_v21 = vadd.f32 %v709_v63, %v708_v62 }
  0xd9   : > { %v739_v22 = vrot.slane %v724_v21, 4 }
  0xdb   : > { %v740_v26 = vadd.f32 %v739_v22, %v724_v21 }
  0xdd   : > { %v741_v28 = vrot.slane %v740_v26, 2 }
  0xdf   : > { %v742_v33 = vadd.f32 %v741_v28, %v740_v26 }
  0xe1   : > { %v743_v34 = vrot.slane %v742_v33, 1 }
  0xe3   : > { %v744_v54 = vadd.f32 %v743_v34, %v742_v33 }
  0xe5   : > { %v745_v17 = vadd.f32 1e-06, %v744_v54 }
  0xe7   : > { %1923 = vrcp.f32 %v745_v17 }
  0xf1   : > { %v1924_v52 = vpop.eup %1923 }
  0xf2   : > { %v747_v53 = vmul.f32 %v1924_v52, %v708_v62  ;;  %v748_v16 = vmul.f32 %v1924_v52, %v709_v63  ;;  %v749_v58 = vmul.f32 0.0, %v1924_v52 }
  0xf4   : > { %v763_v59 = vpack.c.bf16 %v748_v16, %v747_v53  ;;  %v764_v60 = vpack.c.bf16 %v749_v58, %v749_v58 }
  0xf6   : > { %1671 = vmatprep.subr.bf16.mxu0 %v763_v59  ;;  %1767 = vmatprep.subr.bf16.mxu1 %v763_v59 }
  0xf7   : > { %1672 = vmatpush3.bf16.msra.mxu0 %v763_v59  ;;  %1775 = vmatpush3.bf16.msra.mxu1 %v763_v59 }
  0xf8   : > { %1673 = vmatprep.subr.bf16.mxu0 %v764_v60  ;;  %1768 = vmatprep.subr.bf16.mxu1 %v764_v60 }
  0xfb   : > { %1674 = vmatpush3.bf16.msra.mxu0 %v764_v60  ;;  %1776 = vmatpush3.bf16.msra.mxu1 %v764_v60 }
  0xfc   : > { %1675 = vmatprep.subr.bf16.mxu0 %v764_v60  ;;  %1769 = vmatprep.subr.bf16.mxu1 %v764_v60 }
  0xff   : > { %1676 = vmatpush3.bf16.msra.mxu0 %v764_v60  ;;  %1777 = vmatpush3.bf16.msra.mxu1 %v764_v60 }
 0x100   : > { %1677 = vmatprep.subr.bf16.mxu0 %v764_v60  ;;  %1770 = vmatprep.subr.bf16.mxu1 %v764_v60 }
 0x103   : > { %1678 = vmatpush3.bf16.msra.mxu0 %v764_v60  ;;  %1778 = vmatpush3.bf16.msra.mxu1 %v764_v60 }
 0x104   : > { %1679 = vmatprep.subr.bf16.mxu0 %v764_v60  ;;  %1771 = vmatprep.subr.bf16.mxu1 %v764_v60 }
 0x107   : > { %1680 = vmatpush3.bf16.msra.mxu0 %v764_v60  ;;  %1779 = vmatpush3.bf16.msra.mxu1 %v764_v60 }
 0x108   : > { %1681 = vmatprep.subr.bf16.mxu0 %v764_v60  ;;  %1772 = vmatprep.subr.bf16.mxu1 %v764_v60 }
 0x10b   : > { %1682 = vmatpush3.bf16.msra.mxu0 %v764_v60  ;;  %1780 = vmatpush3.bf16.msra.mxu1 %v764_v60 }
 0x10c   : > { %1683 = vmatprep.subr.bf16.mxu0 %v764_v60  ;;  %1773 = vmatprep.subr.bf16.mxu1 %v764_v60 }
 0x10f   : > { %1684 = vmatpush3.bf16.msra.mxu0 %v764_v60  ;;  %1781 = vmatpush3.bf16.msra.mxu1 %v764_v60 }
 0x110   : > { %1685 = vmatprep.subr.bf16.mxu0 %v764_v60  ;;  %1774 = vmatprep.subr.bf16.mxu1 %v764_v60 }
 0x113   : > { %1686 = vmatpush3.bf16.msra.mxu0 %v764_v60  ;;  %1782 = vmatpush3.bf16.msra.mxu1 %v764_v60 }
 0x116   : > { %1688 = vmatmul.mubr.bf16.vlgmr.msra.gmra.mrb[0].mxu0 %v636_v32  ;;  %1696 = vmatmul.mubr.bf16.vlgmr.msra.gmra.mrb[0].mxu1 %v640_v20 }
 0x117   : > { %1691 = vmatprep.mubr.bf16.mxu0 %v637_v40  ;;  %1699 = vmatprep.mubr.bf16.mxu1 %v641_v35 }
 0x11e   : > { %1692 = vmatmul.mubr.bf16.gmra.mrb[4].mxu0 %v638_v42  ;;  %1700 = vmatmul.mubr.bf16.gmra.mrb[4].mxu1 %v642_v43 }
 0x1e9   : > { %v1689_v55 = vpop.f32.mrb[0].mxu0  ;;  %v1697_v44 = vpop.f32.mrb[0].mxu1 }
 0x1ea   : > { %870 = vst [vmem:[#allocation2 + $0x10] sm:$0xff] %v1689_v55  ;;  %878 = vst [vmem:[#allocation2 + $0x50] sm:$0xff] %v1697_v44  ;;  %v805_v56 = vpop.f32.mrb[1].mxu0  ;;  %v837_v57 = vpop.f32.mrb[1].mxu1 }
 0x1eb   : > { %868 = vst [vmem:[#allocation2] sm:$0xff] %v805_v56  ;;  %876 = vst [vmem:[#allocation2 + $0x40] sm:$0xff] %v837_v57  ;;  %v1690_v62 = vpop.f32.mrb[2].mxu0  ;;  %v1698_v63 = vpop.f32.mrb[2].mxu1 }
 0x1ec   : > { %871 = vst [vmem:[#allocation2 + $0x18] sm:$0xff] %v1690_v62  ;;  %879 = vst [vmem:[#allocation2 + $0x58] sm:$0xff] %v1698_v63  ;;  %v808_v21 = vpop.f32.mrb[3].mxu0  ;;  %v840_v22 = vpop.f32.mrb[3].mxu1 }
 0x1ed   : > { %869 = vst [vmem:[#allocation2 + $0x8] sm:$0xff] %v808_v21  ;;  %877 = vst [vmem:[#allocation2 + $0x48] sm:$0xff] %v840_v22 }
 0x1f1   : > { %v1693_v26 = vpop.f32.mrb[4].mxu0  ;;  %v1701_v28 = vpop.f32.mrb[4].mxu1 }
 0x1f2   : > { %874 = vst [vmem:[#allocation2 + $0x30] sm:$0xff] %v1693_v26  ;;  %882 = vst [vmem:[#allocation2 + $0x70] sm:$0xff] %v1701_v28  ;;  %v821_v33 = vpop.f32.mrb[5].mxu0  ;;  %v853_v34 = vpop.f32.mrb[5].mxu1 }
 0x1f3   : > { %872 = vst [vmem:[#allocation2 + $0x20] sm:$0xff] %v821_v33  ;;  %880 = vst [vmem:[#allocation2 + $0x60] sm:$0xff] %v853_v34  ;;  %v1694_v54 = vpop.f32.mrb[6].mxu0  ;;  %v1702_v17 = vpop.f32.mrb[6].mxu1 }
 0x1f4   : > { %875 = vst [vmem:[#allocation2 + $0x38] sm:$0xff] %v1694_v54  ;;  %883 = vst [vmem:[#allocation2 + $0x78] sm:$0xff] %v1702_v17  ;;  %v824_v52 = vpop.f32.mrb[7].mxu0  ;;  %v856_v53 = vpop.f32.mrb[7].mxu1 }
 0x1f5   : > { %873 = vst [vmem:[#allocation2 + $0x28] sm:$0xff] %v824_v52  ;;  %881 = vst [vmem:[#allocation2 + $0x68] sm:$0xff] %v856_v53 }
 0x1f6 PF: > { %p1449_p13 = scmp.lt.s32.totalorder %s2089_s28, 2 }
 0x1f7   : > { %v912_v16 = vpack.c.bf16 (!%p1449_p13), %v2375_v61, %v2373_v15  ;;  %v913_v58 = vpack.c.bf16 (!%p1449_p13), %v2379_v27, %v2377_v19  ;;  %v888_v59 = vld [vmem:[#allocation2] sm:$0xff] (!%p1449_p13)  ;;  %v889_v60 = vld [vmem:[#allocation2 + $0x8] sm:$0xff] (!%p1449_p13)  ;;  %v914_v25 = vpack.c.bf16 (!%p1449_p13), %v2383_v46, %v2381_v45  ;;  %v915_v15 = vpack.c.bf16 (!%p1449_p13), %v2387_v47, %v2385_v12  ;;  %v890_v46 = vld [vmem:[#allocation2 + $0x10] sm:$0xff] (!%p1449_p13) }
 0x1f8   : > { %887 = sbr.rel (%p1449_p13) target bundleno = 761 (0x2f9), region = 52  ;;  %v896_v14 = vld [vmem:[#allocation2 + $0x40] sm:$0xff] (!%p1449_p13)  ;;  %v897_v13 = vld [vmem:[#allocation2 + $0x48] sm:$0xff] (!%p1449_p13)  ;;  %v904_v0 = vpack.c.bf16 (!%p1449_p13), %v889_v60, %v888_v59  ;;  %v916_v61 = vpack.c.bf16 (!%p1449_p13), %v2391_v24, %v2389_v23  ;;  %v917_v19 = vpack.c.bf16 (!%p1449_p13), %v2395_v38, %v2393_v48  ;;  %v918_v27 = vpack.c.bf16 (!%p1449_p13), %v2399_v49, %v2397_v39  ;;  %v891_v12 = vld [vmem:[#allocation2 + $0x18] sm:$0xff] (!%p1449_p13) }
 0x1f9   : > { %1703 = vmatprep.subr.bf16.mxu0 (!%p1449_p13), %v912_v16  ;;  %1783 = vmatprep.subr.bf16.mxu1 (!%p1449_p13), %v912_v16  ;;  %v908_v18 = vpack.c.bf16 (!%p1449_p13), %v897_v13, %v896_v14  ;;  %v919_v45 = vpack.c.bf16 (!%p1449_p13), %v2403_v51, %v2401_v50  ;;  %v898_v47 = vld [vmem:[#allocation2 + $0x50] sm:$0xff] (!%p1449_p13)  ;;  %v899_v23 = vld [vmem:[#allocation2 + $0x58] sm:$0xff] (!%p1449_p13)  ;;  %v905_v39 = vpack.c.bf16 (!%p1449_p13), %v891_v12, %v890_v46 }
 0x1fa   : > { %1704 = vmatpush3.bf16.msra.mxu0 (!%p1449_p13), %v912_v16  ;;  %1791 = vmatpush3.bf16.msra.mxu1 (!%p1449_p13), %v912_v16  ;;  %v892_v24 = vld [vmem:[#allocation2 + $0x20] sm:$0xff] (!%p1449_p13)  ;;  %v909_v49 = vpack.c.bf16 (!%p1449_p13), %v899_v23, %v898_v47  ;;  %v894_v50 = vld [vmem:[#allocation2 + $0x30] sm:$0xff] (!%p1449_p13) }
 0x1fb   : > { %1705 = vmatprep.subr.bf16.mxu0 (!%p1449_p13), %v913_v58  ;;  %1784 = vmatprep.subr.bf16.mxu1 (!%p1449_p13), %v913_v58  ;;  %v900_v38 = vld [vmem:[#allocation2 + $0x60] sm:$0xff] (!%p1449_p13)  ;;  %v895_v51 = vld [vmem:[#allocation2 + $0x38] sm:$0xff] (!%p1449_p13)  ;;  %v902_v32 = vld [vmem:[#allocation2 + $0x70] sm:$0xff] (!%p1449_p13) }
 0x1fc   : > { %1719 = vmatprep.mubr.bf16.mxu0 (!%p1449_p13), %v904_v0  ;;  %1727 = vmatprep.mubr.bf16.mxu1 (!%p1449_p13), %v908_v18  ;;  %v893_v48 = vld [vmem:[#allocation2 + $0x28] sm:$0xff] (!%p1449_p13)  ;;  %v903_v20 = vld [vmem:[#allocation2 + $0x78] sm:$0xff] (!%p1449_p13)  ;;  %v907_v40 = vpack.c.bf16 (!%p1449_p13), %v895_v51, %v894_v50 }
 0x1fd   : > { %v901_v29 = vld [vmem:[#allocation2 + $0x68] sm:$0xff] (!%p1449_p13)  ;;  %v906_v30 = vpack.c.bf16 (!%p1449_p13), %v893_v48, %v892_v24  ;;  %v911_v35 = vpack.c.bf16 (!%p1449_p13), %v903_v20, %v902_v32 }
 0x1fe   : > { %1706 = vmatpush3.bf16.msra.mxu0 (!%p1449_p13), %v913_v58  ;;  %1792 = vmatpush3.bf16.msra.mxu1 (!%p1449_p13), %v913_v58  ;;  %v910_v31 = vpack.c.bf16 (!%p1449_p13), %v901_v29, %v900_v38 }
 0x1ff   : > { %1707 = vmatprep.subr.bf16.mxu0 %v914_v25  ;;  %1785 = vmatprep.subr.bf16.mxu1 %v914_v25 }
 0x202   : > { %1708 = vmatpush3.bf16.msra.mxu0 %v914_v25  ;;  %1793 = vmatpush3.bf16.msra.mxu1 %v914_v25 }
 0x203   : > { %1709 = vmatprep.subr.bf16.mxu0 %v915_v15  ;;  %1786 = vmatprep.subr.bf16.mxu1 %v915_v15 }
 0x206   : > { %1710 = vmatpush3.bf16.msra.mxu0 %v915_v15  ;;  %1794 = vmatpush3.bf16.msra.mxu1 %v915_v15 }
 0x207   : > { %1711 = vmatprep.subr.bf16.mxu0 %v916_v61  ;;  %1787 = vmatprep.subr.bf16.mxu1 %v916_v61 }
 0x20a   : > { %1712 = vmatpush3.bf16.msra.mxu0 %v916_v61  ;;  %1795 = vmatpush3.bf16.msra.mxu1 %v916_v61 }
 0x20b   : > { %1713 = vmatprep.subr.bf16.mxu0 %v917_v19  ;;  %1788 = vmatprep.subr.bf16.mxu1 %v917_v19 }
 0x20e   : > { %1714 = vmatpush3.bf16.msra.mxu0 %v917_v19  ;;  %1796 = vmatpush3.bf16.msra.mxu1 %v917_v19 }
 0x20f   : > { %1715 = vmatprep.subr.bf16.mxu0 %v918_v27  ;;  %1789 = vmatprep.subr.bf16.mxu1 %v918_v27 }
 0x212   : > { %1716 = vmatpush3.bf16.msra.mxu0 %v918_v27  ;;  %1797 = vmatpush3.bf16.msra.mxu1 %v918_v27 }
 0x213   : > { %1717 = vmatprep.subr.bf16.mxu0 %v919_v45  ;;  %1790 = vmatprep.subr.bf16.mxu1 %v919_v45 }
 0x216   : > { %1718 = vmatpush3.bf16.msra.mxu0 %v919_v45  ;;  %1798 = vmatpush3.bf16.msra.mxu1 %v919_v45 }
 0x219   : > { %1720 = vmatmul.mubr.bf16.vlgmr.msra.gmra.mrb[0].mxu0 %v905_v39  ;;  %1728 = vmatmul.mubr.bf16.vlgmr.msra.gmra.mrb[0].mxu1 %v909_v49 }
 0x21a   : > { %1723 = vmatprep.mubr.bf16.mxu0 %v906_v30  ;;  %1731 = vmatprep.mubr.bf16.mxu1 %v910_v31 }
 0x221   : > { %1724 = vmatmul.mubr.bf16.gmra.mrb[4].mxu0 %v907_v40  ;;  %1732 = vmatmul.mubr.bf16.gmra.mrb[4].mxu1 %v911_v35 }
 0x2ec   : > { %v1721_v36 = vpop.f32.mrb[0].mxu0  ;;  %v1729_v37 = vpop.f32.mrb[0].mxu1 }
 0x2ed   : > { %1019 = vst [vmem:[#allocation2 + $0x10] sm:$0xff] %v1721_v36  ;;  %1027 = vst [vmem:[#allocation2 + $0x50] sm:$0xff] %v1729_v37  ;;  %v954_v11 = vpop.f32.mrb[1].mxu0  ;;  %v986_v41 = vpop.f32.mrb[1].mxu1 }
 0x2ee   : > { %1017 = vst [vmem:[#allocation2] sm:$0xff] %v954_v11  ;;  %1025 = vst [vmem:[#allocation2 + $0x40] sm:$0xff] %v986_v41  ;;  %v1722_v42 = vpop.f32.mrb[2].mxu0  ;;  %v1730_v43 = vpop.f32.mrb[2].mxu1 }
 0x2ef   : > { %1020 = vst [vmem:[#allocation2 + $0x18] sm:$0xff] %v1722_v42  ;;  %1028 = vst [vmem:[#allocation2 + $0x58] sm:$0xff] %v1730_v43  ;;  %v957_v55 = vpop.f32.mrb[3].mxu0  ;;  %v989_v44 = vpop.f32.mrb[3].mxu1 }
 0x2f0   : > { %1018 = vst [vmem:[#allocation2 + $0x8] sm:$0xff] %v957_v55  ;;  %1026 = vst [vmem:[#allocation2 + $0x48] sm:$0xff] %v989_v44 }
 0x2f4   : > { %v1725_v56 = vpop.f32.mrb[4].mxu0  ;;  %v1733_v57 = vpop.f32.mrb[4].mxu1 }
 0x2f5   : > { %1023 = vst [vmem:[#allocation2 + $0x30] sm:$0xff] %v1725_v56  ;;  %1031 = vst [vmem:[#allocation2 + $0x70] sm:$0xff] %v1733_v57  ;;  %v970_v62 = vpop.f32.mrb[5].mxu0  ;;  %v1002_v63 = vpop.f32.mrb[5].mxu1 }
 0x2f6   : > { %1021 = vst [vmem:[#allocation2 + $0x20] sm:$0xff] %v970_v62  ;;  %1029 = vst [vmem:[#allocation2 + $0x60] sm:$0xff] %v1002_v63  ;;  %v1726_v21 = vpop.f32.mrb[6].mxu0  ;;  %v1734_v22 = vpop.f32.mrb[6].mxu1 }
 0x2f7   : > { %1024 = vst [vmem:[#allocation2 + $0x38] sm:$0xff] %v1726_v21  ;;  %1032 = vst [vmem:[#allocation2 + $0x78] sm:$0xff] %v1734_v22  ;;  %v973_v26 = vpop.f32.mrb[7].mxu0  ;;  %v1005_v28 = vpop.f32.mrb[7].mxu1 }
 0x2f8   : > { %1022 = vst [vmem:[#allocation2 + $0x28] sm:$0xff] %v973_v26  ;;  %1030 = vst [vmem:[#allocation2 + $0x68] sm:$0xff] %v1005_v28 }
 0x2f9 PF: > { %s1466_s14 = sshll.u32 %s2093_s29, 6  ;;  %v1033_v33 = vld [vmem:[#allocation2] sm:$0xff]  ;;  %v1034_v34 = vld [vmem:[#allocation2 + $0x8] sm:$0xff]  ;;  %v1035_v54 = vld [vmem:[#allocation2 + $0x10] sm:$0xff]  ;;  %vm1049_vm2 = vcmp.eq.s32.totalorder %v2298_v1, %v2300_v2  ;;  %vm1050_vm3 = vcmp.eq.s32.totalorder %v2305_v3, %v2300_v2  ;;  %vm1051_vm4 = vcmp.eq.s32.totalorder %v2308_v4, %v2300_v2  ;;  %vm1052_vm5 = vcmp.eq.s32.totalorder %v2311_v5, %v2300_v2  ;;  %s1147_s8 = scalar_lea.vmem %s2598_s3, %s2093_s29 }
 0x2fa   : > { %s2436_s20 = scalar_lea.vmem [#allocation8], %s1466_s14  ;;  %v1036_v53 = vld [vmem:[#allocation2 + $0x18] sm:$0xff]  ;;  %v2446_v1 = vsel %vm1049_vm2, 0.0, %v1033_v33  ;;  %v2448_v58 = vsel %vm1050_vm3, 0.0, %v1034_v34  ;;  %vm1053_vm6 = vcmp.eq.s32.totalorder %v2314_v6, %v2300_v2  ;;  %v2453_v4 = vsel %vm1051_vm4, 0.0, %v1035_v54  ;;  %v1041_v27 = vld [vmem:[#allocation2 + $0x40] sm:$0xff] }
 0x2fb   : > { %v1925_v17 = vld [vmem:[%s2436_s20] sm:$0xff]   ;;  %v1926_v52 = vld [vmem:[%s2436_s20 + $0x8] sm:$0xff]   ;;  %v1927_v3 = vld [vmem:[%s2436_s20 + $0x10] sm:$0xff]   ;;  %v1081_v59 = vadd.f32 %v2448_v58, %v2446_v1  ;;  %v2457_v5 = vsel %vm1052_vm5, 0.0, %v1036_v53  ;;  %vm1054_vm7 = vcmp.eq.s32.totalorder %v2320_v7, %v2300_v2  ;;  %vm1055_vm8 = vcmp.eq.s32.totalorder %v2323_v8, %v2300_v2  ;;  %s1815_s16 = smul.u32 48, %s2093_s29  ;;  %s1462_s21 = sshll.u32 %s2089_s28, 4 }
 0x2fc   : > { %1735 = vmatprep.subr.bf16.mxu0 %v1925_v17  ;;  %1799 = vmatprep.subr.bf16.mxu1 %v1925_v17  ;;  %v1928_v6 = vld [vmem:[%s2436_s20 + $0x18] sm:$0xff]   ;;  %vm1056_vm9 = vcmp.eq.s32.totalorder %v2326_v9, %v2300_v2  ;;  %v1929_v19 = vld [vmem:[%s2436_s20 + $0x20] sm:$0xff]   ;;  %vm1057_vm10 = vcmp.eq.s32.totalorder %v2329_v10, %v2300_v2  ;;  %v1042_v46 = vld [vmem:[#allocation2 + $0x48] sm:$0xff]  ;;  %s1348_s29 = sshll.u32 %s2406_s11, 4  ;;  %s2543_s24 = scalar_lea.sflag [#allocation7], %s195_s0  ;;  %s2533_s29 = int_to_ptr.vmem [resolvable:$true] %s1348_s29 }
 0x2fd   : > { %1736 = vmatpush3.bf16.msra.mxu0 %v1925_v17  ;;  %1807 = vmatpush3.bf16.msra.mxu1 %v1925_v17  ;;  %v1037_v16 = vld [vmem:[#allocation2 + $0x20] sm:$0xff]  ;;  %v1082_v14 = vadd.f32 %v1081_v59, %v2453_v4  ;;  %v1039_v0 = vld [vmem:[#allocation2 + $0x30] sm:$0xff]  ;;  %v1073_v47 = vsel %vm1057_vm10, 0.0, %v1041_v27  ;;  %v2625_v10 = vld [vmem:[#allocation19_spill] sm:$0xff]  ;;  %s2520_s15 = sadd.s32 %s1815_s16, %s1462_s21  ;;  %s2001_s6 = scalar_lea.vmem %s2533_s29, 2048 }
 0x2fe   : > { %1737 = vmatprep.subr.bf16.mxu0 %v1926_v52  ;;  %1800 = vmatprep.subr.bf16.mxu1 %v1926_v52  ;;  %v2462_v13 = vsel %vm1053_vm6, 0.0, %v1037_v16  ;;  %v1040_v15 = vld [vmem:[#allocation2 + $0x38] sm:$0xff]  ;;  %v2473_v61 = vsel %vm1055_vm8, 0.0, %v1039_v0  ;;  %v2624_v9 = vld [vmem:[#allocation18_spill] sm:$0xff]  ;;  %v1043_v24 = vld [vmem:[#allocation2 + $0x50] sm:$0xff]  ;;  %vm1059_vm12 = vcmp.eq.s32.totalorder %v2625_v10, %v2300_v2  ;;  %s1463_s28 = sshll.u32 %s2520_s15, 7  ;;  %p2002_p1 = scmp.ne.s32.totalorder %s2533_s29, %s2001_s6 }
 0x2ff   : > { %v1038_v60 = vld [vmem:[#allocation2 + $0x28] sm:$0xff]  ;;  %v1083_v18 = vadd.f32 %v1082_v14, %v2457_v5  ;;  %v2479_v45 = vsel %vm1056_vm9, 0.0, %v1040_v15  ;;  %vm1058_vm11 = vcmp.eq.s32.totalorder %v2624_v9, %v2300_v2  ;;  %v1930_v23 = vld [vmem:[%s2436_s20 + $0x28] sm:$0xff]   ;;  %v1044_v29 = vld [vmem:[#allocation2 + $0x58] sm:$0xff]  ;;  %v1075_v30 = vsel %vm1059_vm12, 0.0, %v1043_v24  ;;  %s2531_s23 = scalar_lea.hbm %s2599_s4, %s1463_s28  ;;  %p2631_p4 = scmp.ne.s32.totalorder %s2609_s12, 0 }
 0x300   : > { %v2468_v25 = vsel %vm1054_vm7, 0.0, %v1038_v60  ;;  %v1074_v38 = vsel %vm1058_vm11, 0.0, %v1042_v46  ;;  %v2626_v39 = vld [vmem:[#allocation20_spill] sm:$0xff]  ;;  %v1931_v31 = vld [vmem:[%s2436_s20 + $0x30] sm:$0xff]   ;;  %v1045_v50 = vld [vmem:[#allocation2 + $0x60] sm:$0xff]  ;;  %s2112_s7 = smov [#allocation10]  }
 0x301   : > { %1738 = vmatpush3.bf16.msra.mxu0 %v1926_v52  ;;  %1808 = vmatpush3.bf16.msra.mxu1 %v1926_v52  ;;  %v1084_v7 = vadd.f32 %v1083_v18, %v2462_v13  ;;  %vm1060_vm13 = vcmp.eq.s32.totalorder %v2626_v39, %v2300_v2  ;;  %v2627_v51 = vld [vmem:[#allocation21_spill] sm:$0xff]  ;;  %v1046_v40 = vld [vmem:[#allocation2 + $0x68] sm:$0xff]  ;;  %v2628_v35 = vld [vmem:[#allocation22_spill] sm:$0xff]  ;;  %p2003_p7 = pnand %p2002_p1, %p2631_p4  ;;  %s2005_s10 = sshll.u32 %s2112_s7, 4  ;;  %s2006_s10 = int_to_ptr.vmem [resolvable:$false] %s2005_s10 }
 0x302   : > { %1739 = vmatprep.subr.bf16.mxu0 %v1927_v3  ;;  %1801 = vmatprep.subr.bf16.mxu1 %v1927_v3  ;;  %vm1061_vm14 = vcmp.eq.s32.totalorder %v2627_v51, %v2300_v2  ;;  %v1076_v20 = vsel %vm1060_vm13, 0.0, %v1044_v29  ;;  %vm1062_vm15 = vcmp.eq.s32.totalorder %v2628_v35, %v2300_v2  ;;  %v1932_v11 = vld [vmem:[%s2436_s20 + $0x38] sm:$0xff]   ;;  %v2629_v42 = vld [vmem:[#allocation23_spill] sm:$0xff]  ;;  %v1048_v44 = vld [vmem:[#allocation2 + $0x78] sm:$0xff]  ;;  %s2007_s14 = scalar_lea.vmem %s2006_s10, 4096  ;;  %p2008_p9 = scmp.lt.s32.totalorder %s2533_s29, %s2006_s10 }
 0x303   : > { %v1085_v8 = vadd.f32 %v1084_v7, %v2468_v25  ;;  %v1077_v37 = vsel %vm1061_vm14, 0.0, %v1045_v50  ;;  %v1047_v41 = vld [vmem:[#allocation2 + $0x70] sm:$0xff]  ;;  %vm1063_vm0 = vcmp.eq.s32.totalorder %v2629_v42, %v2300_v2  ;;  %v1078_v55 = vsel %vm1062_vm15, 0.0, %v1046_v40  ;;  %v1452_v24 = vld [vmem:[%s1147_s8] ss:$0 sm:$0xff]  ;;  %p2004_p8 = pneg %p2003_p7  ;;  %p2009_p10 = scmp.lt.s32.totalorder %s2007_s14, %s2001_s6 }
 0x304   : > { %v2630_v56 = vld [vmem:[#allocation24_spill] sm:$0xff]  ;;  %v1079_v62 = vsel %vm1063_vm0, 0.0, %v1047_v41 }
 0x305   : > { %1740 = vmatpush3.bf16.msra.mxu0 %v1927_v3  ;;  %1809 = vmatpush3.bf16.msra.mxu1 %v1927_v3  ;;  %v1086_v12 = vadd.f32 %v1085_v8, %v2473_v61  ;;  %vm1064_vm1 = vcmp.eq.s32.totalorder %v2630_v56, %v2300_v2  ;;  %p2010_p12 = por %p2009_p10, %p2008_p9 }
 0x306   : > { %1741 = vmatprep.subr.bf16.mxu0 %v1928_v6  ;;  %1802 = vmatprep.subr.bf16.mxu1 %v1928_v6  ;;  %v1080_v21 = vsel %vm1064_vm1, 0.0, %v1048_v44 }
 0x307   : > { %v1087_v48 = vadd.f32 %v1086_v12, %v2479_v45  ;;  %p2011_p0 = pnand %p2010_p12, %p2004_p8 }
 0x309   : > { %1742 = vmatpush3.bf16.msra.mxu0 %v1928_v6  ;;  %1810 = vmatpush3.bf16.msra.mxu1 %v1928_v6  ;;  %v1088_v49 = vadd.f32 %v1087_v48, %v1073_v47 }
 0x30a   : > { %1743 = vmatprep.subr.bf16.mxu0 %v1929_v19  ;;  %1803 = vmatprep.subr.bf16.mxu1 %v1929_v19 }
 0x30b   : > { %v1089_v32 = vadd.f32 %v1088_v49, %v1074_v38 }
 0x30d   : > { %1744 = vmatpush3.bf16.msra.mxu0 %v1929_v19  ;;  %1811 = vmatpush3.bf16.msra.mxu1 %v1929_v19  ;;  %v1090_v36 = vadd.f32 %v1089_v32, %v1075_v30 }
 0x30e   : > { %1745 = vmatprep.subr.bf16.mxu0 %v1930_v23  ;;  %1804 = vmatprep.subr.bf16.mxu1 %v1930_v23 }
 0x30f   : > { %v1091_v43 = vadd.f32 %v1090_v36, %v1076_v20 }
 0x311   : > { %1746 = vmatpush3.bf16.msra.mxu0 %v1930_v23  ;;  %1812 = vmatpush3.bf16.msra.mxu1 %v1930_v23  ;;  %v1092_v57 = vadd.f32 %v1091_v43, %v1077_v37 }
 0x312   : > { %1747 = vmatprep.subr.bf16.mxu0 %v1931_v31  ;;  %1805 = vmatprep.subr.bf16.mxu1 %v1931_v31 }
 0x313   : > { %v1093_v63 = vadd.f32 %v1092_v57, %v1078_v55 }
 0x315   : > { %1748 = vmatpush3.bf16.msra.mxu0 %v1931_v31  ;;  %1813 = vmatpush3.bf16.msra.mxu1 %v1931_v31  ;;  %v1094_v22 = vadd.f32 %v1093_v63, %v1079_v62 }
 0x316   : > { %1749 = vmatprep.subr.bf16.mxu0 %v1932_v11  ;;  %1806 = vmatprep.subr.bf16.mxu1 %v1932_v11 }
 0x317   : > { %v1095_v26 = vadd.f32 %v1094_v22, %v1080_v21 }
 0x319   : > { %1750 = vmatpush3.bf16.msra.mxu0 %v1932_v11  ;;  %1814 = vmatpush3.bf16.msra.mxu1 %v1932_v11  ;;  %v1096_v28 = vrot.slane %v1095_v26, 4 }
 0x31b   : > { %v1097_v33 = vadd.f32 %v1096_v28, %v1095_v26 }
 0x31d   : > { %v1098_v34 = vrot.slane %v1097_v33, 2 }
 0x31f   : > { %v1099_v54 = vadd.f32 %v1098_v34, %v1097_v33 }
 0x321   : > { %v1100_v17 = vrot.slane %v1099_v54, 1 }
 0x323   : > { %v1101_v52 = vadd.f32 %v1100_v17, %v1099_v54 }
 0x325   : > { %v1102_v53 = vadd.f32 1e-06, %v1101_v52 }
 0x327   : > { %1933 = vrcp.f32 %v1102_v53 }
 0x331   : > { %v1934_v2 = vpop.eup %1933 }
 0x332   : > { %v1104_v16 = vmul.f32 %v1934_v2, %v2446_v1  ;;  %v1105_v3 = vmul.f32 %v1934_v2, %v2448_v58  ;;  %v1112_v59 = vmul.f32 %v1934_v2, %v1073_v47  ;;  %v1113_v60 = vmul.f32 %v1934_v2, %v1074_v38 }
 0x333   : > { %v1106_v14 = vmul.f32 %v1934_v2, %v2453_v4  ;;  %v1107_v6 = vmul.f32 %v1934_v2, %v2457_v5  ;;  %v1114_v0 = vmul.f32 %v1934_v2, %v1075_v30  ;;  %v1115_v18 = vmul.f32 %v1934_v2, %v1076_v20 }
 0x334   : > { %v1120_v15 = vpack.c.bf16 %v1105_v3, %v1104_v16  ;;  %v1124_v7 = vpack.c.bf16 %v1113_v60, %v1112_v59  ;;  %v1108_v19 = vmul.f32 %v1934_v2, %v2462_v13  ;;  %v1109_v27 = vmul.f32 %v1934_v2, %v2468_v25 }
 0x335   : > { %v1121_v8 = vpack.c.bf16 %v1107_v6, %v1106_v14  ;;  %v1125_v46 = vpack.c.bf16 %v1115_v18, %v1114_v0  ;;  %v1116_v9 = vmul.f32 %v1934_v2, %v1077_v37  ;;  %v1117_v1 = vmul.f32 %v1934_v2, %v1078_v55 }
 0x336   : > { %1751 = vmatprep.mubr.bf16.mxu0 %v1120_v15  ;;  %1759 = vmatprep.mubr.bf16.mxu1 %v1124_v7  ;;  %v1122_v58 = vpack.c.bf16 %v1109_v27, %v1108_v19  ;;  %v1110_v4 = vmul.f32 %v1934_v2, %v2473_v61  ;;  %v1111_v5 = vmul.f32 %v1934_v2, %v2479_v45 }
 0x337   : > { %1752 = vmatmul.mubr.bf16.vlgmr.msra.gmra.mrb[0].mxu0 %v1121_v8  ;;  %1760 = vmatmul.mubr.bf16.vlgmr.msra.gmra.mrb[0].mxu1 %v1125_v46  ;;  %v1126_v12 = vpack.c.bf16 %v1117_v1, %v1116_v9  ;;  %v1118_v47 = vmul.f32 %v1934_v2, %v1079_v62  ;;  %v1119_v23 = vmul.f32 %v1934_v2, %v1080_v21 }
 0x338   : > { %1755 = vmatprep.mubr.bf16.mxu0 %v1122_v58  ;;  %v1123_v13 = vpack.c.bf16 %v1111_v5, %v1110_v4 }
 0x339   : > { %1763 = vmatprep.mubr.bf16.mxu1 %v1126_v12  ;;  %v1127_v25 = vpack.c.bf16 %v1119_v23, %v1118_v47 }
 0x33f   : > { %1756 = vmatmul.mubr.bf16.gmra.mrb[4].mxu0 %v1123_v13  ;;  %1764 = vmatmul.mubr.bf16.gmra.mrb[4].mxu1 %v1127_v25 }
 0x40a   : > { %v1753_v10 = vpop.f32.mrb[0].mxu0  ;;  %v1761_v61 = vpop.f32.mrb[0].mxu1 }
 0x40b   : > { %v1246_v45 = vadd.f32 %v1753_v10, %v1452_v24  ;;  %v1278_v48 = vadd.f32 %v1761_v61, %v1452_v24  ;;  %v1237_v38 = vpop.f32.mrb[1].mxu0  ;;  %v1269_v29 = vpop.f32.mrb[1].mxu1 }
 0x40c   : > { %v1238_v39 = vadd.f32 %v1452_v24, %v1237_v38  ;;  %v1270_v49 = vadd.f32 %v1452_v24, %v1269_v29  ;;  %v1754_v30 = vpop.f32.mrb[2].mxu0  ;;  %v1762_v31 = vpop.f32.mrb[2].mxu1 }
 0x40d   : > { %v1302_v50 = vmax.f32 %v1246_v45, 0.0  ;;  %v1310_v51 = vmax.f32 %v1278_v48, 0.0  ;;  %v1249_v32 = vadd.f32 %v1754_v30, %v1452_v24  ;;  %v1281_v20 = vadd.f32 %v1762_v31, %v1452_v24  ;;  %v1240_v40 = vpop.f32.mrb[3].mxu0  ;;  %v1272_v35 = vpop.f32.mrb[3].mxu1 }
 0x40e   : > { %v1300_v36 = vmax.f32 %v1238_v39, 0.0  ;;  %v1308_v37 = vmax.f32 %v1270_v49, 0.0  ;;  %v1241_v11 = vadd.f32 %v1452_v24, %v1240_v40  ;;  %v1273_v41 = vadd.f32 %v1452_v24, %v1272_v35 }
 0x40f   : > { %1318 = vst [vmem:[%s2406_s11 + $0x10] sm:$0xff] %v1302_v50  ;;  %1326 = vst [vmem:[%s2406_s11 + $0x50] sm:$0xff] %v1310_v51  ;;  %v1303_v42 = vmax.f32 %v1249_v32, 0.0  ;;  %v1311_v43 = vmax.f32 %v1281_v20, 0.0 }
 0x410   : > { %1316 = vst [vmem:[%s2406_s11] sm:$0xff] %v1300_v36  ;;  %1324 = vst [vmem:[%s2406_s11 + $0x40] sm:$0xff] %v1308_v37  ;;  %v1301_v55 = vmax.f32 %v1241_v11, 0.0  ;;  %v1309_v44 = vmax.f32 %v1273_v41, 0.0 }
 0x411   : > { %1319 = vst [vmem:[%s2406_s11 + $0x18] sm:$0xff] %v1303_v42  ;;  %1327 = vst [vmem:[%s2406_s11 + $0x58] sm:$0xff] %v1311_v43 }
 0x412   : > { %1317 = vst [vmem:[%s2406_s11 + $0x8] sm:$0xff] %v1301_v55  ;;  %1325 = vst [vmem:[%s2406_s11 + $0x48] sm:$0xff] %v1309_v44  ;;  %v1757_v56 = vpop.f32.mrb[4].mxu0  ;;  %v1765_v57 = vpop.f32.mrb[4].mxu1 }
 0x413   : > { %v1262_v62 = vadd.f32 %v1757_v56, %v1452_v24  ;;  %v1294_v63 = vadd.f32 %v1765_v57, %v1452_v24  ;;  %v1253_v21 = vpop.f32.mrb[5].mxu0  ;;  %v1285_v22 = vpop.f32.mrb[5].mxu1 }
 0x414   : > { %v1254_v26 = vadd.f32 %v1452_v24, %v1253_v21  ;;  %v1286_v28 = vadd.f32 %v1452_v24, %v1285_v22  ;;  %v1758_v33 = vpop.f32.mrb[6].mxu0  ;;  %v1766_v34 = vpop.f32.mrb[6].mxu1 }
 0x415   : > { %v1306_v54 = vmax.f32 %v1262_v62, 0.0  ;;  %v1314_v17 = vmax.f32 %v1294_v63, 0.0  ;;  %v1265_v52 = vadd.f32 %v1758_v33, %v1452_v24  ;;  %v1297_v53 = vadd.f32 %v1766_v34, %v1452_v24  ;;  %v1256_v2 = vpop.f32.mrb[7].mxu0  ;;  %v1288_v16 = vpop.f32.mrb[7].mxu1 }
 0x416   : > { %v1304_v3 = vmax.f32 %v1254_v26, 0.0  ;;  %v1312_v59 = vmax.f32 %v1286_v28, 0.0  ;;  %v1257_v60 = vadd.f32 %v1452_v24, %v1256_v2  ;;  %v1289_v14 = vadd.f32 %v1452_v24, %v1288_v16 }
 0x417   : > { %1322 = vst [vmem:[%s2406_s11 + $0x30] sm:$0xff] %v1306_v54  ;;  %1330 = vst [vmem:[%s2406_s11 + $0x70] sm:$0xff] %v1314_v17  ;;  %v1307_v6 = vmax.f32 %v1265_v52, 0.0  ;;  %v1315_v0 = vmax.f32 %v1297_v53, 0.0 }
 0x418   : > { %1320 = vst [vmem:[%s2406_s11 + $0x20] sm:$0xff] %v1304_v3  ;;  %1328 = vst [vmem:[%s2406_s11 + $0x60] sm:$0xff] %v1312_v59  ;;  %v1305_v18 = vmax.f32 %v1257_v60, 0.0  ;;  %v1313_v15 = vmax.f32 %v1289_v14, 0.0 }
 0x419   : > { %1323 = vst [vmem:[%s2406_s11 + $0x38] sm:$0xff] %v1307_v6  ;;  %1331 = vst [vmem:[%s2406_s11 + $0x78] sm:$0xff] %v1315_v0 }
 0x41a   : > { %1321 = vst [vmem:[%s2406_s11 + $0x28] sm:$0xff] %v1305_v18  ;;  %1329 = vst [vmem:[%s2406_s11 + $0x68] sm:$0xff] %v1313_v15 }
 0x41b   : > { %2014 = shalt.err (!%p2011_p0)
}
 0x41c   : > { %s2015_s0 = scalar_lea.hbm %s2531_s23, 2048  ;;  %s2019_s9 = scalar_lea.hbm %s2599_s4, 18432 }
 0x41d   : > { %p2016_p2 = scmp.ne.s32.totalorder %s2531_s23, %s2015_s0  ;;  %p2020_p3 = scmp.lt.u32.totalorder %s2531_s23, %s2599_s4 }
 0x41e   : > { %p2021_p5 = scmp.lt.u32.totalorder %s2019_s9, %s2015_s0  ;;  %p2023_p1 = scmp.lt.u32.totalorder %s2015_s0, %s2531_s23 }
 0x41f   : > { %p2017_p6 = pnand %p2016_p2, %p2631_p4 }
 0x420   : > { %p2022_p13 = por %p2021_p5, %p2020_p3 }
 0x421   : > { %p2018_p11 = pneg %p2017_p6 }
 0x422   : > { %p2024_p7 = por %p2023_p1, %p2022_p13 }
 0x424   : > { %p2025_p8 = pnand %p2024_p7, %p2018_p11 }
 0x426   : > { %2028 = shalt.err (!%p2025_p8)
}
 0x427   : > { %s2113_s16 = smov 128   ;;  %s2114_s21 = smov 8  }
 0x428   : > { %1824 = dma.vmem_to_hbm [thread:$0]  (%p2631_p4), %s2533_s29, 2048, %s2531_s23, %s2543_s24, %s2113_s16, %s2113_s16, %s2114_s21  }
 0x429 PF: > { %p1841_p9 = scmp.ge.s32.totalorder %s2105_s5, 2  ;;  %s1363_s15 = sand.u32 1, %s2077_s25  }
 0x42a   : > { %p2632_p10 = scmp.ne.s32.totalorder %s2611_s13, 0  ;;  %s1364_s28 = scalar_lea.sflag [#allocation7], %s1363_s15 }
 0x42c   : > { %p1834_p12 = pnand %p1841_p9, %p2632_p10 }
 0x42e   : > { %2072 = dma.done.wait (!%p1834_p12), %s1364_s28, 2048  }
 0x42f   : > { %2074 = vsyncadd (!%p1834_p12), %s1364_s28, 4294965248  ;;  %s23_s5 = sadd.s32 1, %s2105_s5   ;;  %s2633_s29 = sld [smem:[#allocation15_spill]] }
 0x430   : > { %p20_p0 = scmp.ge.s32.totalorder %s23_s5, 11   ;;  %s2634_s12 = sld [smem:[#allocation16_spill]] }
 0x431   : > { %s2635_s0 = sld [smem:[#allocation17_spill]]  ;;  %s2636_s25 = smov %s2081_s26 }
 0x432   : > { %s2637_s26 = smov %s2085_s27  ;;  %s2638_s27 = smov %s2231_s18 }
 0x433   : > { %s2639_s28 = smov %s2097_s30  ;;  %22 = sbr.rel (!%p20_p0) target bundleno = 19 (0x13), region = 90 }
 0x436   : > { %s2640_s30 = smov %s2634_s12 }
 0x43a   :  { %1369 = vsyncpa [#allocation6], 1 }
 0x43b   :  { %1371 = vsyncpa [#allocation6 + $0x1], 1 }
 0x43c   :  { %1372 = vsyncpa [#allocation9], 1 }
 0x43d   :  { %1373 = vsyncpa [#allocation7], 1 }
 0x43e   :  { %1375 = vsyncpa [#allocation7 + $0x1], 1 }

// kernel: tpu_custom_call.1
= control target key start
LH: loop header
LB: loop body
LE: loop exit
PB: predicated region body
PF: predicated region fallthrough
CT: control target
= control target key end

     0   :  { %s2595_s0 = inlined_call_operand.hbm [shape: f32[36], index: 0, kind: input, shape index: {}]   ;;  %s2596_s1 = inlined_call_operand.hbm [shape: bf16[4,128,128], index: 1, kind: input, shape index: {}]   ;;  %s2597_s2 = inlined_call_operand.hbm [shape: bf16[3,128,128], index: 2, kind: input, shape index: {}]   ;;  %s2598_s3 = inlined_call_operand.vmem [shape: f32[3,1,128], index: 3, kind: input, shape index: {}]   ;;  %s2599_s4 = inlined_call_operand.hbm [shape: f32[3,3,128,128], index: 4, kind: output, shape index: {}]  }
   0x1   :  { %s1935_s17 = scalar_lea.hbm %s2595_s0, 16 }
   0x2   :  { %p1936_p0 = scmp.ne.s32.totalorder %s2595_s0, %s1935_s17  ;;  %p1939_p1 = scmp.lt.u32.totalorder %s1935_s17, %s2595_s0 }
   0x4   :  { %p1941_p2 = pnand %p1939_p1, %p1936_p0 }
   0x6   :  { %1944 = shalt.err (!%p1941_p2)  }
   0x7   :  { %s2107_s22 = smov [#allocation4]  }
   0x8   :  { %10 = dma.hbm_to_smem %s2595_s0, 16, %s2107_s22, [#allocation3] }
   0x9   :  { %2061 = dma.done.wait [#allocation3], 16 }
   0xa   :  { %2062 = vsyncadd [#allocation3], 4294967280 }
   0xb   :  { %12 = sfence }
   0xc   :  { %13 = vsyncpa [#allocation6], 0 }
   0xd   :  { %14 = vsyncpa [#allocation9], 0 }
   0xe   :  { %15 = vsyncpa [#allocation7], 0 }
   0xf   :  { %17 = vsyncpa [#allocation7 + $0x1], 0  ;;  %s2152_s25 = smov 0   ;;  %s2154_s26 = smov 0  }
  0x10   :  { %s2156_s27 = smov 0   ;;  %s2158_s28 = smov 0  }
  0x11   :  { %s2160_s29 = smov 0   ;;  %s2162_s30 = smov 0  }
  0x12   :  { %s2164_s0 = smov 0   ;;  %s2166_s5 = smov 0  }
  0x13 LB: > { %2607 = sst [smem:[#allocation15_spill]] %s2101_s0  ;;  %s1437_s6 = sadd.s32 4294967295, %s2105_s5   ;;  %s2105_s5 = sphi %s2166_s5, %s23_s5   ;;  %s2101_s0 = sphi %s2164_s0, %s2635_s0   ;;  %s2097_s30 = sphi %s2162_s30, %s2640_s30   ;;  %s2093_s29 = sphi %s2160_s29, %s2633_s29   ;;  %s2089_s28 = sphi %s2158_s28, %s2639_s28   ;;  %s2085_s27 = sphi %s2156_s27, %s2638_s27   ;;  %s2081_s26 = sphi %s2154_s26, %s2637_s26   ;;  %s2077_s25 = sphi %s2152_s25, %s2636_s25  }
  0x14   : > { %s1438_s7 = sadd.s32 4294967294, %s2105_s5   ;;  %s32_s8 = sadd.s32 1, %s2097_s30 }
  0x15   : > { %s35_s9 = sadd.s32 1, %s2101_s0  ;;  %p33_p3 = scmp.ge.s32.totalorder %s32_s8, 3 }
  0x16   : > { %s107_s10 = sadd.s32 1, %s2085_s27  ;;  %p117_p4 = scmp.ne.s32.totalorder %s2085_s27, %s2081_s26 }
  0x17   : > { %p118_p5 = scmp.eq.s32.totalorder %s1437_s6, 8  ;;  %s2642_s8 = smov (%p33_p3, %s32_s8), 0 }
  0x18   : > { %2608 = sst [smem:[#allocation16_spill]] %s2642_s8  ;;  %s2644_s9 = smov (!%p33_p3, %s35_s9), %s2101_s0 }
  0x19   : > { %s103_s11 = ssub.s32 %s2097_s30, %s2642_s8  ;;  %p2204_p6 = por %p118_p5, %p117_p4 }
  0x1a   : > { %p37_p7 = scmp.ge.s32.totalorder %s2644_s9, 3  ;;  %p123_p8 = scmp.ne.s32.totalorder %s2081_s26, %s2077_s25 }
  0x1b   : > { %s2609_s12 = scalar_select %p2204_p6, 1, 0 }
  0x1c   : > { %p124_p9 = scmp.eq.s32.totalorder %s1438_s7, 8  ;;  %p1439_p10 = scmp.ge.s32.totalorder %s2105_s5, 1 }
  0x1d   : > { %s2646_s9 = smov (%p37_p7, %s2644_s9), 0  ;;  %p131_p12 = scmp.lt.s32.totalorder %s2105_s5, 10 }
  0x1e   : > { %2610 = sst [smem:[#allocation17_spill]] %s2646_s9  ;;  %p2213_p11 = por %p124_p9, %p123_p8 }
  0x1f   : > { %s102_s14 = ssub.s32 %s2101_s0, %s2646_s9  ;;  %p2220_p13 = pnand %p1439_p10, %p131_p12 }
  0x20   : > { %s2611_s13 = scalar_select %p2213_p11, 1, 0 }
  0x21   : > { %s104_s15 = sor.u32 %s103_s11, %s102_s14  ;;  %p2224_p1 = scmp.eq.s32.totalorder %s1437_s6, 0 }
  0x22   : > { %s2612_s16 = scalar_select %p2220_p13, 1, 0 }
  0x23   : > { %p105_p0 = scmp.eq.s32.totalorder %s104_s15, 0  ;;  %p1826_p2 = pneg %p2220_p13 }
  0x24   : > { %s2613_s17 = scalar_select %p2224_p1, 1, 0 }
  0x25   : > { %s2231_s18 = scalar_select %p105_p0, %s2085_s27, %s107_s10  }
  0x26   : > { %s2108_s19 = smov [#allocation5]   ;;  %p2235_p3 = pnand %p2224_p1, %p1826_p2 }
  0x27   : > { %s143_s20 = sshll.u32 %s2108_s19, 4  ;;  %s1945_s24 = scalar_lea.hbm %s2596_s1, 4096  ;;  %s144_s20 = int_to_ptr.vmem [resolvable:$true] %s143_s20 }
  0x28   : > { %p1946_p4 = scmp.ne.s32.totalorder %s2596_s1, %s1945_s24  ;;  %p1947_p5 = pneg %p2235_p3 }
  0x29   : > { %p1952_p9 = scmp.lt.u32.totalorder %s1945_s24, %s2596_s1 }
  0x2a   : > { %p1948_p7 = pnand %p1947_p5, %p1946_p4 }
  0x2c   : > { %p1949_p8 = pneg %p1948_p7 }
  0x2e   : > { %p1954_p10 = pnand %p1952_p9, %p1949_p8 }
  0x30   : > { %1957 = shalt.err (!%p1954_p10)
}
  0x31   : > { %s1958_s14 = scalar_lea.vmem %s144_s20, 4096  ;;  %p1966_p11 = scmp.lt.s32.totalorder %s144_s20, %s144_s20 }
  0x32   : > { %p1959_p12 = scmp.ne.s32.totalorder %s144_s20, %s1958_s14  ;;  %p1967_p6 = scmp.lt.s32.totalorder %s1958_s14, %s1958_s14 }
  0x34   : > { %p1961_p0 = pnand %p1959_p12, %p1947_p5  ;;  %p1968_p1 = por %p1967_p6, %p1966_p11 }
  0x36   : > { %p1962_p2 = pneg %p1961_p0 }
  0x38   : > { %p1969_p13 = pnand %p1968_p1, %p1962_p2 }
  0x3a   : > { %1972 = shalt.err (!%p1969_p13)
}
  0x3b   : > { %s2109_s15 = smov 64   ;;  %s2110_s19 = smov 4  }
  0x3c   : > { %1829 = dma.hbm_to_vmem [thread:$0]  (!%p2235_p3), %s2596_s1, 4096, %s144_s20, [#allocation6], %s2109_s15, %s2109_s15, %s2110_s19  }
  0x3d   : > { %s2111_s24 = smov [#allocation8]   ;;  %s1973_s11 = scalar_lea.hbm %s2597_s2, 3072 }
  0x3e   : > { %s156_s6 = sshll.u32 %s2111_s24, 4  ;;  %p1974_p6 = scmp.ne.s32.totalorder %s2597_s2, %s1973_s11  ;;  %s157_s6 = int_to_ptr.vmem [resolvable:$true] %s156_s6 }
  0x3f   : > { %p1980_p1 = scmp.lt.u32.totalorder %s1973_s11, %s2597_s2 }
  0x40   : > { %p1976_p11 = pnand %p1974_p6, %p1947_p5 }
  0x42   : > { %p1977_p13 = pneg %p1976_p11 }
  0x44   : > { %p1982_p4 = pnand %p1980_p1, %p1977_p13 }
  0x46   : > { %1985 = shalt.err (!%p1982_p4)
}
  0x47   : > { %s1986_s20 = scalar_lea.vmem %s157_s6, 3072  ;;  %p1994_p10 = scmp.lt.s32.totalorder %s157_s6, %s157_s6 }
  0x48   : > { %p1987_p7 = scmp.ne.s32.totalorder %s157_s6, %s1986_s20  ;;  %p1995_p12 = scmp.lt.s32.totalorder %s1986_s20, %s1986_s20 }
  0x4a   : > { %p1989_p8 = pnand %p1987_p7, %p1947_p5  ;;  %p1996_p0 = por %p1995_p12, %p1994_p10 }
  0x4c   : > { %p1990_p9 = pneg %p1989_p8 }
  0x4e   : > { %p1997_p2 = pnand %p1996_p0, %p1990_p9 }
  0x50   : > { %2000 = shalt.err (!%p1997_p2)
}
  0x51   : > { %1832 = dma.hbm_to_vmem [thread:$0]  (!%p2235_p3), %s2597_s2, 3072, %s157_s6, [#allocation9], %s2109_s15, %s2109_s15, %s2110_s19  }
  0x52   : > { %p2615_p6 = scmp.ne.s32.totalorder %s2612_s16, 0 }
  0x54   : > { %175 = sbr.rel (%p2615_p6) target bundleno = 1065 (0x429), region = 32 }
  0x5b   : > { %p2616_p11 = scmp.ne.s32.totalorder %s2613_s17, 0 }
  0x5d   : > { %2064 = dma.done.wait (%p2616_p11), [#allocation6], 4096  }
  0x5e   : > { %2066 = vsyncadd (%p2616_p11), [#allocation6], 4294963200 }
  0x5f   : > { %2068 = dma.done.wait (%p2616_p11), [#allocation9], 3072  }
  0x60   : > { %2070 = vsyncadd (%p2616_p11), [#allocation9], 4294964224  ;;  %s195_s0 = sand.u32 1, %s2081_s26   ;;  %s199_s8 = smul.u32 3, %s2089_s28  ;;  %v202_v0 = vlaneseq  ;;  %v1468_v18 = vld [vmem:[#allocation5] sm:$0xff]   ;;  %v1595_v19 = vld [vmem:[#allocation5 + $0x8] sm:$0xff]  }
  0x61   : > { %s2295_s16 = sshll.u32 %s195_s0, 7  ;;  %v1596_v20 = vld [vmem:[#allocation5 + $0x10] sm:$0xff]   ;;  %v1469_v21 = vunpack.c.l.bf16 %v1468_v18  ;;  %v1470_v22 = vunpack.c.h.bf16 %v1468_v18  ;;  %v1473_v23 = vunpack.c.l.bf16 %v1595_v19  ;;  %v1474_v24 = vunpack.c.h.bf16 %v1595_v19  ;;  %v1597_v25 = vld [vmem:[#allocation5 + $0x18] sm:$0xff]   ;;  %v1598_v26 = vld [vmem:[#allocation5 + $0x20] sm:$0xff]   ;;  %p1447_p3 = scmp.ne.s32.totalorder %s2089_s28, 0 }
  0x62   : > { %s200_s21 = sadd.s32 %s2093_s29, %s199_s8  ;;  %v2298_v1 = vshrl.u32 %v202_v0, 7  ;;  %v2300_v2 = vand.u32 127, %v202_v0  ;;  %v1599_v27 = vld [vmem:[#allocation5 + $0x28] sm:$0xff]   ;;  %v1477_v28 = vunpack.c.l.bf16 %v1596_v20  ;;  %v1478_v29 = vunpack.c.h.bf16 %v1596_v20  ;;  %v1600_v32 = vld [vmem:[#allocation5 + $0x30] sm:$0xff]   ;;  %v1601_v33 = vld [vmem:[#allocation5 + $0x38] sm:$0xff]   ;;  %s2406_s11 = scalar_lea.vmem [#allocation10], %s2295_s16 }
  0x63   : > { %s2302_s15 = sshll.u32 %s200_s21, 2  ;;  %v1481_v30 = vunpack.c.l.bf16 %v1597_v25  ;;  %v1482_v31 = vunpack.c.h.bf16 %v1597_v25  ;;  %v1500_v34 = vld [vmem:[#allocation5 + $0x40] sm:$0xff]   ;;  %v1485_v35 = vunpack.c.l.bf16 %v1598_v26  ;;  %v1486_v36 = vunpack.c.h.bf16 %v1598_v26  ;;  %v1602_v39 = vld [vmem:[#allocation5 + $0x48] sm:$0xff]   ;;  %v1603_v56 = vld [vmem:[#allocation5 + $0x50] sm:$0xff]  }
  0x64   : > { %v2305_v3 = vadd.s32 8, %v2298_v1  ;;  %v2308_v4 = vadd.s32 16, %v2298_v1  ;;  %v2311_v5 = vadd.s32 24, %v2298_v1  ;;  %v2314_v6 = vadd.s32 32, %v2298_v1  ;;  %s2317_s17 = sld [smem:[#allocation4 + %s2302_s15]]  ;;  %s271_s19 = sadd.s32 1, %s2302_s15 }
  0x65   : > { %v2320_v7 = vadd.s32 40, %v2298_v1  ;;  %v2323_v8 = vadd.s32 48, %v2298_v1  ;;  %v2326_v9 = vadd.s32 56, %v2298_v1  ;;  %v2329_v10 = vadd.s32 64, %v2298_v1  ;;  %s2354_s23 = sld [smem:[#allocation4 + %s271_s19]]  ;;  %v1604_v57 = vld [vmem:[#allocation5 + $0x58] sm:$0xff]  }
  0x66   : > { %v2332_v11 = vadd.s32 72, %v2298_v1  ;;  %v2335_v12 = vadd.s32 80, %v2298_v1  ;;  %v2338_v13 = vadd.s32 88, %v2298_v1  ;;  %v2341_v14 = vadd.s32 96, %v2298_v1  ;;  %v1605_v62 = vld [vmem:[#allocation5 + $0x60] sm:$0xff]   ;;  %v1606_v63 = vld [vmem:[#allocation5 + $0x68] sm:$0xff]  }
  0x67   : > { %v2344_v15 = vadd.s32 104, %v2298_v1  ;;  %v2347_v16 = vadd.s32 112, %v2298_v1  ;;  %v2350_v17 = vadd.s32 120, %v2298_v1  ;;  %v1489_v37 = vunpack.c.l.bf16 %v1599_v27  ;;  %s339_s24 = sadd.s32 2, %s2302_s15  ;;  %s407_s7 = sadd.s32 3, %s2302_s15 }
  0x68   : > { %2617 = vst [vmem:[#allocation18_spill] sm:$0xff] %v2332_v11  ;;  %2618 = vst [vmem:[#allocation19_spill] sm:$0xff] %v2335_v12  ;;  %v1490_v38 = vunpack.c.h.bf16 %v1599_v27  ;;  %v1493_v40 = vunpack.c.l.bf16 %v1600_v32  ;;  %v1494_v41 = vunpack.c.h.bf16 %v1600_v32  ;;  %v1497_v42 = vunpack.c.l.bf16 %v1601_v33  ;;  %v2356_v27 = vld [vmem:[#allocation5 + $0x80] sm:$0xff]   ;;  %s2362_s6 = sld [smem:[#allocation4 + %s339_s24]] }
  0x69   : > { %2619 = vst [vmem:[#allocation20_spill] sm:$0xff] %v2338_v13  ;;  %2620 = vst [vmem:[#allocation21_spill] sm:$0xff] %v2341_v14  ;;  %v1498_v43 = vunpack.c.h.bf16 %v1601_v33  ;;  %v1501_v45 = vunpack.c.l.bf16 %v1500_v34  ;;  %v1502_v46 = vunpack.c.h.bf16 %v1500_v34  ;;  %v1505_v47 = vunpack.c.l.bf16 %v1602_v39  ;;  %s2369_s10 = sld [smem:[#allocation4 + %s407_s7]] }
  0x6a   : > { %2621 = vst [vmem:[#allocation22_spill] sm:$0xff] %v2344_v15  ;;  %2622 = vst [vmem:[#allocation23_spill] sm:$0xff] %v2347_v16  ;;  %v254_v44 = vstv %s2317_s17  ;;  %v1510_v25 = vunpack.c.h.bf16 %v1603_v56  ;;  %v1513_v26 = vunpack.c.l.bf16 %v1604_v57  ;;  %v1522_v32 = vunpack.c.h.bf16 %v1606_v63 }
  0x6b   : > { %2623 = vst [vmem:[#allocation24_spill] sm:$0xff] %v2350_v17  ;;  %v255_v48 = vmul.f32 %v1469_v21, %v254_v44  ;;  %v256_v49 = vmul.f32 %v1470_v22, %v254_v44  ;;  %v257_v50 = vmul.f32 %v1473_v23, %v254_v44  ;;  %v258_v51 = vmul.f32 %v1474_v24, %v254_v44  ;;  %v1607_v21 = vld [vmem:[#allocation5 + $0x70] sm:$0xff]   ;;  %v1608_v22 = vld [vmem:[#allocation5 + $0x78] sm:$0xff]  }
  0x6c   : > { %v259_v52 = vmul.f32 %v1477_v28, %v254_v44  ;;  %v260_v53 = vmul.f32 %v1478_v29, %v254_v44  ;;  %v261_v54 = vmul.f32 %v1481_v30, %v254_v44  ;;  %v262_v55 = vmul.f32 %v1482_v31, %v254_v44 }
  0x6d   : > { %v263_v58 = vmul.f32 %v1485_v35, %v254_v44  ;;  %v264_v59 = vmul.f32 %v1486_v36, %v254_v44  ;;  %v265_v60 = vmul.f32 %v1489_v37, %v254_v44  ;;  %v266_v61 = vmul.f32 %v1490_v38, %v254_v44 }
  0x6e   : > { %v267_v0 = vmul.f32 %v1493_v40, %v254_v44  ;;  %v268_v18 = vmul.f32 %v1494_v41, %v254_v44  ;;  %v269_v19 = vmul.f32 %v1497_v42, %v254_v44  ;;  %v270_v20 = vmul.f32 %v1498_v43, %v254_v44 }
  0x6f   : > { %v1506_v23 = vunpack.c.h.bf16 %v1602_v39  ;;  %v1509_v24 = vunpack.c.l.bf16 %v1603_v56  ;;  %v1514_v28 = vunpack.c.h.bf16 %v1604_v57  ;;  %v1517_v29 = vunpack.c.l.bf16 %v1605_v62 }
  0x70   : > { %v1518_v30 = vunpack.c.h.bf16 %v1605_v62  ;;  %v1521_v31 = vunpack.c.l.bf16 %v1606_v63  ;;  %v1525_v33 = vunpack.c.l.bf16 %v1607_v21  ;;  %v1526_v34 = vunpack.c.h.bf16 %v1607_v21 }
  0x71   : > { %v1529_v35 = vunpack.c.l.bf16 %v1608_v22  ;;  %v1530_v36 = vunpack.c.h.bf16 %v1608_v22  ;;  %v306_v37 = vstv %s2354_s23  ;;  %v1533_v38 = vunpack.c.l.bf16 %v2356_v27 }
  0x72   : > { %v1534_v39 = vunpack.c.h.bf16 %v2356_v27  ;;  %v307_v40 = vmul.f32 %v1501_v45, %v306_v37  ;;  %v308_v41 = vmul.f32 %v1502_v46, %v306_v37  ;;  %v309_v42 = vmul.f32 %v1505_v47, %v306_v37 }
  0x73   : > { %v310_v43 = vmul.f32 %v1506_v23, %v306_v37  ;;  %v311_v44 = vmul.f32 %v1509_v24, %v306_v37  ;;  %v312_v56 = vmul.f32 %v1510_v25, %v306_v37  ;;  %v313_v57 = vmul.f32 %v1513_v26, %v306_v37  ;;  %v1609_v26 = vld [vmem:[#allocation5 + $0x88] sm:$0xff]  }
  0x74   : > { %v314_v62 = vmul.f32 %v1514_v28, %v306_v37  ;;  %v315_v17 = vmul.f32 %v1517_v29, %v306_v37  ;;  %v316_v63 = vmul.f32 %v1518_v30, %v306_v37  ;;  %v317_v16 = vmul.f32 %v1521_v31, %v306_v37  ;;  %v1610_v28 = vld [vmem:[#allocation5 + $0x90] sm:$0xff]  }
  0x75   : > { %v318_v21 = vmul.f32 %v1522_v32, %v306_v37  ;;  %v319_v15 = vmul.f32 %v1525_v33, %v306_v37  ;;  %v320_v22 = vmul.f32 %v1526_v34, %v306_v37  ;;  %v321_v14 = vmul.f32 %v1529_v35, %v306_v37  ;;  %v1611_v33 = vld [vmem:[#allocation5 + $0x98] sm:$0xff]   ;;  %v1612_v34 = vld [vmem:[#allocation5 + $0xa0] sm:$0xff]  }
  0x76   : > { %v322_v13 = vmul.f32 %v1530_v36, %v306_v37  ;;  %v323_v27 = vadd.f32 %v307_v40, %v255_v48  ;;  %v324_v45 = vadd.f32 %v308_v41, %v256_v49  ;;  %v325_v46 = vadd.f32 %v309_v42, %v257_v50  ;;  %v1613_v48 = vld [vmem:[#allocation5 + $0xa8] sm:$0xff]   ;;  %v1614_v49 = vld [vmem:[#allocation5 + $0xb0] sm:$0xff]  }
  0x77   : > { %v326_v47 = vadd.f32 %v310_v43, %v258_v51  ;;  %v327_v23 = vadd.f32 %v311_v44, %v259_v52  ;;  %v328_v12 = vadd.f32 %v312_v56, %v260_v53  ;;  %v329_v24 = vadd.f32 %v313_v57, %v261_v54  ;;  %v1615_v54 = vld [vmem:[#allocation5 + $0xb8] sm:$0xff]  }
  0x78   : > { %v330_v25 = vadd.f32 %v314_v62, %v262_v55  ;;  %v331_v29 = vadd.f32 %v315_v17, %v263_v58  ;;  %v332_v30 = vadd.f32 %v316_v63, %v264_v59  ;;  %v333_v31 = vadd.f32 %v317_v16, %v265_v60  ;;  %v2364_v55 = vld [vmem:[#allocation5 + $0xc0] sm:$0xff]  }
  0x79   : > { %v334_v32 = vadd.f32 %v318_v21, %v266_v61  ;;  %v335_v35 = vadd.f32 %v319_v15, %v267_v0  ;;  %v336_v36 = vadd.f32 %v320_v22, %v268_v18  ;;  %v337_v37 = vadd.f32 %v321_v14, %v269_v19 }
  0x7a   : > { %v338_v11 = vadd.f32 %v322_v13, %v270_v20  ;;  %v1537_v50 = vunpack.c.l.bf16 %v1609_v26  ;;  %v1538_v51 = vunpack.c.h.bf16 %v1609_v26  ;;  %v1541_v52 = vunpack.c.l.bf16 %v1610_v28 }
  0x7b   : > { %v1542_v53 = vunpack.c.h.bf16 %v1610_v28  ;;  %v1545_v17 = vunpack.c.l.bf16 %v1611_v33  ;;  %v1546_v16 = vunpack.c.h.bf16 %v1611_v33  ;;  %v1549_v58 = vunpack.c.l.bf16 %v1612_v34 }
  0x7c   : > { %v1550_v59 = vunpack.c.h.bf16 %v1612_v34  ;;  %v1553_v60 = vunpack.c.l.bf16 %v1613_v48  ;;  %v1554_v15 = vunpack.c.h.bf16 %v1613_v48  ;;  %v1557_v61 = vunpack.c.l.bf16 %v1614_v49 }
  0x7d   : > { %v1558_v14 = vunpack.c.h.bf16 %v1614_v49  ;;  %v1561_v13 = vunpack.c.l.bf16 %v1615_v54  ;;  %v1562_v0 = vunpack.c.h.bf16 %v1615_v54  ;;  %v374_v18 = vstv %s2362_s6  ;;  %v1616_v54 = vld [vmem:[#allocation5 + $0xc8] sm:$0xff]  }
  0x7e   : > { %v1565_v19 = vunpack.c.l.bf16 %v2364_v55  ;;  %v375_v20 = vmul.f32 %v1533_v38, %v374_v18  ;;  %v376_v40 = vmul.f32 %v1534_v39, %v374_v18  ;;  %v377_v41 = vmul.f32 %v1537_v50, %v374_v18 }
  0x7f   : > { %v378_v42 = vmul.f32 %v1538_v51, %v374_v18  ;;  %v379_v43 = vmul.f32 %v1541_v52, %v374_v18  ;;  %v380_v44 = vmul.f32 %v1542_v53, %v374_v18  ;;  %v381_v56 = vmul.f32 %v1545_v17, %v374_v18  ;;  %v1617_v17 = vld [vmem:[#allocation5 + $0xd0] sm:$0xff]  }
  0x80   : > { %v382_v57 = vmul.f32 %v1546_v16, %v374_v18  ;;  %v383_v62 = vmul.f32 %v1549_v58, %v374_v18  ;;  %v384_v63 = vmul.f32 %v1550_v59, %v374_v18  ;;  %v385_v21 = vmul.f32 %v1553_v60, %v374_v18 }
  0x81   : > { %v386_v22 = vmul.f32 %v1554_v15, %v374_v18  ;;  %v387_v26 = vmul.f32 %v1557_v61, %v374_v18  ;;  %v388_v28 = vmul.f32 %v1558_v14, %v374_v18  ;;  %v389_v33 = vmul.f32 %v1561_v13, %v374_v18  ;;  %v1618_v15 = vld [vmem:[#allocation5 + $0xd8] sm:$0xff]   ;;  %v1619_v61 = vld [vmem:[#allocation5 + $0xe0] sm:$0xff]  }
  0x82   : > { %v390_v34 = vmul.f32 %v1562_v0, %v374_v18  ;;  %v391_v48 = vadd.f32 %v375_v20, %v323_v27  ;;  %v392_v38 = vadd.f32 %v376_v40, %v324_v45  ;;  %v393_v39 = vadd.f32 %v377_v41, %v325_v46  ;;  %v1620_v27 = vld [vmem:[#allocation5 + $0xe8] sm:$0xff]   ;;  %v1621_v45 = vld [vmem:[#allocation5 + $0xf0] sm:$0xff]  }
  0x83   : > { %v394_v49 = vadd.f32 %v378_v42, %v326_v47  ;;  %v395_v50 = vadd.f32 %v379_v43, %v327_v23  ;;  %v396_v51 = vadd.f32 %v380_v44, %v328_v12  ;;  %v397_v52 = vadd.f32 %v381_v56, %v329_v24  ;;  %v1622_v24 = vld [vmem:[#allocation5 + $0xf8] sm:$0xff]  }
  0x84   : > { %v398_v53 = vadd.f32 %v382_v57, %v330_v25  ;;  %v399_v16 = vadd.f32 %v383_v62, %v331_v29  ;;  %v400_v58 = vadd.f32 %v384_v63, %v332_v30  ;;  %v401_v59 = vadd.f32 %v385_v21, %v333_v31 }
  0x85   : > { %v402_v60 = vadd.f32 %v386_v22, %v334_v32  ;;  %v403_v14 = vadd.f32 %v387_v26, %v335_v35  ;;  %v404_v13 = vadd.f32 %v388_v28, %v336_v36  ;;  %v405_v0 = vadd.f32 %v389_v33, %v337_v37 }
  0x86   : > { %v406_v18 = vadd.f32 %v390_v34, %v338_v11  ;;  %v1566_v46 = vunpack.c.h.bf16 %v2364_v55  ;;  %v1569_v12 = vunpack.c.l.bf16 %v1616_v54  ;;  %v1570_v47 = vunpack.c.h.bf16 %v1616_v54 }
  0x87   : > { %v1573_v23 = vunpack.c.l.bf16 %v1617_v17  ;;  %v1574_v25 = vunpack.c.h.bf16 %v1617_v17  ;;  %v1577_v29 = vunpack.c.l.bf16 %v1618_v15  ;;  %v1578_v30 = vunpack.c.h.bf16 %v1618_v15 }
  0x88   : > { %v1581_v31 = vunpack.c.l.bf16 %v1619_v61  ;;  %v1582_v32 = vunpack.c.h.bf16 %v1619_v61  ;;  %v1585_v20 = vunpack.c.l.bf16 %v1620_v27  ;;  %v1586_v40 = vunpack.c.h.bf16 %v1620_v27 }
  0x89   : > { %v1589_v35 = vunpack.c.l.bf16 %v1621_v45  ;;  %v1590_v36 = vunpack.c.h.bf16 %v1621_v45  ;;  %v1593_v37 = vunpack.c.l.bf16 %v1622_v24  ;;  %v1594_v11 = vunpack.c.h.bf16 %v1622_v24 }
  0x8a   : > { %v442_v41 = vstv %s2369_s10  ;;  %vm527_vm0 = vcmp.lt.s32.totalorder (!%p1447_p3), %v2300_v2, 16 }
  0x8b   : > { %v443_v42 = vmul.f32 %v1565_v19, %v442_v41  ;;  %v444_v43 = vmul.f32 %v1566_v46, %v442_v41  ;;  %v445_v55 = vmul.f32 %v1569_v12, %v442_v41  ;;  %v446_v44 = vmul.f32 %v1570_v47, %v442_v41 }
  0x8c   : > { %v447_v56 = vmul.f32 %v1573_v23, %v442_v41  ;;  %v448_v57 = vmul.f32 %v1574_v25, %v442_v41  ;;  %v449_v62 = vmul.f32 %v1577_v29, %v442_v41  ;;  %v450_v63 = vmul.f32 %v1578_v30, %v442_v41  ;;  %478 = sbr.rel (%p1447_p3) target bundleno = 199 (0xc7), region = 44 }
  0x8d   : > { %v451_v21 = vmul.f32 %v1581_v31, %v442_v41  ;;  %v452_v22 = vmul.f32 %v1582_v32, %v442_v41  ;;  %v453_v26 = vmul.f32 %v1585_v20, %v442_v41  ;;  %v454_v28 = vmul.f32 %v1586_v40, %v442_v41 }
  0x8e   : > { %v455_v33 = vmul.f32 %v1589_v35, %v442_v41  ;;  %v456_v34 = vmul.f32 %v1590_v36, %v442_v41  ;;  %v457_v54 = vmul.f32 %v1593_v37, %v442_v41  ;;  %v458_v17 = vmul.f32 %v1594_v11, %v442_v41 }
  0x8f   : > { %v2373_v15 = vadd.f32 %v443_v42, %v391_v48  ;;  %v2375_v61 = vadd.f32 %v444_v43, %v392_v38  ;;  %v2377_v19 = vadd.f32 %v445_v55, %v393_v39  ;;  %v2379_v27 = vadd.f32 %v446_v44, %v394_v49 }
  0x90   : > { %v2381_v45 = vadd.f32 %v447_v56, %v395_v50  ;;  %v2383_v46 = vadd.f32 %v448_v57, %v396_v51  ;;  %v2385_v12 = vadd.f32 %v449_v62, %v397_v52  ;;  %v2387_v47 = vadd.f32 %v450_v63, %v398_v53 }
  0x91   : > { %v2389_v23 = vadd.f32 %v451_v21, %v399_v16  ;;  %v2391_v24 = vadd.f32 %v452_v22, %v400_v58  ;;  %v2393_v48 = vadd.f32 %v453_v26, %v401_v59  ;;  %v2395_v38 = vadd.f32 %v454_v28, %v402_v60 }
  0x92   : > { %v2397_v39 = vadd.f32 %v455_v33, %v403_v14  ;;  %v2399_v49 = vadd.f32 %v456_v34, %v404_v13  ;;  %v2401_v50 = vadd.f32 %v457_v54, %v405_v0  ;;  %v2403_v51 = vadd.f32 %v458_v17, %v406_v18 }
  0x93   : > { %v479_v52 = vmul.f32 1.442695, %v2373_v15  ;;  %v481_v53 = vmul.f32 1.442695, %v2375_v61 }
  0x95   : > { %1913 = vpow2.f32 %v479_v52 }
  0x96   : > { %1915 = vpow2.f32 %v481_v53 }
  0x9f   : > { %v1914_v16 = vpop.eup %1913 }
  0xa0   : > { %v1916_v58 = vpop.eup %1915  ;;  %v544_v59 = vsel %vm527_vm0, %v1914_v16, 0.0 }
  0xa1   : > { %v545_v60 = vsel %vm527_vm0, %v1916_v58, 0.0 }
  0xa2   : > { %v560_v14 = vadd.f32 %v545_v60, %v544_v59 }
  0xa4   : > { %v575_v13 = vrot.slane %v560_v14, 4 }
  0xa6   : > { %v576_v0 = vadd.f32 %v575_v13, %v560_v14 }
  0xa8   : > { %v577_v18 = vrot.slane %v576_v0, 2 }
  0xaa   : > { %v578_v25 = vadd.f32 %v577_v18, %v576_v0 }
  0xac   : > { %v579_v29 = vrot.slane %v578_v25, 1 }
  0xae   : > { %v580_v30 = vadd.f32 %v579_v29, %v578_v25 }
  0xb0   : > { %v581_v31 = vadd.f32 1e-06, %v580_v30 }
  0xb2   : > { %1917 = vrcp.f32 %v581_v31 }
  0xbc   : > { %v1918_v32 = vpop.eup %1917 }
  0xbd   : > { %v583_v20 = vmul.f32 %v1918_v32, %v544_v59  ;;  %v585_v40 = vmul.f32 0.0, %v1918_v32  ;;  %v584_v35 = vmul.f32 %v1918_v32, %v545_v60 }
  0xbf   : > { %599 = vst [vmem:[#allocation2] sm:$0xff] %v583_v20  ;;  %601 = vst [vmem:[#allocation2 + $0x10] sm:$0xff] %v585_v40 }
  0xc0   : > { %602 = vst [vmem:[#allocation2 + $0x18] sm:$0xff] %v585_v40  ;;  %603 = vst [vmem:[#allocation2 + $0x20] sm:$0xff] %v585_v40 }
  0xc1   : > { %604 = vst [vmem:[#allocation2 + $0x28] sm:$0xff] %v585_v40  ;;  %605 = vst [vmem:[#allocation2 + $0x30] sm:$0xff] %v585_v40 }
  0xc2   : > { %606 = vst [vmem:[#allocation2 + $0x38] sm:$0xff] %v585_v40  ;;  %607 = vst [vmem:[#allocation2 + $0x40] sm:$0xff] %v585_v40 }
  0xc3   : > { %608 = vst [vmem:[#allocation2 + $0x48] sm:$0xff] %v585_v40  ;;  %609 = vst [vmem:[#allocation2 + $0x50] sm:$0xff] %v585_v40 }
  0xc4   : > { %610 = vst [vmem:[#allocation2 + $0x58] sm:$0xff] %v585_v40  ;;  %611 = vst [vmem:[#allocation2 + $0x60] sm:$0xff] %v585_v40 }
  0xc5   : > { %612 = vst [vmem:[#allocation2 + $0x68] sm:$0xff] %v585_v40  ;;  %613 = vst [vmem:[#allocation2 + $0x70] sm:$0xff] %v585_v40 }
  0xc6   : > { %614 = vst [vmem:[#allocation2 + $0x78] sm:$0xff] %v585_v40  ;;  %600 = vst [vmem:[#allocation2 + $0x8] sm:$0xff] %v584_v35 }
  0xc7 PF: > { %p1448_p5 = scmp.ne.s32.totalorder %s2089_s28, 1 }
  0xc8   : > { %v643_v36 = vmul.f32 (!%p1448_p5), 1.442695, %v2373_v15  ;;  %v645_v37 = vmul.f32 (!%p1448_p5), 1.442695, %v2375_v61  ;;  %v619_v11 = vld [vmem:[#allocation2] sm:$0xff] (!%p1448_p5)  ;;  %vm691_vm1 = vcmp.lt.s32.totalorder (!%p1448_p5), %v2300_v2, 16 }
  0xc9   : > { %618 = sbr.rel (%p1448_p5) target bundleno = 502 (0x1f6), region = 48  ;;  %v627_v42 = vld [vmem:[#allocation2 + $0x40] sm:$0xff] (!%p1448_p5)  ;;  %v621_v14 = vld [vmem:[#allocation2 + $0x10] sm:$0xff] (!%p1448_p5)  ;;  %v622_v13 = vld [vmem:[#allocation2 + $0x18] sm:$0xff] (!%p1448_p5) }
  0xca   : > { %v628_v43 = vld [vmem:[#allocation2 + $0x48] sm:$0xff] (!%p1448_p5)  ;;  %1919 = vpow2.f32 (!%p1448_p5), %v643_v36  ;;  %v629_v0 = vld [vmem:[#allocation2 + $0x50] sm:$0xff] (!%p1448_p5)  ;;  %v623_v25 = vld [vmem:[#allocation2 + $0x20] sm:$0xff] (!%p1448_p5)  ;;  %v636_v32 = vpack.c.bf16 (!%p1448_p5), %v622_v13, %v621_v14 }
  0xcb   : > { %v639_v44 = vpack.c.bf16 (!%p1448_p5), %v628_v43, %v627_v42  ;;  %1921 = vpow2.f32 (!%p1448_p5), %v645_v37  ;;  %v630_v18 = vld [vmem:[#allocation2 + $0x58] sm:$0xff] (!%p1448_p5)  ;;  %v624_v29 = vld [vmem:[#allocation2 + $0x28] sm:$0xff] (!%p1448_p5)  ;;  %v631_v30 = vld [vmem:[#allocation2 + $0x60] sm:$0xff] (!%p1448_p5) }
  0xcc   : > { %v632_v31 = vld [vmem:[#allocation2 + $0x68] sm:$0xff] (!%p1448_p5)  ;;  %v640_v20 = vpack.c.bf16 (!%p1448_p5), %v630_v18, %v629_v0  ;;  %v637_v40 = vpack.c.bf16 (!%p1448_p5), %v624_v29, %v623_v25  ;;  %v625_v36 = vld [vmem:[#allocation2 + $0x30] sm:$0xff] (!%p1448_p5)  ;;  %v626_v37 = vld [vmem:[#allocation2 + $0x38] sm:$0xff] (!%p1448_p5) }
  0xcd   : > { %v620_v41 = vld [vmem:[#allocation2 + $0x8] sm:$0xff] (!%p1448_p5)  ;;  %1695 = vmatprep.mubr.bf16.mxu1 (!%p1448_p5), %v639_v44  ;;  %v641_v35 = vpack.c.bf16 (!%p1448_p5), %v632_v31, %v631_v30  ;;  %v638_v42 = vpack.c.bf16 (!%p1448_p5), %v626_v37, %v625_v36 }
  0xce   : > { %v635_v55 = vpack.c.bf16 (!%p1448_p5), %v620_v41, %v619_v11  ;;  %v633_v11 = vld [vmem:[#allocation2 + $0x70] sm:$0xff] (!%p1448_p5)  ;;  %v634_v41 = vld [vmem:[#allocation2 + $0x78] sm:$0xff] (!%p1448_p5) }
  0xcf   : > { %v642_v43 = vpack.c.bf16 (!%p1448_p5), %v634_v41, %v633_v11 }
  0xd0   : > { %1687 = vmatprep.mubr.bf16.mxu0 %v635_v55 }
  0xd4   : > { %v1920_v56 = vpop.eup %1919 }
  0xd5   : > { %v1922_v57 = vpop.eup %1921  ;;  %v708_v62 = vsel %vm691_vm1, %v1920_v56, 0.0 }
  0xd6   : > { %v709_v63 = vsel %vm691_vm1, %v1922_v57, 0.0 }
  0xd7   : > { %v724_v21 = vadd.f32 %v709_v63, %v708_v62 }
  0xd9   : > { %v739_v22 = vrot.slane %v724_v21, 4 }
  0xdb   : > { %v740_v26 = vadd.f32 %v739_v22, %v724_v21 }
  0xdd   : > { %v741_v28 = vrot.slane %v740_v26, 2 }
  0xdf   : > { %v742_v33 = vadd.f32 %v741_v28, %v740_v26 }
  0xe1   : > { %v743_v34 = vrot.slane %v742_v33, 1 }
  0xe3   : > { %v744_v54 = vadd.f32 %v743_v34, %v742_v33 }
  0xe5   : > { %v745_v17 = vadd.f32 1e-06, %v744_v54 }
  0xe7   : > { %1923 = vrcp.f32 %v745_v17 }
  0xf1   : > { %v1924_v52 = vpop.eup %1923 }
  0xf2   : > { %v747_v53 = vmul.f32 %v1924_v52, %v708_v62  ;;  %v748_v16 = vmul.f32 %v1924_v52, %v709_v63  ;;  %v749_v58 = vmul.f32 0.0, %v1924_v52 }
  0xf4   : > { %v763_v59 = vpack.c.bf16 %v748_v16, %v747_v53  ;;  %v764_v60 = vpack.c.bf16 %v749_v58, %v749_v58 }
  0xf6   : > { %1671 = vmatprep.subr.bf16.mxu0 %v763_v59  ;;  %1767 = vmatprep.subr.bf16.mxu1 %v763_v59 }
  0xf7   : > { %1672 = vmatpush3.bf16.msra.mxu0 %v763_v59  ;;  %1775 = vmatpush3.bf16.msra.mxu1 %v763_v59 }
  0xf8   : > { %1673 = vmatprep.subr.bf16.mxu0 %v764_v60  ;;  %1768 = vmatprep.subr.bf16.mxu1 %v764_v60 }
  0xfb   : > { %1674 = vmatpush3.bf16.msra.mxu0 %v764_v60  ;;  %1776 = vmatpush3.bf16.msra.mxu1 %v764_v60 }
  0xfc   : > { %1675 = vmatprep.subr.bf16.mxu0 %v764_v60  ;;  %1769 = vmatprep.subr.bf16.mxu1 %v764_v60 }
  0xff   : > { %1676 = vmatpush3.bf16.msra.mxu0 %v764_v60  ;;  %1777 = vmatpush3.bf16.msra.mxu1 %v764_v60 }
 0x100   : > { %1677 = vmatprep.subr.bf16.mxu0 %v764_v60  ;;  %1770 = vmatprep.subr.bf16.mxu1 %v764_v60 }
 0x103   : > { %1678 = vmatpush3.bf16.msra.mxu0 %v764_v60  ;;  %1778 = vmatpush3.bf16.msra.mxu1 %v764_v60 }
 0x104   : > { %1679 = vmatprep.subr.bf16.mxu0 %v764_v60  ;;  %1771 = vmatprep.subr.bf16.mxu1 %v764_v60 }
 0x107   : > { %1680 = vmatpush3.bf16.msra.mxu0 %v764_v60  ;;  %1779 = vmatpush3.bf16.msra.mxu1 %v764_v60 }
 0x108   : > { %1681 = vmatprep.subr.bf16.mxu0 %v764_v60  ;;  %1772 = vmatprep.subr.bf16.mxu1 %v764_v60 }
 0x10b   : > { %1682 = vmatpush3.bf16.msra.mxu0 %v764_v60  ;;  %1780 = vmatpush3.bf16.msra.mxu1 %v764_v60 }
 0x10c   : > { %1683 = vmatprep.subr.bf16.mxu0 %v764_v60  ;;  %1773 = vmatprep.subr.bf16.mxu1 %v764_v60 }
 0x10f   : > { %1684 = vmatpush3.bf16.msra.mxu0 %v764_v60  ;;  %1781 = vmatpush3.bf16.msra.mxu1 %v764_v60 }
 0x110   : > { %1685 = vmatprep.subr.bf16.mxu0 %v764_v60  ;;  %1774 = vmatprep.subr.bf16.mxu1 %v764_v60 }
 0x113   : > { %1686 = vmatpush3.bf16.msra.mxu0 %v764_v60  ;;  %1782 = vmatpush3.bf16.msra.mxu1 %v764_v60 }
 0x116   : > { %1688 = vmatmul.mubr.bf16.vlgmr.msra.gmra.mrb[0].mxu0 %v636_v32  ;;  %1696 = vmatmul.mubr.bf16.vlgmr.msra.gmra.mrb[0].mxu1 %v640_v20 }
 0x117   : > { %1691 = vmatprep.mubr.bf16.mxu0 %v637_v40  ;;  %1699 = vmatprep.mubr.bf16.mxu1 %v641_v35 }
 0x11e   : > { %1692 = vmatmul.mubr.bf16.gmra.mrb[4].mxu0 %v638_v42  ;;  %1700 = vmatmul.mubr.bf16.gmra.mrb[4].mxu1 %v642_v43 }
 0x1e9   : > { %v1689_v55 = vpop.f32.mrb[0].mxu0  ;;  %v1697_v44 = vpop.f32.mrb[0].mxu1 }
 0x1ea   : > { %870 = vst [vmem:[#allocation2 + $0x10] sm:$0xff] %v1689_v55  ;;  %878 = vst [vmem:[#allocation2 + $0x50] sm:$0xff] %v1697_v44  ;;  %v805_v56 = vpop.f32.mrb[1].mxu0  ;;  %v837_v57 = vpop.f32.mrb[1].mxu1 }
 0x1eb   : > { %868 = vst [vmem:[#allocation2] sm:$0xff] %v805_v56  ;;  %876 = vst [vmem:[#allocation2 + $0x40] sm:$0xff] %v837_v57  ;;  %v1690_v62 = vpop.f32.mrb[2].mxu0  ;;  %v1698_v63 = vpop.f32.mrb[2].mxu1 }
 0x1ec   : > { %871 = vst [vmem:[#allocation2 + $0x18] sm:$0xff] %v1690_v62  ;;  %879 = vst [vmem:[#allocation2 + $0x58] sm:$0xff] %v1698_v63  ;;  %v808_v21 = vpop.f32.mrb[3].mxu0  ;;  %v840_v22 = vpop.f32.mrb[3].mxu1 }
 0x1ed   : > { %869 = vst [vmem:[#allocation2 + $0x8] sm:$0xff] %v808_v21  ;;  %877 = vst [vmem:[#allocation2 + $0x48] sm:$0xff] %v840_v22 }
 0x1f1   : > { %v1693_v26 = vpop.f32.mrb[4].mxu0  ;;  %v1701_v28 = vpop.f32.mrb[4].mxu1 }
 0x1f2   : > { %874 = vst [vmem:[#allocation2 + $0x30] sm:$0xff] %v1693_v26  ;;  %882 = vst [vmem:[#allocation2 + $0x70] sm:$0xff] %v1701_v28  ;;  %v821_v33 = vpop.f32.mrb[5].mxu0  ;;  %v853_v34 = vpop.f32.mrb[5].mxu1 }
 0x1f3   : > { %872 = vst [vmem:[#allocation2 + $0x20] sm:$0xff] %v821_v33  ;;  %880 = vst [vmem:[#allocation2 + $0x60] sm:$0xff] %v853_v34  ;;  %v1694_v54 = vpop.f32.mrb[6].mxu0  ;;  %v1702_v17 = vpop.f32.mrb[6].mxu1 }
 0x1f4   : > { %875 = vst [vmem:[#allocation2 + $0x38] sm:$0xff] %v1694_v54  ;;  %883 = vst [vmem:[#allocation2 + $0x78] sm:$0xff] %v1702_v17  ;;  %v824_v52 = vpop.f32.mrb[7].mxu0  ;;  %v856_v53 = vpop.f32.mrb[7].mxu1 }
 0x1f5   : > { %873 = vst [vmem:[#allocation2 + $0x28] sm:$0xff] %v824_v52  ;;  %881 = vst [vmem:[#allocation2 + $0x68] sm:$0xff] %v856_v53 }
 0x1f6 PF: > { %p1449_p13 = scmp.lt.s32.totalorder %s2089_s28, 2 }
 0x1f7   : > { %v912_v16 = vpack.c.bf16 (!%p1449_p13), %v2375_v61, %v2373_v15  ;;  %v913_v58 = vpack.c.bf16 (!%p1449_p13), %v2379_v27, %v2377_v19  ;;  %v888_v59 = vld [vmem:[#allocation2] sm:$0xff] (!%p1449_p13)  ;;  %v889_v60 = vld [vmem:[#allocation2 + $0x8] sm:$0xff] (!%p1449_p13)  ;;  %v914_v25 = vpack.c.bf16 (!%p1449_p13), %v2383_v46, %v2381_v45  ;;  %v915_v15 = vpack.c.bf16 (!%p1449_p13), %v2387_v47, %v2385_v12  ;;  %v890_v46 = vld [vmem:[#allocation2 + $0x10] sm:$0xff] (!%p1449_p13) }
 0x1f8   : > { %887 = sbr.rel (%p1449_p13) target bundleno = 761 (0x2f9), region = 52  ;;  %v896_v14 = vld [vmem:[#allocation2 + $0x40] sm:$0xff] (!%p1449_p13)  ;;  %v897_v13 = vld [vmem:[#allocation2 + $0x48] sm:$0xff] (!%p1449_p13)  ;;  %v904_v0 = vpack.c.bf16 (!%p1449_p13), %v889_v60, %v888_v59  ;;  %v916_v61 = vpack.c.bf16 (!%p1449_p13), %v2391_v24, %v2389_v23  ;;  %v917_v19 = vpack.c.bf16 (!%p1449_p13), %v2395_v38, %v2393_v48  ;;  %v918_v27 = vpack.c.bf16 (!%p1449_p13), %v2399_v49, %v2397_v39  ;;  %v891_v12 = vld [vmem:[#allocation2 + $0x18] sm:$0xff] (!%p1449_p13) }
 0x1f9   : > { %1703 = vmatprep.subr.bf16.mxu0 (!%p1449_p13), %v912_v16  ;;  %1783 = vmatprep.subr.bf16.mxu1 (!%p1449_p13), %v912_v16  ;;  %v908_v18 = vpack.c.bf16 (!%p1449_p13), %v897_v13, %v896_v14  ;;  %v919_v45 = vpack.c.bf16 (!%p1449_p13), %v2403_v51, %v2401_v50  ;;  %v898_v47 = vld [vmem:[#allocation2 + $0x50] sm:$0xff] (!%p1449_p13)  ;;  %v899_v23 = vld [vmem:[#allocation2 + $0x58] sm:$0xff] (!%p1449_p13)  ;;  %v905_v39 = vpack.c.bf16 (!%p1449_p13), %v891_v12, %v890_v46 }
 0x1fa   : > { %1704 = vmatpush3.bf16.msra.mxu0 (!%p1449_p13), %v912_v16  ;;  %1791 = vmatpush3.bf16.msra.mxu1 (!%p1449_p13), %v912_v16  ;;  %v892_v24 = vld [vmem:[#allocation2 + $0x20] sm:$0xff] (!%p1449_p13)  ;;  %v909_v49 = vpack.c.bf16 (!%p1449_p13), %v899_v23, %v898_v47  ;;  %v894_v50 = vld [vmem:[#allocation2 + $0x30] sm:$0xff] (!%p1449_p13) }
 0x1fb   : > { %1705 = vmatprep.subr.bf16.mxu0 (!%p1449_p13), %v913_v58  ;;  %1784 = vmatprep.subr.bf16.mxu1 (!%p1449_p13), %v913_v58  ;;  %v900_v38 = vld [vmem:[#allocation2 + $0x60] sm:$0xff] (!%p1449_p13)  ;;  %v895_v51 = vld [vmem:[#allocation2 + $0x38] sm:$0xff] (!%p1449_p13)  ;;  %v902_v32 = vld [vmem:[#allocation2 + $0x70] sm:$0xff] (!%p1449_p13) }
 0x1fc   : > { %1719 = vmatprep.mubr.bf16.mxu0 (!%p1449_p13), %v904_v0  ;;  %1727 = vmatprep.mubr.bf16.mxu1 (!%p1449_p13), %v908_v18  ;;  %v893_v48 = vld [vmem:[#allocation2 + $0x28] sm:$0xff] (!%p1449_p13)  ;;  %v903_v20 = vld [vmem:[#allocation2 + $0x78] sm:$0xff] (!%p1449_p13)  ;;  %v907_v40 = vpack.c.bf16 (!%p1449_p13), %v895_v51, %v894_v50 }
 0x1fd   : > { %v901_v29 = vld [vmem:[#allocation2 + $0x68] sm:$0xff] (!%p1449_p13)  ;;  %v906_v30 = vpack.c.bf16 (!%p1449_p13), %v893_v48, %v892_v24  ;;  %v911_v35 = vpack.c.bf16 (!%p1449_p13), %v903_v20, %v902_v32 }
 0x1fe   : > { %1706 = vmatpush3.bf16.msra.mxu0 (!%p1449_p13), %v913_v58  ;;  %1792 = vmatpush3.bf16.msra.mxu1 (!%p1449_p13), %v913_v58  ;;  %v910_v31 = vpack.c.bf16 (!%p1449_p13), %v901_v29, %v900_v38 }
 0x1ff   : > { %1707 = vmatprep.subr.bf16.mxu0 %v914_v25  ;;  %1785 = vmatprep.subr.bf16.mxu1 %v914_v25 }
 0x202   : > { %1708 = vmatpush3.bf16.msra.mxu0 %v914_v25  ;;  %1793 = vmatpush3.bf16.msra.mxu1 %v914_v25 }
 0x203   : > { %1709 = vmatprep.subr.bf16.mxu0 %v915_v15  ;;  %1786 = vmatprep.subr.bf16.mxu1 %v915_v15 }
 0x206   : > { %1710 = vmatpush3.bf16.msra.mxu0 %v915_v15  ;;  %1794 = vmatpush3.bf16.msra.mxu1 %v915_v15 }
 0x207   : > { %1711 = vmatprep.subr.bf16.mxu0 %v916_v61  ;;  %1787 = vmatprep.subr.bf16.mxu1 %v916_v61 }
 0x20a   : > { %1712 = vmatpush3.bf16.msra.mxu0 %v916_v61  ;;  %1795 = vmatpush3.bf16.msra.mxu1 %v916_v61 }
 0x20b   : > { %1713 = vmatprep.subr.bf16.mxu0 %v917_v19  ;;  %1788 = vmatprep.subr.bf16.mxu1 %v917_v19 }
 0x20e   : > { %1714 = vmatpush3.bf16.msra.mxu0 %v917_v19  ;;  %1796 = vmatpush3.bf16.msra.mxu1 %v917_v19 }
 0x20f   : > { %1715 = vmatprep.subr.bf16.mxu0 %v918_v27  ;;  %1789 = vmatprep.subr.bf16.mxu1 %v918_v27 }
 0x212   : > { %1716 = vmatpush3.bf16.msra.mxu0 %v918_v27  ;;  %1797 = vmatpush3.bf16.msra.mxu1 %v918_v27 }
 0x213   : > { %1717 = vmatprep.subr.bf16.mxu0 %v919_v45  ;;  %1790 = vmatprep.subr.bf16.mxu1 %v919_v45 }
 0x216   : > { %1718 = vmatpush3.bf16.msra.mxu0 %v919_v45  ;;  %1798 = vmatpush3.bf16.msra.mxu1 %v919_v45 }
 0x219   : > { %1720 = vmatmul.mubr.bf16.vlgmr.msra.gmra.mrb[0].mxu0 %v905_v39  ;;  %1728 = vmatmul.mubr.bf16.vlgmr.msra.gmra.mrb[0].mxu1 %v909_v49 }
 0x21a   : > { %1723 = vmatprep.mubr.bf16.mxu0 %v906_v30  ;;  %1731 = vmatprep.mubr.bf16.mxu1 %v910_v31 }
 0x221   : > { %1724 = vmatmul.mubr.bf16.gmra.mrb[4].mxu0 %v907_v40  ;;  %1732 = vmatmul.mubr.bf16.gmra.mrb[4].mxu1 %v911_v35 }
 0x2ec   : > { %v1721_v36 = vpop.f32.mrb[0].mxu0  ;;  %v1729_v37 = vpop.f32.mrb[0].mxu1 }
 0x2ed   : > { %1019 = vst [vmem:[#allocation2 + $0x10] sm:$0xff] %v1721_v36  ;;  %1027 = vst [vmem:[#allocation2 + $0x50] sm:$0xff] %v1729_v37  ;;  %v954_v11 = vpop.f32.mrb[1].mxu0  ;;  %v986_v41 = vpop.f32.mrb[1].mxu1 }
 0x2ee   : > { %1017 = vst [vmem:[#allocation2] sm:$0xff] %v954_v11  ;;  %1025 = vst [vmem:[#allocation2 + $0x40] sm:$0xff] %v986_v41  ;;  %v1722_v42 = vpop.f32.mrb[2].mxu0  ;;  %v1730_v43 = vpop.f32.mrb[2].mxu1 }
 0x2ef   : > { %1020 = vst [vmem:[#allocation2 + $0x18] sm:$0xff] %v1722_v42  ;;  %1028 = vst [vmem:[#allocation2 + $0x58] sm:$0xff] %v1730_v43  ;;  %v957_v55 = vpop.f32.mrb[3].mxu0  ;;  %v989_v44 = vpop.f32.mrb[3].mxu1 }
 0x2f0   : > { %1018 = vst [vmem:[#allocation2 + $0x8] sm:$0xff] %v957_v55  ;;  %1026 = vst [vmem:[#allocation2 + $0x48] sm:$0xff] %v989_v44 }
 0x2f4   : > { %v1725_v56 = vpop.f32.mrb[4].mxu0  ;;  %v1733_v57 = vpop.f32.mrb[4].mxu1 }
 0x2f5   : > { %1023 = vst [vmem:[#allocation2 + $0x30] sm:$0xff] %v1725_v56  ;;  %1031 = vst [vmem:[#allocation2 + $0x70] sm:$0xff] %v1733_v57  ;;  %v970_v62 = vpop.f32.mrb[5].mxu0  ;;  %v1002_v63 = vpop.f32.mrb[5].mxu1 }
 0x2f6   : > { %1021 = vst [vmem:[#allocation2 + $0x20] sm:$0xff] %v970_v62  ;;  %1029 = vst [vmem:[#allocation2 + $0x60] sm:$0xff] %v1002_v63  ;;  %v1726_v21 = vpop.f32.mrb[6].mxu0  ;;  %v1734_v22 = vpop.f32.mrb[6].mxu1 }
 0x2f7   : > { %1024 = vst [vmem:[#allocation2 + $0x38] sm:$0xff] %v1726_v21  ;;  %1032 = vst [vmem:[#allocation2 + $0x78] sm:$0xff] %v1734_v22  ;;  %v973_v26 = vpop.f32.mrb[7].mxu0  ;;  %v1005_v28 = vpop.f32.mrb[7].mxu1 }
 0x2f8   : > { %1022 = vst [vmem:[#allocation2 + $0x28] sm:$0xff] %v973_v26  ;;  %1030 = vst [vmem:[#allocation2 + $0x68] sm:$0xff] %v1005_v28 }
 0x2f9 PF: > { %s1466_s14 = sshll.u32 %s2093_s29, 6  ;;  %v1033_v33 = vld [vmem:[#allocation2] sm:$0xff]  ;;  %v1034_v34 = vld [vmem:[#allocation2 + $0x8] sm:$0xff]  ;;  %v1035_v54 = vld [vmem:[#allocation2 + $0x10] sm:$0xff]  ;;  %vm1049_vm2 = vcmp.eq.s32.totalorder %v2298_v1, %v2300_v2  ;;  %vm1050_vm3 = vcmp.eq.s32.totalorder %v2305_v3, %v2300_v2  ;;  %vm1051_vm4 = vcmp.eq.s32.totalorder %v2308_v4, %v2300_v2  ;;  %vm1052_vm5 = vcmp.eq.s32.totalorder %v2311_v5, %v2300_v2  ;;  %s1147_s8 = scalar_lea.vmem %s2598_s3, %s2093_s29 }
 0x2fa   : > { %s2436_s20 = scalar_lea.vmem [#allocation8], %s1466_s14  ;;  %v1036_v53 = vld [vmem:[#allocation2 + $0x18] sm:$0xff]  ;;  %v2446_v1 = vsel %vm1049_vm2, 0.0, %v1033_v33  ;;  %v2448_v58 = vsel %vm1050_vm3, 0.0, %v1034_v34  ;;  %vm1053_vm6 = vcmp.eq.s32.totalorder %v2314_v6, %v2300_v2  ;;  %v2453_v4 = vsel %vm1051_vm4, 0.0, %v1035_v54  ;;  %v1041_v27 = vld [vmem:[#allocation2 + $0x40] sm:$0xff] }
 0x2fb   : > { %v1925_v17 = vld [vmem:[%s2436_s20] sm:$0xff]   ;;  %v1926_v52 = vld [vmem:[%s2436_s20 + $0x8] sm:$0xff]   ;;  %v1927_v3 = vld [vmem:[%s2436_s20 + $0x10] sm:$0xff]   ;;  %v1081_v59 = vadd.f32 %v2448_v58, %v2446_v1  ;;  %v2457_v5 = vsel %vm1052_vm5, 0.0, %v1036_v53  ;;  %vm1054_vm7 = vcmp.eq.s32.totalorder %v2320_v7, %v2300_v2  ;;  %vm1055_vm8 = vcmp.eq.s32.totalorder %v2323_v8, %v2300_v2  ;;  %s1815_s16 = smul.u32 48, %s2093_s29  ;;  %s1462_s21 = sshll.u32 %s2089_s28, 4 }
 0x2fc   : > { %1735 = vmatprep.subr.bf16.mxu0 %v1925_v17  ;;  %1799 = vmatprep.subr.bf16.mxu1 %v1925_v17  ;;  %v1928_v6 = vld [vmem:[%s2436_s20 + $0x18] sm:$0xff]   ;;  %vm1056_vm9 = vcmp.eq.s32.totalorder %v2326_v9, %v2300_v2  ;;  %v1929_v19 = vld [vmem:[%s2436_s20 + $0x20] sm:$0xff]   ;;  %vm1057_vm10 = vcmp.eq.s32.totalorder %v2329_v10, %v2300_v2  ;;  %v1042_v46 = vld [vmem:[#allocation2 + $0x48] sm:$0xff]  ;;  %s1348_s29 = sshll.u32 %s2406_s11, 4  ;;  %s2543_s24 = scalar_lea.sflag [#allocation7], %s195_s0  ;;  %s2533_s29 = int_to_ptr.vmem [resolvable:$true] %s1348_s29 }
 0x2fd   : > { %1736 = vmatpush3.bf16.msra.mxu0 %v1925_v17  ;;  %1807 = vmatpush3.bf16.msra.mxu1 %v1925_v17  ;;  %v1037_v16 = vld [vmem:[#allocation2 + $0x20] sm:$0xff]  ;;  %v1082_v14 = vadd.f32 %v1081_v59, %v2453_v4  ;;  %v1039_v0 = vld [vmem:[#allocation2 + $0x30] sm:$0xff]  ;;  %v1073_v47 = vsel %vm1057_vm10, 0.0, %v1041_v27  ;;  %v2625_v10 = vld [vmem:[#allocation19_spill] sm:$0xff]  ;;  %s2520_s15 = sadd.s32 %s1815_s16, %s1462_s21  ;;  %s2001_s6 = scalar_lea.vmem %s2533_s29, 2048 }
 0x2fe   : > { %1737 = vmatprep.subr.bf16.mxu0 %v1926_v52  ;;  %1800 = vmatprep.subr.bf16.mxu1 %v1926_v52  ;;  %v2462_v13 = vsel %vm1053_vm6, 0.0, %v1037_v16  ;;  %v1040_v15 = vld [vmem:[#allocation2 + $0x38] sm:$0xff]  ;;  %v2473_v61 = vsel %vm1055_vm8, 0.0, %v1039_v0  ;;  %v2624_v9 = vld [vmem:[#allocation18_spill] sm:$0xff]  ;;  %v1043_v24 = vld [vmem:[#allocation2 + $0x50] sm:$0xff]  ;;  %vm1059_vm12 = vcmp.eq.s32.totalorder %v2625_v10, %v2300_v2  ;;  %s1463_s28 = sshll.u32 %s2520_s15, 7  ;;  %p2002_p1 = scmp.ne.s32.totalorder %s2533_s29, %s2001_s6 }
 0x2ff   : > { %v1038_v60 = vld [vmem:[#allocation2 + $0x28] sm:$0xff]  ;;  %v1083_v18 = vadd.f32 %v1082_v14, %v2457_v5  ;;  %v2479_v45 = vsel %vm1056_vm9, 0.0, %v1040_v15  ;;  %vm1058_vm11 = vcmp.eq.s32.totalorder %v2624_v9, %v2300_v2  ;;  %v1930_v23 = vld [vmem:[%s2436_s20 + $0x28] sm:$0xff]   ;;  %v1044_v29 = vld [vmem:[#allocation2 + $0x58] sm:$0xff]  ;;  %v1075_v30 = vsel %vm1059_vm12, 0.0, %v1043_v24  ;;  %s2531_s23 = scalar_lea.hbm %s2599_s4, %s1463_s28  ;;  %p2631_p4 = scmp.ne.s32.totalorder %s2609_s12, 0 }
 0x300   : > { %v2468_v25 = vsel %vm1054_vm7, 0.0, %v1038_v60  ;;  %v1074_v38 = vsel %vm1058_vm11, 0.0, %v1042_v46  ;;  %v2626_v39 = vld [vmem:[#allocation20_spill] sm:$0xff]  ;;  %v1931_v31 = vld [vmem:[%s2436_s20 + $0x30] sm:$0xff]   ;;  %v1045_v50 = vld [vmem:[#allocation2 + $0x60] sm:$0xff]  ;;  %s2112_s7 = smov [#allocation10]  }
 0x301   : > { %1738 = vmatpush3.bf16.msra.mxu0 %v1926_v52  ;;  %1808 = vmatpush3.bf16.msra.mxu1 %v1926_v52  ;;  %v1084_v7 = vadd.f32 %v1083_v18, %v2462_v13  ;;  %vm1060_vm13 = vcmp.eq.s32.totalorder %v2626_v39, %v2300_v2  ;;  %v2627_v51 = vld [vmem:[#allocation21_spill] sm:$0xff]  ;;  %v1046_v40 = vld [vmem:[#allocation2 + $0x68] sm:$0xff]  ;;  %v2628_v35 = vld [vmem:[#allocation22_spill] sm:$0xff]  ;;  %p2003_p7 = pnand %p2002_p1, %p2631_p4  ;;  %s2005_s10 = sshll.u32 %s2112_s7, 4  ;;  %s2006_s10 = int_to_ptr.vmem [resolvable:$false] %s2005_s10 }
 0x302   : > { %1739 = vmatprep.subr.bf16.mxu0 %v1927_v3  ;;  %1801 = vmatprep.subr.bf16.mxu1 %v1927_v3  ;;  %vm1061_vm14 = vcmp.eq.s32.totalorder %v2627_v51, %v2300_v2  ;;  %v1076_v20 = vsel %vm1060_vm13, 0.0, %v1044_v29  ;;  %vm1062_vm15 = vcmp.eq.s32.totalorder %v2628_v35, %v2300_v2  ;;  %v1932_v11 = vld [vmem:[%s2436_s20 + $0x38] sm:$0xff]   ;;  %v2629_v42 = vld [vmem:[#allocation23_spill] sm:$0xff]  ;;  %v1048_v44 = vld [vmem:[#allocation2 + $0x78] sm:$0xff]  ;;  %s2007_s14 = scalar_lea.vmem %s2006_s10, 4096  ;;  %p2008_p9 = scmp.lt.s32.totalorder %s2533_s29, %s2006_s10 }
 0x303   : > { %v1085_v8 = vadd.f32 %v1084_v7, %v2468_v25  ;;  %v1077_v37 = vsel %vm1061_vm14, 0.0, %v1045_v50  ;;  %v1047_v41 = vld [vmem:[#allocation2 + $0x70] sm:$0xff]  ;;  %vm1063_vm0 = vcmp.eq.s32.totalorder %v2629_v42, %v2300_v2  ;;  %v1078_v55 = vsel %vm1062_vm15, 0.0, %v1046_v40  ;;  %v1452_v24 = vld [vmem:[%s1147_s8] ss:$0 sm:$0xff]  ;;  %p2004_p8 = pneg %p2003_p7  ;;  %p2009_p10 = scmp.lt.s32.totalorder %s2007_s14, %s2001_s6 }
 0x304   : > { %v2630_v56 = vld [vmem:[#allocation24_spill] sm:$0xff]  ;;  %v1079_v62 = vsel %vm1063_vm0, 0.0, %v1047_v41 }
 0x305   : > { %1740 = vmatpush3.bf16.msra.mxu0 %v1927_v3  ;;  %1809 = vmatpush3.bf16.msra.mxu1 %v1927_v3  ;;  %v1086_v12 = vadd.f32 %v1085_v8, %v2473_v61  ;;  %vm1064_vm1 = vcmp.eq.s32.totalorder %v2630_v56, %v2300_v2  ;;  %p2010_p12 = por %p2009_p10, %p2008_p9 }
 0x306   : > { %1741 = vmatprep.subr.bf16.mxu0 %v1928_v6  ;;  %1802 = vmatprep.subr.bf16.mxu1 %v1928_v6  ;;  %v1080_v21 = vsel %vm1064_vm1, 0.0, %v1048_v44 }
 0x307   : > { %v1087_v48 = vadd.f32 %v1086_v12, %v2479_v45  ;;  %p2011_p0 = pnand %p2010_p12, %p2004_p8 }
 0x309   : > { %1742 = vmatpush3.bf16.msra.mxu0 %v1928_v6  ;;  %1810 = vmatpush3.bf16.msra.mxu1 %v1928_v6  ;;  %v1088_v49 = vadd.f32 %v1087_v48, %v1073_v47 }
 0x30a   : > { %1743 = vmatprep.subr.bf16.mxu0 %v1929_v19  ;;  %1803 = vmatprep.subr.bf16.mxu1 %v1929_v19 }
 0x30b   : > { %v1089_v32 = vadd.f32 %v1088_v49, %v1074_v38 }
 0x30d   : > { %1744 = vmatpush3.bf16.msra.mxu0 %v1929_v19  ;;  %1811 = vmatpush3.bf16.msra.mxu1 %v1929_v19  ;;  %v1090_v36 = vadd.f32 %v1089_v32, %v1075_v30 }
 0x30e   : > { %1745 = vmatprep.subr.bf16.mxu0 %v1930_v23  ;;  %1804 = vmatprep.subr.bf16.mxu1 %v1930_v23 }
 0x30f   : > { %v1091_v43 = vadd.f32 %v1090_v36, %v1076_v20 }
 0x311   : > { %1746 = vmatpush3.bf16.msra.mxu0 %v1930_v23  ;;  %1812 = vmatpush3.bf16.msra.mxu1 %v1930_v23  ;;  %v1092_v57 = vadd.f32 %v1091_v43, %v1077_v37 }
 0x312   : > { %1747 = vmatprep.subr.bf16.mxu0 %v1931_v31  ;;  %1805 = vmatprep.subr.bf16.mxu1 %v1931_v31 }
 0x313   : > { %v1093_v63 = vadd.f32 %v1092_v57, %v1078_v55 }
 0x315   : > { %1748 = vmatpush3.bf16.msra.mxu0 %v1931_v31  ;;  %1813 = vmatpush3.bf16.msra.mxu1 %v1931_v31  ;;  %v1094_v22 = vadd.f32 %v1093_v63, %v1079_v62 }
 0x316   : > { %1749 = vmatprep.subr.bf16.mxu0 %v1932_v11  ;;  %1806 = vmatprep.subr.bf16.mxu1 %v1932_v11 }
 0x317   : > { %v1095_v26 = vadd.f32 %v1094_v22, %v1080_v21 }
 0x319   : > { %1750 = vmatpush3.bf16.msra.mxu0 %v1932_v11  ;;  %1814 = vmatpush3.bf16.msra.mxu1 %v1932_v11  ;;  %v1096_v28 = vrot.slane %v1095_v26, 4 }
 0x31b   : > { %v1097_v33 = vadd.f32 %v1096_v28, %v1095_v26 }
 0x31d   : > { %v1098_v34 = vrot.slane %v1097_v33, 2 }
 0x31f   : > { %v1099_v54 = vadd.f32 %v1098_v34, %v1097_v33 }
 0x321   : > { %v1100_v17 = vrot.slane %v1099_v54, 1 }
 0x323   : > { %v1101_v52 = vadd.f32 %v1100_v17, %v1099_v54 }
 0x325   : > { %v1102_v53 = vadd.f32 1e-06, %v1101_v52 }
 0x327   : > { %1933 = vrcp.f32 %v1102_v53 }
 0x331   : > { %v1934_v2 = vpop.eup %1933 }
 0x332   : > { %v1104_v16 = vmul.f32 %v1934_v2, %v2446_v1  ;;  %v1105_v3 = vmul.f32 %v1934_v2, %v2448_v58  ;;  %v1112_v59 = vmul.f32 %v1934_v2, %v1073_v47  ;;  %v1113_v60 = vmul.f32 %v1934_v2, %v1074_v38 }
 0x333   : > { %v1106_v14 = vmul.f32 %v1934_v2, %v2453_v4  ;;  %v1107_v6 = vmul.f32 %v1934_v2, %v2457_v5  ;;  %v1114_v0 = vmul.f32 %v1934_v2, %v1075_v30  ;;  %v1115_v18 = vmul.f32 %v1934_v2, %v1076_v20 }
 0x334   : > { %v1120_v15 = vpack.c.bf16 %v1105_v3, %v1104_v16  ;;  %v1124_v7 = vpack.c.bf16 %v1113_v60, %v1112_v59  ;;  %v1108_v19 = vmul.f32 %v1934_v2, %v2462_v13  ;;  %v1109_v27 = vmul.f32 %v1934_v2, %v2468_v25 }
 0x335   : > { %v1121_v8 = vpack.c.bf16 %v1107_v6, %v1106_v14  ;;  %v1125_v46 = vpack.c.bf16 %v1115_v18, %v1114_v0  ;;  %v1116_v9 = vmul.f32 %v1934_v2, %v1077_v37  ;;  %v1117_v1 = vmul.f32 %v1934_v2, %v1078_v55 }
 0x336   : > { %1751 = vmatprep.mubr.bf16.mxu0 %v1120_v15  ;;  %1759 = vmatprep.mubr.bf16.mxu1 %v1124_v7  ;;  %v1122_v58 = vpack.c.bf16 %v1109_v27, %v1108_v19  ;;  %v1110_v4 = vmul.f32 %v1934_v2, %v2473_v61  ;;  %v1111_v5 = vmul.f32 %v1934_v2, %v2479_v45 }
 0x337   : > { %1752 = vmatmul.mubr.bf16.vlgmr.msra.gmra.mrb[0].mxu0 %v1121_v8  ;;  %1760 = vmatmul.mubr.bf16.vlgmr.msra.gmra.mrb[0].mxu1 %v1125_v46  ;;  %v1126_v12 = vpack.c.bf16 %v1117_v1, %v1116_v9  ;;  %v1118_v47 = vmul.f32 %v1934_v2, %v1079_v62  ;;  %v1119_v23 = vmul.f32 %v1934_v2, %v1080_v21 }
 0x338   : > { %1755 = vmatprep.mubr.bf16.mxu0 %v1122_v58  ;;  %v1123_v13 = vpack.c.bf16 %v1111_v5, %v1110_v4 }
 0x339   : > { %1763 = vmatprep.mubr.bf16.mxu1 %v1126_v12  ;;  %v1127_v25 = vpack.c.bf16 %v1119_v23, %v1118_v47 }
 0x33f   : > { %1756 = vmatmul.mubr.bf16.gmra.mrb[4].mxu0 %v1123_v13  ;;  %1764 = vmatmul.mubr.bf16.gmra.mrb[4].mxu1 %v1127_v25 }
 0x40a   : > { %v1753_v10 = vpop.f32.mrb[0].mxu0  ;;  %v1761_v61 = vpop.f32.mrb[0].mxu1 }
 0x40b   : > { %v1246_v45 = vadd.f32 %v1753_v10, %v1452_v24  ;;  %v1278_v48 = vadd.f32 %v1761_v61, %v1452_v24  ;;  %v1237_v38 = vpop.f32.mrb[1].mxu0  ;;  %v1269_v29 = vpop.f32.mrb[1].mxu1 }
 0x40c   : > { %v1238_v39 = vadd.f32 %v1452_v24, %v1237_v38  ;;  %v1270_v49 = vadd.f32 %v1452_v24, %v1269_v29  ;;  %v1754_v30 = vpop.f32.mrb[2].mxu0  ;;  %v1762_v31 = vpop.f32.mrb[2].mxu1 }
 0x40d   : > { %v1302_v50 = vmax.f32 %v1246_v45, 0.0  ;;  %v1310_v51 = vmax.f32 %v1278_v48, 0.0  ;;  %v1249_v32 = vadd.f32 %v1754_v30, %v1452_v24  ;;  %v1281_v20 = vadd.f32 %v1762_v31, %v1452_v24  ;;  %v1240_v40 = vpop.f32.mrb[3].mxu0  ;;  %v1272_v35 = vpop.f32.mrb[3].mxu1 }
 0x40e   : > { %v1300_v36 = vmax.f32 %v1238_v39, 0.0  ;;  %v1308_v37 = vmax.f32 %v1270_v49, 0.0  ;;  %v1241_v11 = vadd.f32 %v1452_v24, %v1240_v40  ;;  %v1273_v41 = vadd.f32 %v1452_v24, %v1272_v35 }
 0x40f   : > { %1318 = vst [vmem:[%s2406_s11 + $0x10] sm:$0xff] %v1302_v50  ;;  %1326 = vst [vmem:[%s2406_s11 + $0x50] sm:$0xff] %v1310_v51  ;;  %v1303_v42 = vmax.f32 %v1249_v32, 0.0  ;;  %v1311_v43 = vmax.f32 %v1281_v20, 0.0 }
 0x410   : > { %1316 = vst [vmem:[%s2406_s11] sm:$0xff] %v1300_v36  ;;  %1324 = vst [vmem:[%s2406_s11 + $0x40] sm:$0xff] %v1308_v37  ;;  %v1301_v55 = vmax.f32 %v1241_v11, 0.0  ;;  %v1309_v44 = vmax.f32 %v1273_v41, 0.0 }
 0x411   : > { %1319 = vst [vmem:[%s2406_s11 + $0x18] sm:$0xff] %v1303_v42  ;;  %1327 = vst [vmem:[%s2406_s11 + $0x58] sm:$0xff] %v1311_v43 }
 0x412   : > { %1317 = vst [vmem:[%s2406_s11 + $0x8] sm:$0xff] %v1301_v55  ;;  %1325 = vst [vmem:[%s2406_s11 + $0x48] sm:$0xff] %v1309_v44  ;;  %v1757_v56 = vpop.f32.mrb[4].mxu0  ;;  %v1765_v57 = vpop.f32.mrb[4].mxu1 }
 0x413   : > { %v1262_v62 = vadd.f32 %v1757_v56, %v1452_v24  ;;  %v1294_v63 = vadd.f32 %v1765_v57, %v1452_v24  ;;  %v1253_v21 = vpop.f32.mrb[5].mxu0  ;;  %v1285_v22 = vpop.f32.mrb[5].mxu1 }
 0x414   : > { %v1254_v26 = vadd.f32 %v1452_v24, %v1253_v21  ;;  %v1286_v28 = vadd.f32 %v1452_v24, %v1285_v22  ;;  %v1758_v33 = vpop.f32.mrb[6].mxu0  ;;  %v1766_v34 = vpop.f32.mrb[6].mxu1 }
 0x415   : > { %v1306_v54 = vmax.f32 %v1262_v62, 0.0  ;;  %v1314_v17 = vmax.f32 %v1294_v63, 0.0  ;;  %v1265_v52 = vadd.f32 %v1758_v33, %v1452_v24  ;;  %v1297_v53 = vadd.f32 %v1766_v34, %v1452_v24  ;;  %v1256_v2 = vpop.f32.mrb[7].mxu0  ;;  %v1288_v16 = vpop.f32.mrb[7].mxu1 }
 0x416   : > { %v1304_v3 = vmax.f32 %v1254_v26, 0.0  ;;  %v1312_v59 = vmax.f32 %v1286_v28, 0.0  ;;  %v1257_v60 = vadd.f32 %v1452_v24, %v1256_v2  ;;  %v1289_v14 = vadd.f32 %v1452_v24, %v1288_v16 }
 0x417   : > { %1322 = vst [vmem:[%s2406_s11 + $0x30] sm:$0xff] %v1306_v54  ;;  %1330 = vst [vmem:[%s2406_s11 + $0x70] sm:$0xff] %v1314_v17  ;;  %v1307_v6 = vmax.f32 %v1265_v52, 0.0  ;;  %v1315_v0 = vmax.f32 %v1297_v53, 0.0 }
 0x418   : > { %1320 = vst [vmem:[%s2406_s11 + $0x20] sm:$0xff] %v1304_v3  ;;  %1328 = vst [vmem:[%s2406_s11 + $0x60] sm:$0xff] %v1312_v59  ;;  %v1305_v18 = vmax.f32 %v1257_v60, 0.0  ;;  %v1313_v15 = vmax.f32 %v1289_v14, 0.0 }
 0x419   : > { %1323 = vst [vmem:[%s2406_s11 + $0x38] sm:$0xff] %v1307_v6  ;;  %1331 = vst [vmem:[%s2406_s11 + $0x78] sm:$0xff] %v1315_v0 }
 0x41a   : > { %1321 = vst [vmem:[%s2406_s11 + $0x28] sm:$0xff] %v1305_v18  ;;  %1329 = vst [vmem:[%s2406_s11 + $0x68] sm:$0xff] %v1313_v15 }
 0x41b   : > { %2014 = shalt.err (!%p2011_p0)
}
 0x41c   : > { %s2015_s0 = scalar_lea.hbm %s2531_s23, 2048  ;;  %s2019_s9 = scalar_lea.hbm %s2599_s4, 18432 }
 0x41d   : > { %p2016_p2 = scmp.ne.s32.totalorder %s2531_s23, %s2015_s0  ;;  %p2020_p3 = scmp.lt.u32.totalorder %s2531_s23, %s2599_s4 }
 0x41e   : > { %p2021_p5 = scmp.lt.u32.totalorder %s2019_s9, %s2015_s0  ;;  %p2023_p1 = scmp.lt.u32.totalorder %s2015_s0, %s2531_s23 }
 0x41f   : > { %p2017_p6 = pnand %p2016_p2, %p2631_p4 }
 0x420   : > { %p2022_p13 = por %p2021_p5, %p2020_p3 }
 0x421   : > { %p2018_p11 = pneg %p2017_p6 }
 0x422   : > { %p2024_p7 = por %p2023_p1, %p2022_p13 }
 0x424   : > { %p2025_p8 = pnand %p2024_p7, %p2018_p11 }
 0x426   : > { %2028 = shalt.err (!%p2025_p8)
}
 0x427   : > { %s2113_s16 = smov 128   ;;  %s2114_s21 = smov 8  }
 0x428   : > { %1824 = dma.vmem_to_hbm [thread:$0]  (%p2631_p4), %s2533_s29, 2048, %s2531_s23, %s2543_s24, %s2113_s16, %s2113_s16, %s2114_s21  }
 0x429 PF: > { %p1841_p9 = scmp.ge.s32.totalorder %s2105_s5, 2  ;;  %s1363_s15 = sand.u32 1, %s2077_s25  }
 0x42a   : > { %p2632_p10 = scmp.ne.s32.totalorder %s2611_s13, 0  ;;  %s1364_s28 = scalar_lea.sflag [#allocation7], %s1363_s15 }
 0x42c   : > { %p1834_p12 = pnand %p1841_p9, %p2632_p10 }
 0x42e   : > { %2072 = dma.done.wait (!%p1834_p12), %s1364_s28, 2048  }
 0x42f   : > { %2074 = vsyncadd (!%p1834_p12), %s1364_s28, 4294965248  ;;  %s23_s5 = sadd.s32 1, %s2105_s5   ;;  %s2633_s29 = sld [smem:[#allocation15_spill]] }
 0x430   : > { %p20_p0 = scmp.ge.s32.totalorder %s23_s5, 11   ;;  %s2634_s12 = sld [smem:[#allocation16_spill]] }
 0x431   : > { %s2635_s0 = sld [smem:[#allocation17_spill]]  ;;  %s2636_s25 = smov %s2081_s26 }
 0x432   : > { %s2637_s26 = smov %s2085_s27  ;;  %s2638_s27 = smov %s2231_s18 }
 0x433   : > { %s2639_s28 = smov %s2097_s30  ;;  %22 = sbr.rel (!%p20_p0) target bundleno = 19 (0x13), region = 90 }
 0x436   : > { %s2640_s30 = smov %s2634_s12 }
 0x43a   :  { %1369 = vsyncpa [#allocation6], 1 }
 0x43b   :  { %1371 = vsyncpa [#allocation6 + $0x1], 1 }
 0x43c   :  { %1372 = vsyncpa [#allocation9], 1 }
 0x43d   :  { %1373 = vsyncpa [#allocation7], 1 }
 0x43e   :  { %1375 = vsyncpa [#allocation7 + $0x1], 1 }

</bundles_post_ra>
